<compile_context>
chip_gen: v5e
topology: v5e:2x2
jax: 0.10.0
libtpu: 0.0.40
codegen_flags: <defaults>
</compile_context>

<pallas_src>
import jax
import jax.numpy as jnp
from jax.experimental import pallas as pl
from jax.experimental.pallas import tpu as pltpu


def _ape_kernel(x_ref, peh_ref, pew_ref, w1_ref, w2_ref, ox_ref, feat_ref):
    """One batch-block (block_b elements) per grid step.

    x_ref    : (Bb, C, S)    input block, NCHW-native, S = H*W on the lane axis
    peh_ref  : (S, C)        height PE, pre-expanded: peh_ref[h*W+w, c] = pe_height[h, c]
    pew_ref  : (S, C)        width  PE, pre-expanded: pew_ref[h*W+w, c] = pe_width[w, c]
    w1_ref   : (C, C//2)     first Linear (no bias), stored (in, out)
    w2_ref   : (C//2, 2C)    second Linear (no bias), stored (in, out)
    ox_ref   : (Bb, W, H*C)  flattened (b, w, h, c) output: x + positional encoding
    feat_ref : (S, Bb*C)     flattened (s, b, c) output: `feature`
    """
    Bb, C, S = x_ref.shape
    W = ox_ref.shape[1]
    H = S // W

    for bb in range(Bb):  # static unroll, Bb <= 8
        # (C, S) -> (S, C): the only layout change, done once in VMEM (XLU),
        # replacing the full HBM transpose pass the old wrapper did.
        xt = jnp.transpose(x_ref[bb].astype(jnp.float32))          # (S, C)

        # inter = mean over all spatial positions (native axis reduce, no reshape)
        inter = jnp.mean(xt, axis=0, keepdims=True)                # (1, C)

        # inter_fc: Linear(C, C//2) -> ReLU -> Linear(C//2, 2C) -> Sigmoid
        h1 = jnp.maximum(
            jnp.dot(inter, w1_ref[...], preferred_element_type=jnp.float32), 0.0)
        z = jnp.dot(h1, w2_ref[...], preferred_element_type=jnp.float32)  # (1, 2C)
        alpha = pl.reciprocal(1.0 + jnp.exp(-z), approx=False)            # sigmoid

        a_h = alpha[:, :C]                                          # scales height PE
        a_w = alpha[:, C:]                                          # scales width PE

        # y[s, c] = x[c, s] + a_h[c]*pe_h[h(s), c] + a_w[c]*pe_w[w(s), c]
        y = (xt + a_h * peh_ref[...] + a_w * pew_ref[...]).astype(ox_ref.dtype)  # (S, C)

        # feature[h*W+w, b, c]  <-  y      (one lane-dense band store)
        feat_ref[:, bb * C:(bb + 1) * C] = y

        # x_out[b, w, h, c]     <-  y[h*W+w, c]   (H lane-dense band stores)
        for h in range(H):
            ox_ref[bb, :, h * C:(h + 1) * C] = y[h * W:(h + 1) * W, :]


def _pick_block_b(B, C):
    """Batch elements per grid step.

    Prefer 8 (bigger per-step blocks; still >=2 parallel grid steps when B>=16).
    block_b*C must be a multiple of 128 so the flattened `feature` block stays
    lane-aligned; otherwise fall back to covering the whole batch in one block
    (block == full array dims, always layout-legal).
    """
    for cand in (8, 4, 2):
        if B % cand == 0 and (cand * C) % 128 == 0:
            return cand
    return B


def adaptive_2d_pos_encoding(x_nchw, pe_height, pe_width, w1, w2, *, block_b=None):
    """x_nchw: (B, C, H, W); pe_height: (H, C); pe_width: (W, C);
    w1: (C, C//2), w2: (C//2, 2C), both (in, out), no bias.
    Returns (x_bwhc, feature) exactly like the torch module's forward."""
    B, C, H, W = x_nchw.shape
    S = H * W
    if block_b is None:
        block_b = _pick_block_b(B, C)
    assert B % block_b == 0
    nb = B // block_b

    # Free, contiguous reshape (no HBM pass): NCHW -> (B, C, S).
    x_flat = x_nchw.reshape(B, C, S)

    # Pre-expand the tiny PE tables once to (S, C) in (s = h*W + w, c) order so the
    # kernel computes `pos` with pure elementwise VPU work in its native layout.
    peh_sc = jnp.broadcast_to(pe_height[:, None, :], (H, W, C)).reshape(S, C)
    pew_sc = jnp.broadcast_to(pe_width[None, :, :], (H, W, C)).reshape(S, C)

    dtype = x_nchw.dtype
    itemsize = jnp.dtype(dtype).itemsize
    blk_bytes = block_b * C * S * itemsize          # x block == x_out block == feature block
    const_bytes = (2 * S * C + C * (C // 2) + (C // 2) * 2 * C) * 4
    # double-buffered in/out blocks + resident constants + headroom for in-kernel temporaries
    vmem_need = 2 * 3 * blk_bytes + 2 * const_bytes + 3 * S * C * 4 + (2 << 20)
    vmem_limit = int(min(max(vmem_need, 32 << 20), 48 << 20))   # stay < ~48 MiB for v7x

    out_x_flat, feat_flat = pl.pallas_call(
        _ape_kernel,
        out_shape=(
            jax.ShapeDtypeStruct((B, W, H * C), dtype),   # (b, w, h*C + c): lane-dense
            jax.ShapeDtypeStruct((S, B * C), dtype),      # (h*W + w, b*C + c): lane-dense
        ),
        grid_spec=pltpu.PrefetchScalarGridSpec(
            num_scalar_prefetch=0,
            grid=(nb,),
            in_specs=[
                pl.BlockSpec((block_b, C, S), lambda b: (b, 0, 0)),
                pl.BlockSpec((S, C), lambda b: (0, 0)),
                pl.BlockSpec((S, C), lambda b: (0, 0)),
                pl.BlockSpec((C, C // 2), lambda b: (0, 0)),
                pl.BlockSpec((C // 2, 2 * C), lambda b: (0, 0)),
            ],
            out_specs=(
                pl.BlockSpec((block_b, W, H * C), lambda b: (b, 0, 0)),
                pl.BlockSpec((S, block_b * C), lambda b: (0, b)),
            ),
        ),
        compiler_params=pltpu.CompilerParams(
            dimension_semantics=("parallel",),
            vmem_limit_bytes=vmem_limit,
        ),
    )(x_flat, peh_sc, pew_sc, w1, w2)

    # Free reshapes back to the module's output shapes.
    x_out = out_x_flat.reshape(B, W, H, C)
    feature = feat_flat.reshape(S, B, C)
    return x_out, feature


def make_sinusoid_pe(length, emb_dim):
    """Replicates the module's PE table (it uses sin for both even & odd columns)."""
    pos = jnp.arange(length, dtype=jnp.float32)[:, None]
    denom = 10000.0 ** (jnp.arange(0, emb_dim, 2, dtype=jnp.float32) / emb_dim)
    vals = jnp.sin(pos / denom)                  # (length, emb_dim // 2)
    pe = jnp.zeros((length, emb_dim), jnp.float32)
    pe = pe.at[:, 0::2].set(vals)
    pe = pe.at[:, 1::2].set(vals)
    return pe


def _reference(x_nchw, pe_height, pe_width, w1, w2):
    """Pure-JAX replica of the torch forward, for a correctness check."""
    x = jnp.transpose(x_nchw, (0, 3, 2, 1))                     # (B, W, H, C)
    B, W, H, C = x.shape
    inter = jnp.mean(x, axis=(1, 2))                            # (B, C)
    alpha = jax.nn.sigmoid(jax.nn.relu(inter @ w1) @ w2)        # (B, 2C)
    a = alpha.reshape(B, 2, 1, C)
    pos = (a[:, 0:1, :, :] * pe_height[None, None, :, :]        # pe_height buffer (1,1,H,C)
           + a[:, 1:2, :, :] * pe_width[None, :, None, :])      # pe_width  buffer (1,W,1,C)
    x = x + pos
    feature = jnp.transpose(x, (2, 1, 0, 3)).reshape(H * W, B, C)
    return x, feature


if __name__ == "__main__":
    def run_case(B, C, H, W, seed):
        key = jax.random.PRNGKey(seed)
        kx, k1, k2 = jax.random.split(key, 3)
        x = jax.random.normal(kx, (B, C, H, W), dtype=jnp.float32)
        # deterministic "Linear" weights stored (in, out) so the kernel does x @ W
        w1 = jax.random.normal(k1, (C, C // 2), dtype=jnp.float32) * (1.0 / jnp.sqrt(C))
        w2 = jax.random.normal(k2, (C // 2, 2 * C), dtype=jnp.float32) * (1.0 / jnp.sqrt(C // 2))
        pe_h = make_sinusoid_pe(H, C)            # (H, C)
        pe_w = make_sinusoid_pe(W, C)            # (W, C)

        x_out, feature = adaptive_2d_pos_encoding(x, pe_h, pe_w, w1, w2)
        jax.block_until_ready((x_out, feature))

        x_ref, feat_ref = _reference(x, pe_h, pe_w, w1, w2)
        assert x_out.shape == (B, W, H, C) and feature.shape == (H * W, B, C)
        assert jnp.allclose(x_out, x_ref, atol=2e-4, rtol=2e-4)
        assert jnp.allclose(feature, feat_ref, atol=2e-4, rtol=2e-4)

    # main case: lane-dense C=128, block_b=8 -> 2 parallel grid steps (v7x-friendly)
    run_case(B=16, C=128, H=8, W=16, seed=0)
    # fallback path: small batch not divisible by 8 -> whole batch in one block
    run_case(B=2, C=64, H=8, W=16, seed=1)

    print("KERNEL_OK")
</pallas_src>

<mosaic_0001>
module attributes {stable_mosaic.version = 11 : i64} {
  func.func @_ape_kernel(%arg0: i32, %arg1: memref<8x128x128xf32, #tpu.memory_space<vmem>>, %arg2: memref<128x128xf32, #tpu.memory_space<vmem>>, %arg3: memref<128x128xf32, #tpu.memory_space<vmem>>, %arg4: memref<128x64xf32, #tpu.memory_space<vmem>>, %arg5: memref<64x256xf32, #tpu.memory_space<vmem>>, %arg6: memref<8x16x1024xf32, #tpu.memory_space<vmem>>, %arg7: memref<128x1024xf32, #tpu.memory_space<vmem>>) attributes {dimension_semantics = [#tpu.dimension_semantics<parallel>], iteration_bounds = array<i64: 2>, scalar_prefetch = 0 : i64, scratch_operands = 0 : i64, tpu.core_type = #tpu.core_type<tc>, window_params = [{transform_indices = @transform_0, window_bounds = array<i64: 8, 128, 128>}, {pipeline_mode = #tpu.pipeline_mode<synchronous>, transform_indices = @transform_1, window_bounds = array<i64: 128, 128>}, {pipeline_mode = #tpu.pipeline_mode<synchronous>, transform_indices = @transform_2, window_bounds = array<i64: 128, 128>}, {pipeline_mode = #tpu.pipeline_mode<synchronous>, transform_indices = @transform_3, window_bounds = array<i64: 128, 64>}, {pipeline_mode = #tpu.pipeline_mode<synchronous>, transform_indices = @transform_4, window_bounds = array<i64: 64, 256>}, {transform_indices = @transform_5, window_bounds = array<i64: 8, 16, 1024>}, {transform_indices = @transform_6, window_bounds = array<i64: 128, 1024>}]} {
    %c0 = arith.constant 0 : index
    %c0_0 = arith.constant 0 : index
    %c0_1 = arith.constant 0 : index
    %0 = vector.load %arg1[%c0, %c0_0, %c0_1] : memref<8x128x128xf32, #tpu.memory_space<vmem>>, vector<1x128x128xf32>
    %1 = vector.shape_cast %0 : vector<1x128x128xf32> to vector<128x128xf32>
    %2 = tpu.transpose %1, [1, 0] : vector<128x128xf32> -> vector<128x128xf32>
    %cst = arith.constant dense<0.000000e+00> : vector<128xf32>
    %3 = vector.multi_reduction <add>, %2, %cst [0] : vector<128x128xf32> to vector<128xf32>
    %4 = vector.shape_cast %3 : vector<128xf32> to vector<1x128xf32>
    %cst_2 = arith.constant 1.280000e+02 : f32
    %5 = vector.broadcast %cst_2 : f32 to vector<1x128xf32>
    %6 = arith.divf %4, %5 : vector<1x128xf32>
    %c0_3 = arith.constant 0 : index
    %c0_4 = arith.constant 0 : index
    %7 = vector.load %arg4[%c0_3, %c0_4] : memref<128x64xf32, #tpu.memory_space<vmem>>, vector<128x64xf32>
    %cst_5 = arith.constant dense<0.000000e+00> : vector<1x64xf32>
    %8 = tpu.matmul %6, %7, %cst_5 {dimension_numbers = #tpu.dot_dimension_numbers<[1], [0], [0], [1], [0, 0, 1, 1], [], []>} : vector<1x128xf32>, vector<128x64xf32>, vector<1x64xf32> -> vector<1x64xf32>
    %cst_6 = arith.constant 0.000000e+00 : f32
    %9 = vector.broadcast %cst_6 : f32 to vector<1x64xf32>
    %10 = arith.maximumf %8, %9 : vector<1x64xf32>
    %c0_7 = arith.constant 0 : index
    %c0_8 = arith.constant 0 : index
    %11 = vector.load %arg5[%c0_7, %c0_8] : memref<64x256xf32, #tpu.memory_space<vmem>>, vector<64x256xf32>
    %cst_9 = arith.constant dense<0.000000e+00> : vector<1x256xf32>
    %12 = tpu.matmul %10, %11, %cst_9 {dimension_numbers = #tpu.dot_dimension_numbers<[1], [0], [0], [1], [0, 0, 1, 1], [], []>} : vector<1x64xf32>, vector<64x256xf32>, vector<1x256xf32> -> vector<1x256xf32>
    %cst_10 = arith.constant 0.000000e+00 : f32
    %13 = vector.broadcast %cst_10 : f32 to vector<1x256xf32>
    %14 = arith.subf %13, %12 : vector<1x256xf32>
    %15 = math.exp %14 : vector<1x256xf32>
    %cst_11 = arith.constant 1.000000e+00 : f32
    %16 = vector.broadcast %cst_11 : f32 to vector<1x256xf32>
    %17 = arith.addf %16, %15 : vector<1x256xf32>
    %18 = tpu.reciprocal %17 : vector<1x256xf32> -> vector<1x256xf32>
    %19 = vector.extract_strided_slice %18 {offsets = [0, 0], sizes = [1, 128], strides = [1, 1]} : vector<1x256xf32> to vector<1x128xf32>
    %20 = vector.extract_strided_slice %18 {offsets = [0, 128], sizes = [1, 128], strides = [1, 1]} : vector<1x256xf32> to vector<1x128xf32>
    %c0_12 = arith.constant 0 : index
    %c0_13 = arith.constant 0 : index
    %21 = vector.load %arg2[%c0_12, %c0_13] : memref<128x128xf32, #tpu.memory_space<vmem>>, vector<128x128xf32>
    %22 = vector.broadcast %19 : vector<1x128xf32> to vector<128x128xf32>
    %23 = arith.mulf %22, %21 : vector<128x128xf32>
    %24 = arith.addf %2, %23 : vector<128x128xf32>
    %c0_14 = arith.constant 0 : index
    %c0_15 = arith.constant 0 : index
    %25 = vector.load %arg3[%c0_14, %c0_15] : memref<128x128xf32, #tpu.memory_space<vmem>>, vector<128x128xf32>
    %26 = vector.broadcast %20 : vector<1x128xf32> to vector<128x128xf32>
    %27 = arith.mulf %26, %25 : vector<128x128xf32>
    %28 = arith.addf %24, %27 : vector<128x128xf32>
    %c0_16 = arith.constant 0 : index
    %c0_17 = arith.constant 0 : index
    %29 = vector.load %arg7[%c0_16, %c0_17] : memref<128x1024xf32, #tpu.memory_space<vmem>>, vector<128x128xf32>
    tpu.vector_store %arg7[%c0_16, %c0_17], %28 {strides = array<i32>} : memref<128x1024xf32, #tpu.memory_space<vmem>>, vector<128x128xf32>,
    %30 = vector.extract_strided_slice %28 {offsets = [0, 0], sizes = [16, 128], strides = [1, 1]} : vector<128x128xf32> to vector<16x128xf32>
    %c0_18 = arith.constant 0 : index
    %c0_19 = arith.constant 0 : index
    %c0_20 = arith.constant 0 : index
    %31 = vector.load %arg6[%c0_18, %c0_19, %c0_20] : memref<8x16x1024xf32, #tpu.memory_space<vmem>>, vector<1x16x128xf32>
    %32 = vector.shape_cast %31 : vector<1x16x128xf32> to vector<16x128xf32>
    %33 = vector.shape_cast %30 : vector<16x128xf32> to vector<1x16x128xf32>
    tpu.vector_store %arg6[%c0_18, %c0_19, %c0_20], %33 {strides = array<i32>} : memref<8x16x1024xf32, #tpu.memory_space<vmem>>, vector<1x16x128xf32>,
    %34 = vector.extract_strided_slice %28 {offsets = [16, 0], sizes = [16, 128], strides = [1, 1]} : vector<128x128xf32> to vector<16x128xf32>
    %c0_21 = arith.constant 0 : index
    %c0_22 = arith.constant 0 : index
    %c128 = arith.constant 128 : index
    %35 = vector.load %arg6[%c0_21, %c0_22, %c128] : memref<8x16x1024xf32, #tpu.memory_space<vmem>>, vector<1x16x128xf32>
    %36 = vector.shape_cast %35 : vector<1x16x128xf32> to vector<16x128xf32>
    %37 = vector.shape_cast %34 : vector<16x128xf32> to vector<1x16x128xf32>
    tpu.vector_store %arg6[%c0_21, %c0_22, %c128], %37 {strides = array<i32>} : memref<8x16x1024xf32, #tpu.memory_space<vmem>>, vector<1x16x128xf32>,
    %38 = vector.extract_strided_slice %28 {offsets = [32, 0], sizes = [16, 128], strides = [1, 1]} : vector<128x128xf32> to vector<16x128xf32>
    %c0_23 = arith.constant 0 : index
    %c0_24 = arith.constant 0 : index
    %c256 = arith.constant 256 : index
    %39 = vector.load %arg6[%c0_23, %c0_24, %c256] : memref<8x16x1024xf32, #tpu.memory_space<vmem>>, vector<1x16x128xf32>
    %40 = vector.shape_cast %39 : vector<1x16x128xf32> to vector<16x128xf32>
    %41 = vector.shape_cast %38 : vector<16x128xf32> to vector<1x16x128xf32>
    tpu.vector_store %arg6[%c0_23, %c0_24, %c256], %41 {strides = array<i32>} : memref<8x16x1024xf32, #tpu.memory_space<vmem>>, vector<1x16x128xf32>,
    %42 = vector.extract_strided_slice %28 {offsets = [48, 0], sizes = [16, 128], strides = [1, 1]} : vector<128x128xf32> to vector<16x128xf32>
    %c0_25 = arith.constant 0 : index
    %c0_26 = arith.constant 0 : index
    %c384 = arith.constant 384 : index
    %43 = vector.load %arg6[%c0_25, %c0_26, %c384] : memref<8x16x1024xf32, #tpu.memory_space<vmem>>, vector<1x16x128xf32>
    %44 = vector.shape_cast %43 : vector<1x16x128xf32> to vector<16x128xf32>
    %45 = vector.shape_cast %42 : vector<16x128xf32> to vector<1x16x128xf32>
    tpu.vector_store %arg6[%c0_25, %c0_26, %c384], %45 {strides = array<i32>} : memref<8x16x1024xf32, #tpu.memory_space<vmem>>, vector<1x16x128xf32>,
    %46 = vector.extract_strided_slice %28 {offsets = [64, 0], sizes = [16, 128], strides = [1, 1]} : vector<128x128xf32> to vector<16x128xf32>
    %c0_27 = arith.constant 0 : index
    %c0_28 = arith.constant 0 : index
    %c512 = arith.constant 512 : index
    %47 = vector.load %arg6[%c0_27, %c0_28, %c512] : memref<8x16x1024xf32, #tpu.memory_space<vmem>>, vector<1x16x128xf32>
    %48 = vector.shape_cast %47 : vector<1x16x128xf32> to vector<16x128xf32>
    %49 = vector.shape_cast %46 : vector<16x128xf32> to vector<1x16x128xf32>
    tpu.vector_store %arg6[%c0_27, %c0_28, %c512], %49 {strides = array<i32>} : memref<8x16x1024xf32, #tpu.memory_space<vmem>>, vector<1x16x128xf32>,
    %50 = vector.extract_strided_slice %28 {offsets = [80, 0], sizes = [16, 128], strides = [1, 1]} : vector<128x128xf32> to vector<16x128xf32>
    %c0_29 = arith.constant 0 : index
    %c0_30 = arith.constant 0 : index
    %c640 = arith.constant 640 : index
    %51 = vector.load %arg6[%c0_29, %c0_30, %c640] : memref<8x16x1024xf32, #tpu.memory_space<vmem>>, vector<1x16x128xf32>
    %52 = vector.shape_cast %51 : vector<1x16x128xf32> to vector<16x128xf32>
    %53 = vector.shape_cast %50 : vector<16x128xf32> to vector<1x16x128xf32>
    tpu.vector_store %arg6[%c0_29, %c0_30, %c640], %53 {strides = array<i32>} : memref<8x16x1024xf32, #tpu.memory_space<vmem>>, vector<1x16x128xf32>,
    %54 = vector.extract_strided_slice %28 {offsets = [96, 0], sizes = [16, 128], strides = [1, 1]} : vector<128x128xf32> to vector<16x128xf32>
    %c0_31 = arith.constant 0 : index
    %c0_32 = arith.constant 0 : index
    %c768 = arith.constant 768 : index
    %55 = vector.load %arg6[%c0_31, %c0_32, %c768] : memref<8x16x1024xf32, #tpu.memory_space<vmem>>, vector<1x16x128xf32>
    %56 = vector.shape_cast %55 : vector<1x16x128xf32> to vector<16x128xf32>
    %57 = vector.shape_cast %54 : vector<16x128xf32> to vector<1x16x128xf32>
    tpu.vector_store %arg6[%c0_31, %c0_32, %c768], %57 {strides = array<i32>} : memref<8x16x1024xf32, #tpu.memory_space<vmem>>, vector<1x16x128xf32>,
    %58 = vector.extract_strided_slice %28 {offsets = [112, 0], sizes = [16, 128], strides = [1, 1]} : vector<128x128xf32> to vector<16x128xf32>
    %c0_33 = arith.constant 0 : index
    %c0_34 = arith.constant 0 : index
    %c896 = arith.constant 896 : index
    %59 = vector.load %arg6[%c0_33, %c0_34, %c896] : memref<8x16x1024xf32, #tpu.memory_space<vmem>>, vector<1x16x128xf32>
    %60 = vector.shape_cast %59 : vector<1x16x128xf32> to vector<16x128xf32>
    %61 = vector.shape_cast %58 : vector<16x128xf32> to vector<1x16x128xf32>
    tpu.vector_store %arg6[%c0_33, %c0_34, %c896], %61 {strides = array<i32>} : memref<8x16x1024xf32, #tpu.memory_space<vmem>>, vector<1x16x128xf32>,
    %c1 = arith.constant 1 : index
    %c0_35 = arith.constant 0 : index
    %c0_36 = arith.constant 0 : index
    %62 = vector.load %arg1[%c1, %c0_35, %c0_36] : memref<8x128x128xf32, #tpu.memory_space<vmem>>, vector<1x128x128xf32>
    %63 = vector.shape_cast %62 : vector<1x128x128xf32> to vector<128x128xf32>
    %64 = tpu.transpose %63, [1, 0] : vector<128x128xf32> -> vector<128x128xf32>
    %cst_37 = arith.constant dense<0.000000e+00> : vector<128xf32>
    %65 = vector.multi_reduction <add>, %64, %cst_37 [0] : vector<128x128xf32> to vector<128xf32>
    %66 = vector.shape_cast %65 : vector<128xf32> to vector<1x128xf32>
    %cst_38 = arith.constant 1.280000e+02 : f32
    %67 = vector.broadcast %cst_38 : f32 to vector<1x128xf32>
    %68 = arith.divf %66, %67 : vector<1x128xf32>
    %c0_39 = arith.constant 0 : index
    %c0_40 = arith.constant 0 : index
    %69 = vector.load %arg4[%c0_39, %c0_40] : memref<128x64xf32, #tpu.memory_space<vmem>>, vector<128x64xf32>
    %cst_41 = arith.constant dense<0.000000e+00> : vector<1x64xf32>
    %70 = tpu.matmul %68, %69, %cst_41 {dimension_numbers = #tpu.dot_dimension_numbers<[1], [0], [0], [1], [0, 0, 1, 1], [], []>} : vector<1x128xf32>, vector<128x64xf32>, vector<1x64xf32> -> vector<1x64xf32>
    %cst_42 = arith.constant 0.000000e+00 : f32
    %71 = vector.broadcast %cst_42 : f32 to vector<1x64xf32>
    %72 = arith.maximumf %70, %71 : vector<1x64xf32>
    %c0_43 = arith.constant 0 : index
    %c0_44 = arith.constant 0 : index
    %73 = vector.load %arg5[%c0_43, %c0_44] : memref<64x256xf32, #tpu.memory_space<vmem>>, vector<64x256xf32>
    %cst_45 = arith.constant dense<0.000000e+00> : vector<1x256xf32>
    %74 = tpu.matmul %72, %73, %cst_45 {dimension_numbers = #tpu.dot_dimension_numbers<[1], [0], [0], [1], [0, 0, 1, 1], [], []>} : vector<1x64xf32>, vector<64x256xf32>, vector<1x256xf32> -> vector<1x256xf32>
    %cst_46 = arith.constant 0.000000e+00 : f32
    %75 = vector.broadcast %cst_46 : f32 to vector<1x256xf32>
    %76 = arith.subf %75, %74 : vector<1x256xf32>
    %77 = math.exp %76 : vector<1x256xf32>
    %cst_47 = arith.constant 1.000000e+00 : f32
    %78 = vector.broadcast %cst_47 : f32 to vector<1x256xf32>
    %79 = arith.addf %78, %77 : vector<1x256xf32>
    %80 = tpu.reciprocal %79 : vector<1x256xf32> -> vector<1x256xf32>
    %81 = vector.extract_strided_slice %80 {offsets = [0, 0], sizes = [1, 128], strides = [1, 1]} : vector<1x256xf32> to vector<1x128xf32>
    %82 = vector.extract_strided_slice %80 {offsets = [0, 128], sizes = [1, 128], strides = [1, 1]} : vector<1x256xf32> to vector<1x128xf32>
    %c0_48 = arith.constant 0 : index
    %c0_49 = arith.constant 0 : index
    %83 = vector.load %arg2[%c0_48, %c0_49] : memref<128x128xf32, #tpu.memory_space<vmem>>, vector<128x128xf32>
    %84 = vector.broadcast %81 : vector<1x128xf32> to vector<128x128xf32>
    %85 = arith.mulf %84, %83 : vector<128x128xf32>
    %86 = arith.addf %64, %85 : vector<128x128xf32>
    %c0_50 = arith.constant 0 : index
    %c0_51 = arith.constant 0 : index
    %87 = vector.load %arg3[%c0_50, %c0_51] : memref<128x128xf32, #tpu.memory_space<vmem>>, vector<128x128xf32>
    %88 = vector.broadcast %82 : vector<1x128xf32> to vector<128x128xf32>
    %89 = arith.mulf %88, %87 : vector<128x128xf32>
    %90 = arith.addf %86, %89 : vector<128x128xf32>
    %c0_52 = arith.constant 0 : index
    %c128_53 = arith.constant 128 : index
    %91 = vector.load %arg7[%c0_52, %c128_53] : memref<128x1024xf32, #tpu.memory_space<vmem>>, vector<128x128xf32>
    tpu.vector_store %arg7[%c0_52, %c128_53], %90 {strides = array<i32>} : memref<128x1024xf32, #tpu.memory_space<vmem>>, vector<128x128xf32>,
    %92 = vector.extract_strided_slice %90 {offsets = [0, 0], sizes = [16, 128], strides = [1, 1]} : vector<128x128xf32> to vector<16x128xf32>
    %c1_54 = arith.constant 1 : index
    %c0_55 = arith.constant 0 : index
    %c0_56 = arith.constant 0 : index
    %93 = vector.load %arg6[%c1_54, %c0_55, %c0_56] : memref<8x16x1024xf32, #tpu.memory_space<vmem>>, vector<1x16x128xf32>
    %94 = vector.shape_cast %93 : vector<1x16x128xf32> to vector<16x128xf32>
    %95 = vector.shape_cast %92 : vector<16x128xf32> to vector<1x16x128xf32>
    tpu.vector_store %arg6[%c1_54, %c0_55, %c0_56], %95 {strides = array<i32>} : memref<8x16x1024xf32, #tpu.memory_space<vmem>>, vector<1x16x128xf32>,
    %96 = vector.extract_strided_slice %90 {offsets = [16, 0], sizes = [16, 128], strides = [1, 1]} : vector<128x128xf32> to vector<16x128xf32>
    %c1_57 = arith.constant 1 : index
    %c0_58 = arith.constant 0 : index
    %c128_59 = arith.constant 128 : index
    %97 = vector.load %arg6[%c1_57, %c0_58, %c128_59] : memref<8x16x1024xf32, #tpu.memory_space<vmem>>, vector<1x16x128xf32>
    %98 = vector.shape_cast %97 : vector<1x16x128xf32> to vector<16x128xf32>
    %99 = vector.shape_cast %96 : vector<16x128xf32> to vector<1x16x128xf32>
    tpu.vector_store %arg6[%c1_57, %c0_58, %c128_59], %99 {strides = array<i32>} : memref<8x16x1024xf32, #tpu.memory_space<vmem>>, vector<1x16x128xf32>,
    %100 = vector.extract_strided_slice %90 {offsets = [32, 0], sizes = [16, 128], strides = [1, 1]} : vector<128x128xf32> to vector<16x128xf32>
    %c1_60 = arith.constant 1 : index
    %c0_61 = arith.constant 0 : index
    %c256_62 = arith.constant 256 : index
    %101 = vector.load %arg6[%c1_60, %c0_61, %c256_62] : memref<8x16x1024xf32, #tpu.memory_space<vmem>>, vector<1x16x128xf32>
    %102 = vector.shape_cast %101 : vector<1x16x128xf32> to vector<16x128xf32>
    %103 = vector.shape_cast %100 : vector<16x128xf32> to vector<1x16x128xf32>
    tpu.vector_store %arg6[%c1_60, %c0_61, %c256_62], %103 {strides = array<i32>} : memref<8x16x1024xf32, #tpu.memory_space<vmem>>, vector<1x16x128xf32>,
    %104 = vector.extract_strided_slice %90 {offsets = [48, 0], sizes = [16, 128], strides = [1, 1]} : vector<128x128xf32> to vector<16x128xf32>
    %c1_63 = arith.constant 1 : index
    %c0_64 = arith.constant 0 : index
    %c384_65 = arith.constant 384 : index
    %105 = vector.load %arg6[%c1_63, %c0_64, %c384_65] : memref<8x16x1024xf32, #tpu.memory_space<vmem>>, vector<1x16x128xf32>
    %106 = vector.shape_cast %105 : vector<1x16x128xf32> to vector<16x128xf32>
    %107 = vector.shape_cast %104 : vector<16x128xf32> to vector<1x16x128xf32>
    tpu.vector_store %arg6[%c1_63, %c0_64, %c384_65], %107 {strides = array<i32>} : memref<8x16x1024xf32, #tpu.memory_space<vmem>>, vector<1x16x128xf32>,
    %108 = vector.extract_strided_slice %90 {offsets = [64, 0], sizes = [16, 128], strides = [1, 1]} : vector<128x128xf32> to vector<16x128xf32>
    %c1_66 = arith.constant 1 : index
    %c0_67 = arith.constant 0 : index
    %c512_68 = arith.constant 512 : index
    %109 = vector.load %arg6[%c1_66, %c0_67, %c512_68] : memref<8x16x1024xf32, #tpu.memory_space<vmem>>, vector<1x16x128xf32>
    %110 = vector.shape_cast %109 : vector<1x16x128xf32> to vector<16x128xf32>
    %111 = vector.shape_cast %108 : vector<16x128xf32> to vector<1x16x128xf32>
    tpu.vector_store %arg6[%c1_66, %c0_67, %c512_68], %111 {strides = array<i32>} : memref<8x16x1024xf32, #tpu.memory_space<vmem>>, vector<1x16x128xf32>,
    %112 = vector.extract_strided_slice %90 {offsets = [80, 0], sizes = [16, 128], strides = [1, 1]} : vector<128x128xf32> to vector<16x128xf32>
    %c1_69 = arith.constant 1 : index
    %c0_70 = arith.constant 0 : index
    %c640_71 = arith.constant 640 : index
    %113 = vector.load %arg6[%c1_69, %c0_70, %c640_71] : memref<8x16x1024xf32, #tpu.memory_space<vmem>>, vector<1x16x128xf32>
    %114 = vector.shape_cast %113 : vector<1x16x128xf32> to vector<16x128xf32>
    %115 = vector.shape_cast %112 : vector<16x128xf32> to vector<1x16x128xf32>
    tpu.vector_store %arg6[%c1_69, %c0_70, %c640_71], %115 {strides = array<i32>} : memref<8x16x1024xf32, #tpu.memory_space<vmem>>, vector<1x16x128xf32>,
    %116 = vector.extract_strided_slice %90 {offsets = [96, 0], sizes = [16, 128], strides = [1, 1]} : vector<128x128xf32> to vector<16x128xf32>
    %c1_72 = arith.constant 1 : index
    %c0_73 = arith.constant 0 : index
    %c768_74 = arith.constant 768 : index
    %117 = vector.load %arg6[%c1_72, %c0_73, %c768_74] : memref<8x16x1024xf32, #tpu.memory_space<vmem>>, vector<1x16x128xf32>
    %118 = vector.shape_cast %117 : vector<1x16x128xf32> to vector<16x128xf32>
    %119 = vector.shape_cast %116 : vector<16x128xf32> to vector<1x16x128xf32>
    tpu.vector_store %arg6[%c1_72, %c0_73, %c768_74], %119 {strides = array<i32>} : memref<8x16x1024xf32, #tpu.memory_space<vmem>>, vector<1x16x128xf32>,
    %120 = vector.extract_strided_slice %90 {offsets = [112, 0], sizes = [16, 128], strides = [1, 1]} : vector<128x128xf32> to vector<16x128xf32>
    %c1_75 = arith.constant 1 : index
    %c0_76 = arith.constant 0 : index
    %c896_77 = arith.constant 896 : index
    %121 = vector.load %arg6[%c1_75, %c0_76, %c896_77] : memref<8x16x1024xf32, #tpu.memory_space<vmem>>, vector<1x16x128xf32>
    %122 = vector.shape_cast %121 : vector<1x16x128xf32> to vector<16x128xf32>
    %123 = vector.shape_cast %120 : vector<16x128xf32> to vector<1x16x128xf32>
    tpu.vector_store %arg6[%c1_75, %c0_76, %c896_77], %123 {strides = array<i32>} : memref<8x16x1024xf32, #tpu.memory_space<vmem>>, vector<1x16x128xf32>,
    %c2 = arith.constant 2 : index
    %c0_78 = arith.constant 0 : index
    %c0_79 = arith.constant 0 : index
    %124 = vector.load %arg1[%c2, %c0_78, %c0_79] : memref<8x128x128xf32, #tpu.memory_space<vmem>>, vector<1x128x128xf32>
    %125 = vector.shape_cast %124 : vector<1x128x128xf32> to vector<128x128xf32>
    %126 = tpu.transpose %125, [1, 0] : vector<128x128xf32> -> vector<128x128xf32>
    %cst_80 = arith.constant dense<0.000000e+00> : vector<128xf32>
    %127 = vector.multi_reduction <add>, %126, %cst_80 [0] : vector<128x128xf32> to vector<128xf32>
    %128 = vector.shape_cast %127 : vector<128xf32> to vector<1x128xf32>
    %cst_81 = arith.constant 1.280000e+02 : f32
    %129 = vector.broadcast %cst_81 : f32 to vector<1x128xf32>
    %130 = arith.divf %128, %129 : vector<1x128xf32>
    %c0_82 = arith.constant 0 : index
    %c0_83 = arith.constant 0 : index
    %131 = vector.load %arg4[%c0_82, %c0_83] : memref<128x64xf32, #tpu.memory_space<vmem>>, vector<128x64xf32>
    %cst_84 = arith.constant dense<0.000000e+00> : vector<1x64xf32>
    %132 = tpu.matmul %130, %131, %cst_84 {dimension_numbers = #tpu.dot_dimension_numbers<[1], [0], [0], [1], [0, 0, 1, 1], [], []>} : vector<1x128xf32>, vector<128x64xf32>, vector<1x64xf32> -> vector<1x64xf32>
    %cst_85 = arith.constant 0.000000e+00 : f32
    %133 = vector.broadcast %cst_85 : f32 to vector<1x64xf32>
    %134 = arith.maximumf %132, %133 : vector<1x64xf32>
    %c0_86 = arith.constant 0 : index
    %c0_87 = arith.constant 0 : index
    %135 = vector.load %arg5[%c0_86, %c0_87] : memref<64x256xf32, #tpu.memory_space<vmem>>, vector<64x256xf32>
    %cst_88 = arith.constant dense<0.000000e+00> : vector<1x256xf32>
    %136 = tpu.matmul %134, %135, %cst_88 {dimension_numbers = #tpu.dot_dimension_numbers<[1], [0], [0], [1], [0, 0, 1, 1], [], []>} : vector<1x64xf32>, vector<64x256xf32>, vector<1x256xf32> -> vector<1x256xf32>
    %cst_89 = arith.constant 0.000000e+00 : f32
    %137 = vector.broadcast %cst_89 : f32 to vector<1x256xf32>
    %138 = arith.subf %137, %136 : vector<1x256xf32>
    %139 = math.exp %138 : vector<1x256xf32>
    %cst_90 = arith.constant 1.000000e+00 : f32
    %140 = vector.broadcast %cst_90 : f32 to vector<1x256xf32>
    %141 = arith.addf %140, %139 : vector<1x256xf32>
    %142 = tpu.reciprocal %141 : vector<1x256xf32> -> vector<1x256xf32>
    %143 = vector.extract_strided_slice %142 {offsets = [0, 0], sizes = [1, 128], strides = [1, 1]} : vector<1x256xf32> to vector<1x128xf32>
    %144 = vector.extract_strided_slice %142 {offsets = [0, 128], sizes = [1, 128], strides = [1, 1]} : vector<1x256xf32> to vector<1x128xf32>
    %c0_91 = arith.constant 0 : index
    %c0_92 = arith.constant 0 : index
    %145 = vector.load %arg2[%c0_91, %c0_92] : memref<128x128xf32, #tpu.memory_space<vmem>>, vector<128x128xf32>
    %146 = vector.broadcast %143 : vector<1x128xf32> to vector<128x128xf32>
    %147 = arith.mulf %146, %145 : vector<128x128xf32>
    %148 = arith.addf %126, %147 : vector<128x128xf32>
    %c0_93 = arith.constant 0 : index
    %c0_94 = arith.constant 0 : index
    %149 = vector.load %arg3[%c0_93, %c0_94] : memref<128x128xf32, #tpu.memory_space<vmem>>, vector<128x128xf32>
    %150 = vector.broadcast %144 : vector<1x128xf32> to vector<128x128xf32>
    %151 = arith.mulf %150, %149 : vector<128x128xf32>
    %152 = arith.addf %148, %151 : vector<128x128xf32>
    %c0_95 = arith.constant 0 : index
    %c256_96 = arith.constant 256 : index
    %153 = vector.load %arg7[%c0_95, %c256_96] : memref<128x1024xf32, #tpu.memory_space<vmem>>, vector<128x128xf32>
    tpu.vector_store %arg7[%c0_95, %c256_96], %152 {strides = array<i32>} : memref<128x1024xf32, #tpu.memory_space<vmem>>, vector<128x128xf32>,
    %154 = vector.extract_strided_slice %152 {offsets = [0, 0], sizes = [16, 128], strides = [1, 1]} : vector<128x128xf32> to vector<16x128xf32>
    %c2_97 = arith.constant 2 : index
    %c0_98 = arith.constant 0 : index
    %c0_99 = arith.constant 0 : index
    %155 = vector.load %arg6[%c2_97, %c0_98, %c0_99] : memref<8x16x1024xf32, #tpu.memory_space<vmem>>, vector<1x16x128xf32>
    %156 = vector.shape_cast %155 : vector<1x16x128xf32> to vector<16x128xf32>
    %157 = vector.shape_cast %154 : vector<16x128xf32> to vector<1x16x128xf32>
    tpu.vector_store %arg6[%c2_97, %c0_98, %c0_99], %157 {strides = array<i32>} : memref<8x16x1024xf32, #tpu.memory_space<vmem>>, vector<1x16x128xf32>,
    %158 = vector.extract_strided_slice %152 {offsets = [16, 0], sizes = [16, 128], strides = [1, 1]} : vector<128x128xf32> to vector<16x128xf32>
    %c2_100 = arith.constant 2 : index
    %c0_101 = arith.constant 0 : index
    %c128_102 = arith.constant 128 : index
    %159 = vector.load %arg6[%c2_100, %c0_101, %c128_102] : memref<8x16x1024xf32, #tpu.memory_space<vmem>>, vector<1x16x128xf32>
    %160 = vector.shape_cast %159 : vector<1x16x128xf32> to vector<16x128xf32>
    %161 = vector.shape_cast %158 : vector<16x128xf32> to vector<1x16x128xf32>
    tpu.vector_store %arg6[%c2_100, %c0_101, %c128_102], %161 {strides = array<i32>} : memref<8x16x1024xf32, #tpu.memory_space<vmem>>, vector<1x16x128xf32>,
    %162 = vector.extract_strided_slice %152 {offsets = [32, 0], sizes = [16, 128], strides = [1, 1]} : vector<128x128xf32> to vector<16x128xf32>
    %c2_103 = arith.constant 2 : index
    %c0_104 = arith.constant 0 : index
    %c256_105 = arith.constant 256 : index
    %163 = vector.load %arg6[%c2_103, %c0_104, %c256_105] : memref<8x16x1024xf32, #tpu.memory_space<vmem>>, vector<1x16x128xf32>
    %164 = vector.shape_cast %163 : vector<1x16x128xf32> to vector<16x128xf32>
    %165 = vector.shape_cast %162 : vector<16x128xf32> to vector<1x16x128xf32>
    tpu.vector_store %arg6[%c2_103, %c0_104, %c256_105], %165 {strides = array<i32>} : memref<8x16x1024xf32, #tpu.memory_space<vmem>>, vector<1x16x128xf32>,
    %166 = vector.extract_strided_slice %152 {offsets = [48, 0], sizes = [16, 128], strides = [1, 1]} : vector<128x128xf32> to vector<16x128xf32>
    %c2_106 = arith.constant 2 : index
    %c0_107 = arith.constant 0 : index
    %c384_108 = arith.constant 384 : index
    %167 = vector.load %arg6[%c2_106, %c0_107, %c384_108] : memref<8x16x1024xf32, #tpu.memory_space<vmem>>, vector<1x16x128xf32>
    %168 = vector.shape_cast %167 : vector<1x16x128xf32> to vector<16x128xf32>
    %169 = vector.shape_cast %166 : vector<16x128xf32> to vector<1x16x128xf32>
    tpu.vector_store %arg6[%c2_106, %c0_107, %c384_108], %169 {strides = array<i32>} : memref<8x16x1024xf32, #tpu.memory_space<vmem>>, vector<1x16x128xf32>,
    %170 = vector.extract_strided_slice %152 {offsets = [64, 0], sizes = [16, 128], strides = [1, 1]} : vector<128x128xf32> to vector<16x128xf32>
    %c2_109 = arith.constant 2 : index
    %c0_110 = arith.constant 0 : index
    %c512_111 = arith.constant 512 : index
    %171 = vector.load %arg6[%c2_109, %c0_110, %c512_111] : memref<8x16x1024xf32, #tpu.memory_space<vmem>>, vector<1x16x128xf32>
    %172 = vector.shape_cast %171 : vector<1x16x128xf32> to vector<16x128xf32>
    %173 = vector.shape_cast %170 : vector<16x128xf32> to vector<1x16x128xf32>
    tpu.vector_store %arg6[%c2_109, %c0_110, %c512_111], %173 {strides = array<i32>} : memref<8x16x1024xf32, #tpu.memory_space<vmem>>, vector<1x16x128xf32>,
    %174 = vector.extract_strided_slice %152 {offsets = [80, 0], sizes = [16, 128], strides = [1, 1]} : vector<128x128xf32> to vector<16x128xf32>
    %c2_112 = arith.constant 2 : index
    %c0_113 = arith.constant 0 : index
    %c640_114 = arith.constant 640 : index
    %175 = vector.load %arg6[%c2_112, %c0_113, %c640_114] : memref<8x16x1024xf32, #tpu.memory_space<vmem>>, vector<1x16x128xf32>
    %176 = vector.shape_cast %175 : vector<1x16x128xf32> to vector<16x128xf32>
    %177 = vector.shape_cast %174 : vector<16x128xf32> to vector<1x16x128xf32>
    tpu.vector_store %arg6[%c2_112, %c0_113, %c640_114], %177 {strides = array<i32>} : memref<8x16x1024xf32, #tpu.memory_space<vmem>>, vector<1x16x128xf32>,
    %178 = vector.extract_strided_slice %152 {offsets = [96, 0], sizes = [16, 128], strides = [1, 1]} : vector<128x128xf32> to vector<16x128xf32>
    %c2_115 = arith.constant 2 : index
    %c0_116 = arith.constant 0 : index
    %c768_117 = arith.constant 768 : index
    %179 = vector.load %arg6[%c2_115, %c0_116, %c768_117] : memref<8x16x1024xf32, #tpu.memory_space<vmem>>, vector<1x16x128xf32>
    %180 = vector.shape_cast %179 : vector<1x16x128xf32> to vector<16x128xf32>
    %181 = vector.shape_cast %178 : vector<16x128xf32> to vector<1x16x128xf32>
    tpu.vector_store %arg6[%c2_115, %c0_116, %c768_117], %181 {strides = array<i32>} : memref<8x16x1024xf32, #tpu.memory_space<vmem>>, vector<1x16x128xf32>,
    %182 = vector.extract_strided_slice %152 {offsets = [112, 0], sizes = [16, 128], strides = [1, 1]} : vector<128x128xf32> to vector<16x128xf32>
    %c2_118 = arith.constant 2 : index
    %c0_119 = arith.constant 0 : index
    %c896_120 = arith.constant 896 : index
    %183 = vector.load %arg6[%c2_118, %c0_119, %c896_120] : memref<8x16x1024xf32, #tpu.memory_space<vmem>>, vector<1x16x128xf32>
    %184 = vector.shape_cast %183 : vector<1x16x128xf32> to vector<16x128xf32>
    %185 = vector.shape_cast %182 : vector<16x128xf32> to vector<1x16x128xf32>
    tpu.vector_store %arg6[%c2_118, %c0_119, %c896_120], %185 {strides = array<i32>} : memref<8x16x1024xf32, #tpu.memory_space<vmem>>, vector<1x16x128xf32>,
    %c3 = arith.constant 3 : index
    %c0_121 = arith.constant 0 : index
    %c0_122 = arith.constant 0 : index
    %186 = vector.load %arg1[%c3, %c0_121, %c0_122] : memref<8x128x128xf32, #tpu.memory_space<vmem>>, vector<1x128x128xf32>
    %187 = vector.shape_cast %186 : vector<1x128x128xf32> to vector<128x128xf32>
    %188 = tpu.transpose %187, [1, 0] : vector<128x128xf32> -> vector<128x128xf32>
    %cst_123 = arith.constant dense<0.000000e+00> : vector<128xf32>
    %189 = vector.multi_reduction <add>, %188, %cst_123 [0] : vector<128x128xf32> to vector<128xf32>
    %190 = vector.shape_cast %189 : vector<128xf32> to vector<1x128xf32>
    %cst_124 = arith.constant 1.280000e+02 : f32
    %191 = vector.broadcast %cst_124 : f32 to vector<1x128xf32>
    %192 = arith.divf %190, %191 : vector<1x128xf32>
    %c0_125 = arith.constant 0 : index
    %c0_126 = arith.constant 0 : index
    %193 = vector.load %arg4[%c0_125, %c0_126] : memref<128x64xf32, #tpu.memory_space<vmem>>, vector<128x64xf32>
    %cst_127 = arith.constant dense<0.000000e+00> : vector<1x64xf32>
    %194 = tpu.matmul %192, %193, %cst_127 {dimension_numbers = #tpu.dot_dimension_numbers<[1], [0], [0], [1], [0, 0, 1, 1], [], []>} : vector<1x128xf32>, vector<128x64xf32>, vector<1x64xf32> -> vector<1x64xf32>
    %cst_128 = arith.constant 0.000000e+00 : f32
    %195 = vector.broadcast %cst_128 : f32 to vector<1x64xf32>
    %196 = arith.maximumf %194, %195 : vector<1x64xf32>
    %c0_129 = arith.constant 0 : index
    %c0_130 = arith.constant 0 : index
    %197 = vector.load %arg5[%c0_129, %c0_130] : memref<64x256xf32, #tpu.memory_space<vmem>>, vector<64x256xf32>
    %cst_131 = arith.constant dense<0.000000e+00> : vector<1x256xf32>
    %198 = tpu.matmul %196, %197, %cst_131 {dimension_numbers = #tpu.dot_dimension_numbers<[1], [0], [0], [1], [0, 0, 1, 1], [], []>} : vector<1x64xf32>, vector<64x256xf32>, vector<1x256xf32> -> vector<1x256xf32>
    %cst_132 = arith.constant 0.000000e+00 : f32
    %199 = vector.broadcast %cst_132 : f32 to vector<1x256xf32>
    %200 = arith.subf %199, %198 : vector<1x256xf32>
    %201 = math.exp %200 : vector<1x256xf32>
    %cst_133 = arith.constant 1.000000e+00 : f32
    %202 = vector.broadcast %cst_133 : f32 to vector<1x256xf32>
    %203 = arith.addf %202, %201 : vector<1x256xf32>
    %204 = tpu.reciprocal %203 : vector<1x256xf32> -> vector<1x256xf32>
    %205 = vector.extract_strided_slice %204 {offsets = [0, 0], sizes = [1, 128], strides = [1, 1]} : vector<1x256xf32> to vector<1x128xf32>
    %206 = vector.extract_strided_slice %204 {offsets = [0, 128], sizes = [1, 128], strides = [1, 1]} : vector<1x256xf32> to vector<1x128xf32>
    %c0_134 = arith.constant 0 : index
    %c0_135 = arith.constant 0 : index
    %207 = vector.load %arg2[%c0_134, %c0_135] : memref<128x128xf32, #tpu.memory_space<vmem>>, vector<128x128xf32>
    %208 = vector.broadcast %205 : vector<1x128xf32> to vector<128x128xf32>
    %209 = arith.mulf %208, %207 : vector<128x128xf32>
    %210 = arith.addf %188, %209 : vector<128x128xf32>
    %c0_136 = arith.constant 0 : index
    %c0_137 = arith.constant 0 : index
    %211 = vector.load %arg3[%c0_136, %c0_137] : memref<128x128xf32, #tpu.memory_space<vmem>>, vector<128x128xf32>
    %212 = vector.broadcast %206 : vector<1x128xf32> to vector<128x128xf32>
    %213 = arith.mulf %212, %211 : vector<128x128xf32>
    %214 = arith.addf %210, %213 : vector<128x128xf32>
    %c0_138 = arith.constant 0 : index
    %c384_139 = arith.constant 384 : index
    %215 = vector.load %arg7[%c0_138, %c384_139] : memref<128x1024xf32, #tpu.memory_space<vmem>>, vector<128x128xf32>
    tpu.vector_store %arg7[%c0_138, %c384_139], %214 {strides = array<i32>} : memref<128x1024xf32, #tpu.memory_space<vmem>>, vector<128x128xf32>,
    %216 = vector.extract_strided_slice %214 {offsets = [0, 0], sizes = [16, 128], strides = [1, 1]} : vector<128x128xf32> to vector<16x128xf32>
    %c3_140 = arith.constant 3 : index
    %c0_141 = arith.constant 0 : index
    %c0_142 = arith.constant 0 : index
    %217 = vector.load %arg6[%c3_140, %c0_141, %c0_142] : memref<8x16x1024xf32, #tpu.memory_space<vmem>>, vector<1x16x128xf32>
    %218 = vector.shape_cast %217 : vector<1x16x128xf32> to vector<16x128xf32>
    %219 = vector.shape_cast %216 : vector<16x128xf32> to vector<1x16x128xf32>
    tpu.vector_store %arg6[%c3_140, %c0_141, %c0_142], %219 {strides = array<i32>} : memref<8x16x1024xf32, #tpu.memory_space<vmem>>, vector<1x16x128xf32>,
    %220 = vector.extract_strided_slice %214 {offsets = [16, 0], sizes = [16, 128], strides = [1, 1]} : vector<128x128xf32> to vector<16x128xf32>
    %c3_143 = arith.constant 3 : index
    %c0_144 = arith.constant 0 : index
    %c128_145 = arith.constant 128 : index
    %221 = vector.load %arg6[%c3_143, %c0_144, %c128_145] : memref<8x16x1024xf32, #tpu.memory_space<vmem>>, vector<1x16x128xf32>
    %222 = vector.shape_cast %221 : vector<1x16x128xf32> to vector<16x128xf32>
    %223 = vector.shape_cast %220 : vector<16x128xf32> to vector<1x16x128xf32>
    tpu.vector_store %arg6[%c3_143, %c0_144, %c128_145], %223 {strides = array<i32>} : memref<8x16x1024xf32, #tpu.memory_space<vmem>>, vector<1x16x128xf32>,
    %224 = vector.extract_strided_slice %214 {offsets = [32, 0], sizes = [16, 128], strides = [1, 1]} : vector<128x128xf32> to vector<16x128xf32>
    %c3_146 = arith.constant 3 : index
    %c0_147 = arith.constant 0 : index
    %c256_148 = arith.constant 256 : index
    %225 = vector.load %arg6[%c3_146, %c0_147, %c256_148] : memref<8x16x1024xf32, #tpu.memory_space<vmem>>, vector<1x16x128xf32>
    %226 = vector.shape_cast %225 : vector<1x16x128xf32> to vector<16x128xf32>
    %227 = vector.shape_cast %224 : vector<16x128xf32> to vector<1x16x128xf32>
    tpu.vector_store %arg6[%c3_146, %c0_147, %c256_148], %227 {strides = array<i32>} : memref<8x16x1024xf32, #tpu.memory_space<vmem>>, vector<1x16x128xf32>,
    %228 = vector.extract_strided_slice %214 {offsets = [48, 0], sizes = [16, 128], strides = [1, 1]} : vector<128x128xf32> to vector<16x128xf32>
    %c3_149 = arith.constant 3 : index
    %c0_150 = arith.constant 0 : index
    %c384_151 = arith.constant 384 : index
    %229 = vector.load %arg6[%c3_149, %c0_150, %c384_151] : memref<8x16x1024xf32, #tpu.memory_space<vmem>>, vector<1x16x128xf32>
    %230 = vector.shape_cast %229 : vector<1x16x128xf32> to vector<16x128xf32>
    %231 = vector.shape_cast %228 : vector<16x128xf32> to vector<1x16x128xf32>
    tpu.vector_store %arg6[%c3_149, %c0_150, %c384_151], %231 {strides = array<i32>} : memref<8x16x1024xf32, #tpu.memory_space<vmem>>, vector<1x16x128xf32>,
    %232 = vector.extract_strided_slice %214 {offsets = [64, 0], sizes = [16, 128], strides = [1, 1]} : vector<128x128xf32> to vector<16x128xf32>
    %c3_152 = arith.constant 3 : index
    %c0_153 = arith.constant 0 : index
    %c512_154 = arith.constant 512 : index
    %233 = vector.load %arg6[%c3_152, %c0_153, %c512_154] : memref<8x16x1024xf32, #tpu.memory_space<vmem>>, vector<1x16x128xf32>
    %234 = vector.shape_cast %233 : vector<1x16x128xf32> to vector<16x128xf32>
    %235 = vector.shape_cast %232 : vector<16x128xf32> to vector<1x16x128xf32>
    tpu.vector_store %arg6[%c3_152, %c0_153, %c512_154], %235 {strides = array<i32>} : memref<8x16x1024xf32, #tpu.memory_space<vmem>>, vector<1x16x128xf32>,
    %236 = vector.extract_strided_slice %214 {offsets = [80, 0], sizes = [16, 128], strides = [1, 1]} : vector<128x128xf32> to vector<16x128xf32>
    %c3_155 = arith.constant 3 : index
    %c0_156 = arith.constant 0 : index
    %c640_157 = arith.constant 640 : index
    %237 = vector.load %arg6[%c3_155, %c0_156, %c640_157] : memref<8x16x1024xf32, #tpu.memory_space<vmem>>, vector<1x16x128xf32>
    %238 = vector.shape_cast %237 : vector<1x16x128xf32> to vector<16x128xf32>
    %239 = vector.shape_cast %236 : vector<16x128xf32> to vector<1x16x128xf32>
    tpu.vector_store %arg6[%c3_155, %c0_156, %c640_157], %239 {strides = array<i32>} : memref<8x16x1024xf32, #tpu.memory_space<vmem>>, vector<1x16x128xf32>,
    %240 = vector.extract_strided_slice %214 {offsets = [96, 0], sizes = [16, 128], strides = [1, 1]} : vector<128x128xf32> to vector<16x128xf32>
    %c3_158 = arith.constant 3 : index
    %c0_159 = arith.constant 0 : index
    %c768_160 = arith.constant 768 : index
    %241 = vector.load %arg6[%c3_158, %c0_159, %c768_160] : memref<8x16x1024xf32, #tpu.memory_space<vmem>>, vector<1x16x128xf32>
    %242 = vector.shape_cast %241 : vector<1x16x128xf32> to vector<16x128xf32>
    %243 = vector.shape_cast %240 : vector<16x128xf32> to vector<1x16x128xf32>
    tpu.vector_store %arg6[%c3_158, %c0_159, %c768_160], %243 {strides = array<i32>} : memref<8x16x1024xf32, #tpu.memory_space<vmem>>, vector<1x16x128xf32>,
    %244 = vector.extract_strided_slice %214 {offsets = [112, 0], sizes = [16, 128], strides = [1, 1]} : vector<128x128xf32> to vector<16x128xf32>
    %c3_161 = arith.constant 3 : index
    %c0_162 = arith.constant 0 : index
    %c896_163 = arith.constant 896 : index
    %245 = vector.load %arg6[%c3_161, %c0_162, %c896_163] : memref<8x16x1024xf32, #tpu.memory_space<vmem>>, vector<1x16x128xf32>
    %246 = vector.shape_cast %245 : vector<1x16x128xf32> to vector<16x128xf32>
    %247 = vector.shape_cast %244 : vector<16x128xf32> to vector<1x16x128xf32>
    tpu.vector_store %arg6[%c3_161, %c0_162, %c896_163], %247 {strides = array<i32>} : memref<8x16x1024xf32, #tpu.memory_space<vmem>>, vector<1x16x128xf32>,
    %c4 = arith.constant 4 : index
    %c0_164 = arith.constant 0 : index
    %c0_165 = arith.constant 0 : index
    %248 = vector.load %arg1[%c4, %c0_164, %c0_165] : memref<8x128x128xf32, #tpu.memory_space<vmem>>, vector<1x128x128xf32>
    %249 = vector.shape_cast %248 : vector<1x128x128xf32> to vector<128x128xf32>
    %250 = tpu.transpose %249, [1, 0] : vector<128x128xf32> -> vector<128x128xf32>
    %cst_166 = arith.constant dense<0.000000e+00> : vector<128xf32>
    %251 = vector.multi_reduction <add>, %250, %cst_166 [0] : vector<128x128xf32> to vector<128xf32>
    %252 = vector.shape_cast %251 : vector<128xf32> to vector<1x128xf32>
    %cst_167 = arith.constant 1.280000e+02 : f32
    %253 = vector.broadcast %cst_167 : f32 to vector<1x128xf32>
    %254 = arith.divf %252, %253 : vector<1x128xf32>
    %c0_168 = arith.constant 0 : index
    %c0_169 = arith.constant 0 : index
    %255 = vector.load %arg4[%c0_168, %c0_169] : memref<128x64xf32, #tpu.memory_space<vmem>>, vector<128x64xf32>
    %cst_170 = arith.constant dense<0.000000e+00> : vector<1x64xf32>
    %256 = tpu.matmul %254, %255, %cst_170 {dimension_numbers = #tpu.dot_dimension_numbers<[1], [0], [0], [1], [0, 0, 1, 1], [], []>} : vector<1x128xf32>, vector<128x64xf32>, vector<1x64xf32> -> vector<1x64xf32>
    %cst_171 = arith.constant 0.000000e+00 : f32
    %257 = vector.broadcast %cst_171 : f32 to vector<1x64xf32>
    %258 = arith.maximumf %256, %257 : vector<1x64xf32>
    %c0_172 = arith.constant 0 : index
    %c0_173 = arith.constant 0 : index
    %259 = vector.load %arg5[%c0_172, %c0_173] : memref<64x256xf32, #tpu.memory_space<vmem>>, vector<64x256xf32>
    %cst_174 = arith.constant dense<0.000000e+00> : vector<1x256xf32>
    %260 = tpu.matmul %258, %259, %cst_174 {dimension_numbers = #tpu.dot_dimension_numbers<[1], [0], [0], [1], [0, 0, 1, 1], [], []>} : vector<1x64xf32>, vector<64x256xf32>, vector<1x256xf32> -> vector<1x256xf32>
    %cst_175 = arith.constant 0.000000e+00 : f32
    %261 = vector.broadcast %cst_175 : f32 to vector<1x256xf32>
    %262 = arith.subf %261, %260 : vector<1x256xf32>
    %263 = math.exp %262 : vector<1x256xf32>
    %cst_176 = arith.constant 1.000000e+00 : f32
    %264 = vector.broadcast %cst_176 : f32 to vector<1x256xf32>
    %265 = arith.addf %264, %263 : vector<1x256xf32>
    %266 = tpu.reciprocal %265 : vector<1x256xf32> -> vector<1x256xf32>
    %267 = vector.extract_strided_slice %266 {offsets = [0, 0], sizes = [1, 128], strides = [1, 1]} : vector<1x256xf32> to vector<1x128xf32>
    %268 = vector.extract_strided_slice %266 {offsets = [0, 128], sizes = [1, 128], strides = [1, 1]} : vector<1x256xf32> to vector<1x128xf32>
    %c0_177 = arith.constant 0 : index
    %c0_178 = arith.constant 0 : index
    %269 = vector.load %arg2[%c0_177, %c0_178] : memref<128x128xf32, #tpu.memory_space<vmem>>, vector<128x128xf32>
    %270 = vector.broadcast %267 : vector<1x128xf32> to vector<128x128xf32>
    %271 = arith.mulf %270, %269 : vector<128x128xf32>
    %272 = arith.addf %250, %271 : vector<128x128xf32>
    %c0_179 = arith.constant 0 : index
    %c0_180 = arith.constant 0 : index
    %273 = vector.load %arg3[%c0_179, %c0_180] : memref<128x128xf32, #tpu.memory_space<vmem>>, vector<128x128xf32>
    %274 = vector.broadcast %268 : vector<1x128xf32> to vector<128x128xf32>
    %275 = arith.mulf %274, %273 : vector<128x128xf32>
    %276 = arith.addf %272, %275 : vector<128x128xf32>
    %c0_181 = arith.constant 0 : index
    %c512_182 = arith.constant 512 : index
    %277 = vector.load %arg7[%c0_181, %c512_182] : memref<128x1024xf32, #tpu.memory_space<vmem>>, vector<128x128xf32>
    tpu.vector_store %arg7[%c0_181, %c512_182], %276 {strides = array<i32>} : memref<128x1024xf32, #tpu.memory_space<vmem>>, vector<128x128xf32>,
    %278 = vector.extract_strided_slice %276 {offsets = [0, 0], sizes = [16, 128], strides = [1, 1]} : vector<128x128xf32> to vector<16x128xf32>
    %c4_183 = arith.constant 4 : index
    %c0_184 = arith.constant 0 : index
    %c0_185 = arith.constant 0 : index
    %279 = vector.load %arg6[%c4_183, %c0_184, %c0_185] : memref<8x16x1024xf32, #tpu.memory_space<vmem>>, vector<1x16x128xf32>
    %280 = vector.shape_cast %279 : vector<1x16x128xf32> to vector<16x128xf32>
    %281 = vector.shape_cast %278 : vector<16x128xf32> to vector<1x16x128xf32>
    tpu.vector_store %arg6[%c4_183, %c0_184, %c0_185], %281 {strides = array<i32>} : memref<8x16x1024xf32, #tpu.memory_space<vmem>>, vector<1x16x128xf32>,
    %282 = vector.extract_strided_slice %276 {offsets = [16, 0], sizes = [16, 128], strides = [1, 1]} : vector<128x128xf32> to vector<16x128xf32>
    %c4_186 = arith.constant 4 : index
    %c0_187 = arith.constant 0 : index
    %c128_188 = arith.constant 128 : index
    %283 = vector.load %arg6[%c4_186, %c0_187, %c128_188] : memref<8x16x1024xf32, #tpu.memory_space<vmem>>, vector<1x16x128xf32>
    %284 = vector.shape_cast %283 : vector<1x16x128xf32> to vector<16x128xf32>
    %285 = vector.shape_cast %282 : vector<16x128xf32> to vector<1x16x128xf32>
    tpu.vector_store %arg6[%c4_186, %c0_187, %c128_188], %285 {strides = array<i32>} : memref<8x16x1024xf32, #tpu.memory_space<vmem>>, vector<1x16x128xf32>,
    %286 = vector.extract_strided_slice %276 {offsets = [32, 0], sizes = [16, 128], strides = [1, 1]} : vector<128x128xf32> to vector<16x128xf32>
    %c4_189 = arith.constant 4 : index
    %c0_190 = arith.constant 0 : index
    %c256_191 = arith.constant 256 : index
    %287 = vector.load %arg6[%c4_189, %c0_190, %c256_191] : memref<8x16x1024xf32, #tpu.memory_space<vmem>>, vector<1x16x128xf32>
    %288 = vector.shape_cast %287 : vector<1x16x128xf32> to vector<16x128xf32>
    %289 = vector.shape_cast %286 : vector<16x128xf32> to vector<1x16x128xf32>
    tpu.vector_store %arg6[%c4_189, %c0_190, %c256_191], %289 {strides = array<i32>} : memref<8x16x1024xf32, #tpu.memory_space<vmem>>, vector<1x16x128xf32>,
    %290 = vector.extract_strided_slice %276 {offsets = [48, 0], sizes = [16, 128], strides = [1, 1]} : vector<128x128xf32> to vector<16x128xf32>
    %c4_192 = arith.constant 4 : index
    %c0_193 = arith.constant 0 : index
    %c384_194 = arith.constant 384 : index
    %291 = vector.load %arg6[%c4_192, %c0_193, %c384_194] : memref<8x16x1024xf32, #tpu.memory_space<vmem>>, vector<1x16x128xf32>
    %292 = vector.shape_cast %291 : vector<1x16x128xf32> to vector<16x128xf32>
    %293 = vector.shape_cast %290 : vector<16x128xf32> to vector<1x16x128xf32>
    tpu.vector_store %arg6[%c4_192, %c0_193, %c384_194], %293 {strides = array<i32>} : memref<8x16x1024xf32, #tpu.memory_space<vmem>>, vector<1x16x128xf32>,
    %294 = vector.extract_strided_slice %276 {offsets = [64, 0], sizes = [16, 128], strides = [1, 1]} : vector<128x128xf32> to vector<16x128xf32>
    %c4_195 = arith.constant 4 : index
    %c0_196 = arith.constant 0 : index
    %c512_197 = arith.constant 512 : index
    %295 = vector.load %arg6[%c4_195, %c0_196, %c512_197] : memref<8x16x1024xf32, #tpu.memory_space<vmem>>, vector<1x16x128xf32>
    %296 = vector.shape_cast %295 : vector<1x16x128xf32> to vector<16x128xf32>
    %297 = vector.shape_cast %294 : vector<16x128xf32> to vector<1x16x128xf32>
    tpu.vector_store %arg6[%c4_195, %c0_196, %c512_197], %297 {strides = array<i32>} : memref<8x16x1024xf32, #tpu.memory_space<vmem>>, vector<1x16x128xf32>,
    %298 = vector.extract_strided_slice %276 {offsets = [80, 0], sizes = [16, 128], strides = [1, 1]} : vector<128x128xf32> to vector<16x128xf32>
    %c4_198 = arith.constant 4 : index
    %c0_199 = arith.constant 0 : index
    %c640_200 = arith.constant 640 : index
    %299 = vector.load %arg6[%c4_198, %c0_199, %c640_200] : memref<8x16x1024xf32, #tpu.memory_space<vmem>>, vector<1x16x128xf32>
    %300 = vector.shape_cast %299 : vector<1x16x128xf32> to vector<16x128xf32>
    %301 = vector.shape_cast %298 : vector<16x128xf32> to vector<1x16x128xf32>
    tpu.vector_store %arg6[%c4_198, %c0_199, %c640_200], %301 {strides = array<i32>} : memref<8x16x1024xf32, #tpu.memory_space<vmem>>, vector<1x16x128xf32>,
    %302 = vector.extract_strided_slice %276 {offsets = [96, 0], sizes = [16, 128], strides = [1, 1]} : vector<128x128xf32> to vector<16x128xf32>
    %c4_201 = arith.constant 4 : index
    %c0_202 = arith.constant 0 : index
    %c768_203 = arith.constant 768 : index
    %303 = vector.load %arg6[%c4_201, %c0_202, %c768_203] : memref<8x16x1024xf32, #tpu.memory_space<vmem>>, vector<1x16x128xf32>
    %304 = vector.shape_cast %303 : vector<1x16x128xf32> to vector<16x128xf32>
    %305 = vector.shape_cast %302 : vector<16x128xf32> to vector<1x16x128xf32>
    tpu.vector_store %arg6[%c4_201, %c0_202, %c768_203], %305 {strides = array<i32>} : memref<8x16x1024xf32, #tpu.memory_space<vmem>>, vector<1x16x128xf32>,
    %306 = vector.extract_strided_slice %276 {offsets = [112, 0], sizes = [16, 128], strides = [1, 1]} : vector<128x128xf32> to vector<16x128xf32>
    %c4_204 = arith.constant 4 : index
    %c0_205 = arith.constant 0 : index
    %c896_206 = arith.constant 896 : index
    %307 = vector.load %arg6[%c4_204, %c0_205, %c896_206] : memref<8x16x1024xf32, #tpu.memory_space<vmem>>, vector<1x16x128xf32>
    %308 = vector.shape_cast %307 : vector<1x16x128xf32> to vector<16x128xf32>
    %309 = vector.shape_cast %306 : vector<16x128xf32> to vector<1x16x128xf32>
    tpu.vector_store %arg6[%c4_204, %c0_205, %c896_206], %309 {strides = array<i32>} : memref<8x16x1024xf32, #tpu.memory_space<vmem>>, vector<1x16x128xf32>,
    %c5 = arith.constant 5 : index
    %c0_207 = arith.constant 0 : index
    %c0_208 = arith.constant 0 : index
    %310 = vector.load %arg1[%c5, %c0_207, %c0_208] : memref<8x128x128xf32, #tpu.memory_space<vmem>>, vector<1x128x128xf32>
    %311 = vector.shape_cast %310 : vector<1x128x128xf32> to vector<128x128xf32>
    %312 = tpu.transpose %311, [1, 0] : vector<128x128xf32> -> vector<128x128xf32>
    %cst_209 = arith.constant dense<0.000000e+00> : vector<128xf32>
    %313 = vector.multi_reduction <add>, %312, %cst_209 [0] : vector<128x128xf32> to vector<128xf32>
    %314 = vector.shape_cast %313 : vector<128xf32> to vector<1x128xf32>
    %cst_210 = arith.constant 1.280000e+02 : f32
    %315 = vector.broadcast %cst_210 : f32 to vector<1x128xf32>
    %316 = arith.divf %314, %315 : vector<1x128xf32>
    %c0_211 = arith.constant 0 : index
    %c0_212 = arith.constant 0 : index
    %317 = vector.load %arg4[%c0_211, %c0_212] : memref<128x64xf32, #tpu.memory_space<vmem>>, vector<128x64xf32>
    %cst_213 = arith.constant dense<0.000000e+00> : vector<1x64xf32>
    %318 = tpu.matmul %316, %317, %cst_213 {dimension_numbers = #tpu.dot_dimension_numbers<[1], [0], [0], [1], [0, 0, 1, 1], [], []>} : vector<1x128xf32>, vector<128x64xf32>, vector<1x64xf32> -> vector<1x64xf32>
    %cst_214 = arith.constant 0.000000e+00 : f32
    %319 = vector.broadcast %cst_214 : f32 to vector<1x64xf32>
    %320 = arith.maximumf %318, %319 : vector<1x64xf32>
    %c0_215 = arith.constant 0 : index
    %c0_216 = arith.constant 0 : index
    %321 = vector.load %arg5[%c0_215, %c0_216] : memref<64x256xf32, #tpu.memory_space<vmem>>, vector<64x256xf32>
    %cst_217 = arith.constant dense<0.000000e+00> : vector<1x256xf32>
    %322 = tpu.matmul %320, %321, %cst_217 {dimension_numbers = #tpu.dot_dimension_numbers<[1], [0], [0], [1], [0, 0, 1, 1], [], []>} : vector<1x64xf32>, vector<64x256xf32>, vector<1x256xf32> -> vector<1x256xf32>
    %cst_218 = arith.constant 0.000000e+00 : f32
    %323 = vector.broadcast %cst_218 : f32 to vector<1x256xf32>
    %324 = arith.subf %323, %322 : vector<1x256xf32>
    %325 = math.exp %324 : vector<1x256xf32>
    %cst_219 = arith.constant 1.000000e+00 : f32
    %326 = vector.broadcast %cst_219 : f32 to vector<1x256xf32>
    %327 = arith.addf %326, %325 : vector<1x256xf32>
    %328 = tpu.reciprocal %327 : vector<1x256xf32> -> vector<1x256xf32>
    %329 = vector.extract_strided_slice %328 {offsets = [0, 0], sizes = [1, 128], strides = [1, 1]} : vector<1x256xf32> to vector<1x128xf32>
    %330 = vector.extract_strided_slice %328 {offsets = [0, 128], sizes = [1, 128], strides = [1, 1]} : vector<1x256xf32> to vector<1x128xf32>
    %c0_220 = arith.constant 0 : index
    %c0_221 = arith.constant 0 : index
    %331 = vector.load %arg2[%c0_220, %c0_221] : memref<128x128xf32, #tpu.memory_space<vmem>>, vector<128x128xf32>
    %332 = vector.broadcast %329 : vector<1x128xf32> to vector<128x128xf32>
    %333 = arith.mulf %332, %331 : vector<128x128xf32>
    %334 = arith.addf %312, %333 : vector<128x128xf32>
    %c0_222 = arith.constant 0 : index
    %c0_223 = arith.constant 0 : index
    %335 = vector.load %arg3[%c0_222, %c0_223] : memref<128x128xf32, #tpu.memory_space<vmem>>, vector<128x128xf32>
    %336 = vector.broadcast %330 : vector<1x128xf32> to vector<128x128xf32>
    %337 = arith.mulf %336, %335 : vector<128x128xf32>
    %338 = arith.addf %334, %337 : vector<128x128xf32>
    %c0_224 = arith.constant 0 : index
    %c640_225 = arith.constant 640 : index
    %339 = vector.load %arg7[%c0_224, %c640_225] : memref<128x1024xf32, #tpu.memory_space<vmem>>, vector<128x128xf32>
    tpu.vector_store %arg7[%c0_224, %c640_225], %338 {strides = array<i32>} : memref<128x1024xf32, #tpu.memory_space<vmem>>, vector<128x128xf32>,
    %340 = vector.extract_strided_slice %338 {offsets = [0, 0], sizes = [16, 128], strides = [1, 1]} : vector<128x128xf32> to vector<16x128xf32>
    %c5_226 = arith.constant 5 : index
    %c0_227 = arith.constant 0 : index
    %c0_228 = arith.constant 0 : index
    %341 = vector.load %arg6[%c5_226, %c0_227, %c0_228] : memref<8x16x1024xf32, #tpu.memory_space<vmem>>, vector<1x16x128xf32>
    %342 = vector.shape_cast %341 : vector<1x16x128xf32> to vector<16x128xf32>
    %343 = vector.shape_cast %340 : vector<16x128xf32> to vector<1x16x128xf32>
    tpu.vector_store %arg6[%c5_226, %c0_227, %c0_228], %343 {strides = array<i32>} : memref<8x16x1024xf32, #tpu.memory_space<vmem>>, vector<1x16x128xf32>,
    %344 = vector.extract_strided_slice %338 {offsets = [16, 0], sizes = [16, 128], strides = [1, 1]} : vector<128x128xf32> to vector<16x128xf32>
    %c5_229 = arith.constant 5 : index
    %c0_230 = arith.constant 0 : index
    %c128_231 = arith.constant 128 : index
    %345 = vector.load %arg6[%c5_229, %c0_230, %c128_231] : memref<8x16x1024xf32, #tpu.memory_space<vmem>>, vector<1x16x128xf32>
    %346 = vector.shape_cast %345 : vector<1x16x128xf32> to vector<16x128xf32>
    %347 = vector.shape_cast %344 : vector<16x128xf32> to vector<1x16x128xf32>
    tpu.vector_store %arg6[%c5_229, %c0_230, %c128_231], %347 {strides = array<i32>} : memref<8x16x1024xf32, #tpu.memory_space<vmem>>, vector<1x16x128xf32>,
    %348 = vector.extract_strided_slice %338 {offsets = [32, 0], sizes = [16, 128], strides = [1, 1]} : vector<128x128xf32> to vector<16x128xf32>
    %c5_232 = arith.constant 5 : index
    %c0_233 = arith.constant 0 : index
    %c256_234 = arith.constant 256 : index
    %349 = vector.load %arg6[%c5_232, %c0_233, %c256_234] : memref<8x16x1024xf32, #tpu.memory_space<vmem>>, vector<1x16x128xf32>
    %350 = vector.shape_cast %349 : vector<1x16x128xf32> to vector<16x128xf32>
    %351 = vector.shape_cast %348 : vector<16x128xf32> to vector<1x16x128xf32>
    tpu.vector_store %arg6[%c5_232, %c0_233, %c256_234], %351 {strides = array<i32>} : memref<8x16x1024xf32, #tpu.memory_space<vmem>>, vector<1x16x128xf32>,
    %352 = vector.extract_strided_slice %338 {offsets = [48, 0], sizes = [16, 128], strides = [1, 1]} : vector<128x128xf32> to vector<16x128xf32>
    %c5_235 = arith.constant 5 : index
    %c0_236 = arith.constant 0 : index
    %c384_237 = arith.constant 384 : index
    %353 = vector.load %arg6[%c5_235, %c0_236, %c384_237] : memref<8x16x1024xf32, #tpu.memory_space<vmem>>, vector<1x16x128xf32>
    %354 = vector.shape_cast %353 : vector<1x16x128xf32> to vector<16x128xf32>
    %355 = vector.shape_cast %352 : vector<16x128xf32> to vector<1x16x128xf32>
    tpu.vector_store %arg6[%c5_235, %c0_236, %c384_237], %355 {strides = array<i32>} : memref<8x16x1024xf32, #tpu.memory_space<vmem>>, vector<1x16x128xf32>,
    %356 = vector.extract_strided_slice %338 {offsets = [64, 0], sizes = [16, 128], strides = [1, 1]} : vector<128x128xf32> to vector<16x128xf32>
    %c5_238 = arith.constant 5 : index
    %c0_239 = arith.constant 0 : index
    %c512_240 = arith.constant 512 : index
    %357 = vector.load %arg6[%c5_238, %c0_239, %c512_240] : memref<8x16x1024xf32, #tpu.memory_space<vmem>>, vector<1x16x128xf32>
    %358 = vector.shape_cast %357 : vector<1x16x128xf32> to vector<16x128xf32>
    %359 = vector.shape_cast %356 : vector<16x128xf32> to vector<1x16x128xf32>
    tpu.vector_store %arg6[%c5_238, %c0_239, %c512_240], %359 {strides = array<i32>} : memref<8x16x1024xf32, #tpu.memory_space<vmem>>, vector<1x16x128xf32>,
    %360 = vector.extract_strided_slice %338 {offsets = [80, 0], sizes = [16, 128], strides = [1, 1]} : vector<128x128xf32> to vector<16x128xf32>
    %c5_241 = arith.constant 5 : index
    %c0_242 = arith.constant 0 : index
    %c640_243 = arith.constant 640 : index
    %361 = vector.load %arg6[%c5_241, %c0_242, %c640_243] : memref<8x16x1024xf32, #tpu.memory_space<vmem>>, vector<1x16x128xf32>
    %362 = vector.shape_cast %361 : vector<1x16x128xf32> to vector<16x128xf32>
    %363 = vector.shape_cast %360 : vector<16x128xf32> to vector<1x16x128xf32>
    tpu.vector_store %arg6[%c5_241, %c0_242, %c640_243], %363 {strides = array<i32>} : memref<8x16x1024xf32, #tpu.memory_space<vmem>>, vector<1x16x128xf32>,
    %364 = vector.extract_strided_slice %338 {offsets = [96, 0], sizes = [16, 128], strides = [1, 1]} : vector<128x128xf32> to vector<16x128xf32>
    %c5_244 = arith.constant 5 : index
    %c0_245 = arith.constant 0 : index
    %c768_246 = arith.constant 768 : index
    %365 = vector.load %arg6[%c5_244, %c0_245, %c768_246] : memref<8x16x1024xf32, #tpu.memory_space<vmem>>, vector<1x16x128xf32>
    %366 = vector.shape_cast %365 : vector<1x16x128xf32> to vector<16x128xf32>
    %367 = vector.shape_cast %364 : vector<16x128xf32> to vector<1x16x128xf32>
    tpu.vector_store %arg6[%c5_244, %c0_245, %c768_246], %367 {strides = array<i32>} : memref<8x16x1024xf32, #tpu.memory_space<vmem>>, vector<1x16x128xf32>,
    %368 = vector.extract_strided_slice %338 {offsets = [112, 0], sizes = [16, 128], strides = [1, 1]} : vector<128x128xf32> to vector<16x128xf32>
    %c5_247 = arith.constant 5 : index
    %c0_248 = arith.constant 0 : index
    %c896_249 = arith.constant 896 : index
    %369 = vector.load %arg6[%c5_247, %c0_248, %c896_249] : memref<8x16x1024xf32, #tpu.memory_space<vmem>>, vector<1x16x128xf32>
    %370 = vector.shape_cast %369 : vector<1x16x128xf32> to vector<16x128xf32>
    %371 = vector.shape_cast %368 : vector<16x128xf32> to vector<1x16x128xf32>
    tpu.vector_store %arg6[%c5_247, %c0_248, %c896_249], %371 {strides = array<i32>} : memref<8x16x1024xf32, #tpu.memory_space<vmem>>, vector<1x16x128xf32>,
    %c6 = arith.constant 6 : index
    %c0_250 = arith.constant 0 : index
    %c0_251 = arith.constant 0 : index
    %372 = vector.load %arg1[%c6, %c0_250, %c0_251] : memref<8x128x128xf32, #tpu.memory_space<vmem>>, vector<1x128x128xf32>
    %373 = vector.shape_cast %372 : vector<1x128x128xf32> to vector<128x128xf32>
    %374 = tpu.transpose %373, [1, 0] : vector<128x128xf32> -> vector<128x128xf32>
    %cst_252 = arith.constant dense<0.000000e+00> : vector<128xf32>
    %375 = vector.multi_reduction <add>, %374, %cst_252 [0] : vector<128x128xf32> to vector<128xf32>
    %376 = vector.shape_cast %375 : vector<128xf32> to vector<1x128xf32>
    %cst_253 = arith.constant 1.280000e+02 : f32
    %377 = vector.broadcast %cst_253 : f32 to vector<1x128xf32>
    %378 = arith.divf %376, %377 : vector<1x128xf32>
    %c0_254 = arith.constant 0 : index
    %c0_255 = arith.constant 0 : index
    %379 = vector.load %arg4[%c0_254, %c0_255] : memref<128x64xf32, #tpu.memory_space<vmem>>, vector<128x64xf32>
    %cst_256 = arith.constant dense<0.000000e+00> : vector<1x64xf32>
    %380 = tpu.matmul %378, %379, %cst_256 {dimension_numbers = #tpu.dot_dimension_numbers<[1], [0], [0], [1], [0, 0, 1, 1], [], []>} : vector<1x128xf32>, vector<128x64xf32>, vector<1x64xf32> -> vector<1x64xf32>
    %cst_257 = arith.constant 0.000000e+00 : f32
    %381 = vector.broadcast %cst_257 : f32 to vector<1x64xf32>
    %382 = arith.maximumf %380, %381 : vector<1x64xf32>
    %c0_258 = arith.constant 0 : index
    %c0_259 = arith.constant 0 : index
    %383 = vector.load %arg5[%c0_258, %c0_259] : memref<64x256xf32, #tpu.memory_space<vmem>>, vector<64x256xf32>
    %cst_260 = arith.constant dense<0.000000e+00> : vector<1x256xf32>
    %384 = tpu.matmul %382, %383, %cst_260 {dimension_numbers = #tpu.dot_dimension_numbers<[1], [0], [0], [1], [0, 0, 1, 1], [], []>} : vector<1x64xf32>, vector<64x256xf32>, vector<1x256xf32> -> vector<1x256xf32>
    %cst_261 = arith.constant 0.000000e+00 : f32
    %385 = vector.broadcast %cst_261 : f32 to vector<1x256xf32>
    %386 = arith.subf %385, %384 : vector<1x256xf32>
    %387 = math.exp %386 : vector<1x256xf32>
    %cst_262 = arith.constant 1.000000e+00 : f32
    %388 = vector.broadcast %cst_262 : f32 to vector<1x256xf32>
    %389 = arith.addf %388, %387 : vector<1x256xf32>
    %390 = tpu.reciprocal %389 : vector<1x256xf32> -> vector<1x256xf32>
    %391 = vector.extract_strided_slice %390 {offsets = [0, 0], sizes = [1, 128], strides = [1, 1]} : vector<1x256xf32> to vector<1x128xf32>
    %392 = vector.extract_strided_slice %390 {offsets = [0, 128], sizes = [1, 128], strides = [1, 1]} : vector<1x256xf32> to vector<1x128xf32>
    %c0_263 = arith.constant 0 : index
    %c0_264 = arith.constant 0 : index
    %393 = vector.load %arg2[%c0_263, %c0_264] : memref<128x128xf32, #tpu.memory_space<vmem>>, vector<128x128xf32>
    %394 = vector.broadcast %391 : vector<1x128xf32> to vector<128x128xf32>
    %395 = arith.mulf %394, %393 : vector<128x128xf32>
    %396 = arith.addf %374, %395 : vector<128x128xf32>
    %c0_265 = arith.constant 0 : index
    %c0_266 = arith.constant 0 : index
    %397 = vector.load %arg3[%c0_265, %c0_266] : memref<128x128xf32, #tpu.memory_space<vmem>>, vector<128x128xf32>
    %398 = vector.broadcast %392 : vector<1x128xf32> to vector<128x128xf32>
    %399 = arith.mulf %398, %397 : vector<128x128xf32>
    %400 = arith.addf %396, %399 : vector<128x128xf32>
    %c0_267 = arith.constant 0 : index
    %c768_268 = arith.constant 768 : index
    %401 = vector.load %arg7[%c0_267, %c768_268] : memref<128x1024xf32, #tpu.memory_space<vmem>>, vector<128x128xf32>
    tpu.vector_store %arg7[%c0_267, %c768_268], %400 {strides = array<i32>} : memref<128x1024xf32, #tpu.memory_space<vmem>>, vector<128x128xf32>,
    %402 = vector.extract_strided_slice %400 {offsets = [0, 0], sizes = [16, 128], strides = [1, 1]} : vector<128x128xf32> to vector<16x128xf32>
    %c6_269 = arith.constant 6 : index
    %c0_270 = arith.constant 0 : index
    %c0_271 = arith.constant 0 : index
    %403 = vector.load %arg6[%c6_269, %c0_270, %c0_271] : memref<8x16x1024xf32, #tpu.memory_space<vmem>>, vector<1x16x128xf32>
    %404 = vector.shape_cast %403 : vector<1x16x128xf32> to vector<16x128xf32>
    %405 = vector.shape_cast %402 : vector<16x128xf32> to vector<1x16x128xf32>
    tpu.vector_store %arg6[%c6_269, %c0_270, %c0_271], %405 {strides = array<i32>} : memref<8x16x1024xf32, #tpu.memory_space<vmem>>, vector<1x16x128xf32>,
    %406 = vector.extract_strided_slice %400 {offsets = [16, 0], sizes = [16, 128], strides = [1, 1]} : vector<128x128xf32> to vector<16x128xf32>
    %c6_272 = arith.constant 6 : index
    %c0_273 = arith.constant 0 : index
    %c128_274 = arith.constant 128 : index
    %407 = vector.load %arg6[%c6_272, %c0_273, %c128_274] : memref<8x16x1024xf32, #tpu.memory_space<vmem>>, vector<1x16x128xf32>
    %408 = vector.shape_cast %407 : vector<1x16x128xf32> to vector<16x128xf32>
    %409 = vector.shape_cast %406 : vector<16x128xf32> to vector<1x16x128xf32>
    tpu.vector_store %arg6[%c6_272, %c0_273, %c128_274], %409 {strides = array<i32>} : memref<8x16x1024xf32, #tpu.memory_space<vmem>>, vector<1x16x128xf32>,
    %410 = vector.extract_strided_slice %400 {offsets = [32, 0], sizes = [16, 128], strides = [1, 1]} : vector<128x128xf32> to vector<16x128xf32>
    %c6_275 = arith.constant 6 : index
    %c0_276 = arith.constant 0 : index
    %c256_277 = arith.constant 256 : index
    %411 = vector.load %arg6[%c6_275, %c0_276, %c256_277] : memref<8x16x1024xf32, #tpu.memory_space<vmem>>, vector<1x16x128xf32>
    %412 = vector.shape_cast %411 : vector<1x16x128xf32> to vector<16x128xf32>
    %413 = vector.shape_cast %410 : vector<16x128xf32> to vector<1x16x128xf32>
    tpu.vector_store %arg6[%c6_275, %c0_276, %c256_277], %413 {strides = array<i32>} : memref<8x16x1024xf32, #tpu.memory_space<vmem>>, vector<1x16x128xf32>,
    %414 = vector.extract_strided_slice %400 {offsets = [48, 0], sizes = [16, 128], strides = [1, 1]} : vector<128x128xf32> to vector<16x128xf32>
    %c6_278 = arith.constant 6 : index
    %c0_279 = arith.constant 0 : index
    %c384_280 = arith.constant 384 : index
    %415 = vector.load %arg6[%c6_278, %c0_279, %c384_280] : memref<8x16x1024xf32, #tpu.memory_space<vmem>>, vector<1x16x128xf32>
    %416 = vector.shape_cast %415 : vector<1x16x128xf32> to vector<16x128xf32>
    %417 = vector.shape_cast %414 : vector<16x128xf32> to vector<1x16x128xf32>
    tpu.vector_store %arg6[%c6_278, %c0_279, %c384_280], %417 {strides = array<i32>} : memref<8x16x1024xf32, #tpu.memory_space<vmem>>, vector<1x16x128xf32>,
    %418 = vector.extract_strided_slice %400 {offsets = [64, 0], sizes = [16, 128], strides = [1, 1]} : vector<128x128xf32> to vector<16x128xf32>
    %c6_281 = arith.constant 6 : index
    %c0_282 = arith.constant 0 : index
    %c512_283 = arith.constant 512 : index
    %419 = vector.load %arg6[%c6_281, %c0_282, %c512_283] : memref<8x16x1024xf32, #tpu.memory_space<vmem>>, vector<1x16x128xf32>
    %420 = vector.shape_cast %419 : vector<1x16x128xf32> to vector<16x128xf32>
    %421 = vector.shape_cast %418 : vector<16x128xf32> to vector<1x16x128xf32>
    tpu.vector_store %arg6[%c6_281, %c0_282, %c512_283], %421 {strides = array<i32>} : memref<8x16x1024xf32, #tpu.memory_space<vmem>>, vector<1x16x128xf32>,
    %422 = vector.extract_strided_slice %400 {offsets = [80, 0], sizes = [16, 128], strides = [1, 1]} : vector<128x128xf32> to vector<16x128xf32>
    %c6_284 = arith.constant 6 : index
    %c0_285 = arith.constant 0 : index
    %c640_286 = arith.constant 640 : index
    %423 = vector.load %arg6[%c6_284, %c0_285, %c640_286] : memref<8x16x1024xf32, #tpu.memory_space<vmem>>, vector<1x16x128xf32>
    %424 = vector.shape_cast %423 : vector<1x16x128xf32> to vector<16x128xf32>
    %425 = vector.shape_cast %422 : vector<16x128xf32> to vector<1x16x128xf32>
    tpu.vector_store %arg6[%c6_284, %c0_285, %c640_286], %425 {strides = array<i32>} : memref<8x16x1024xf32, #tpu.memory_space<vmem>>, vector<1x16x128xf32>,
    %426 = vector.extract_strided_slice %400 {offsets = [96, 0], sizes = [16, 128], strides = [1, 1]} : vector<128x128xf32> to vector<16x128xf32>
    %c6_287 = arith.constant 6 : index
    %c0_288 = arith.constant 0 : index
    %c768_289 = arith.constant 768 : index
    %427 = vector.load %arg6[%c6_287, %c0_288, %c768_289] : memref<8x16x1024xf32, #tpu.memory_space<vmem>>, vector<1x16x128xf32>
    %428 = vector.shape_cast %427 : vector<1x16x128xf32> to vector<16x128xf32>
    %429 = vector.shape_cast %426 : vector<16x128xf32> to vector<1x16x128xf32>
    tpu.vector_store %arg6[%c6_287, %c0_288, %c768_289], %429 {strides = array<i32>} : memref<8x16x1024xf32, #tpu.memory_space<vmem>>, vector<1x16x128xf32>,
    %430 = vector.extract_strided_slice %400 {offsets = [112, 0], sizes = [16, 128], strides = [1, 1]} : vector<128x128xf32> to vector<16x128xf32>
    %c6_290 = arith.constant 6 : index
    %c0_291 = arith.constant 0 : index
    %c896_292 = arith.constant 896 : index
    %431 = vector.load %arg6[%c6_290, %c0_291, %c896_292] : memref<8x16x1024xf32, #tpu.memory_space<vmem>>, vector<1x16x128xf32>
    %432 = vector.shape_cast %431 : vector<1x16x128xf32> to vector<16x128xf32>
    %433 = vector.shape_cast %430 : vector<16x128xf32> to vector<1x16x128xf32>
    tpu.vector_store %arg6[%c6_290, %c0_291, %c896_292], %433 {strides = array<i32>} : memref<8x16x1024xf32, #tpu.memory_space<vmem>>, vector<1x16x128xf32>,
    %c7 = arith.constant 7 : index
    %c0_293 = arith.constant 0 : index
    %c0_294 = arith.constant 0 : index
    %434 = vector.load %arg1[%c7, %c0_293, %c0_294] : memref<8x128x128xf32, #tpu.memory_space<vmem>>, vector<1x128x128xf32>
    %435 = vector.shape_cast %434 : vector<1x128x128xf32> to vector<128x128xf32>
    %436 = tpu.transpose %435, [1, 0] : vector<128x128xf32> -> vector<128x128xf32>
    %cst_295 = arith.constant dense<0.000000e+00> : vector<128xf32>
    %437 = vector.multi_reduction <add>, %436, %cst_295 [0] : vector<128x128xf32> to vector<128xf32>
    %438 = vector.shape_cast %437 : vector<128xf32> to vector<1x128xf32>
    %cst_296 = arith.constant 1.280000e+02 : f32
    %439 = vector.broadcast %cst_296 : f32 to vector<1x128xf32>
    %440 = arith.divf %438, %439 : vector<1x128xf32>
    %c0_297 = arith.constant 0 : index
    %c0_298 = arith.constant 0 : index
    %441 = vector.load %arg4[%c0_297, %c0_298] : memref<128x64xf32, #tpu.memory_space<vmem>>, vector<128x64xf32>
    %cst_299 = arith.constant dense<0.000000e+00> : vector<1x64xf32>
    %442 = tpu.matmul %440, %441, %cst_299 {dimension_numbers = #tpu.dot_dimension_numbers<[1], [0], [0], [1], [0, 0, 1, 1], [], []>} : vector<1x128xf32>, vector<128x64xf32>, vector<1x64xf32> -> vector<1x64xf32>
    %cst_300 = arith.constant 0.000000e+00 : f32
    %443 = vector.broadcast %cst_300 : f32 to vector<1x64xf32>
    %444 = arith.maximumf %442, %443 : vector<1x64xf32>
    %c0_301 = arith.constant 0 : index
    %c0_302 = arith.constant 0 : index
    %445 = vector.load %arg5[%c0_301, %c0_302] : memref<64x256xf32, #tpu.memory_space<vmem>>, vector<64x256xf32>
    %cst_303 = arith.constant dense<0.000000e+00> : vector<1x256xf32>
    %446 = tpu.matmul %444, %445, %cst_303 {dimension_numbers = #tpu.dot_dimension_numbers<[1], [0], [0], [1], [0, 0, 1, 1], [], []>} : vector<1x64xf32>, vector<64x256xf32>, vector<1x256xf32> -> vector<1x256xf32>
    %cst_304 = arith.constant 0.000000e+00 : f32
    %447 = vector.broadcast %cst_304 : f32 to vector<1x256xf32>
    %448 = arith.subf %447, %446 : vector<1x256xf32>
    %449 = math.exp %448 : vector<1x256xf32>
    %cst_305 = arith.constant 1.000000e+00 : f32
    %450 = vector.broadcast %cst_305 : f32 to vector<1x256xf32>
    %451 = arith.addf %450, %449 : vector<1x256xf32>
    %452 = tpu.reciprocal %451 : vector<1x256xf32> -> vector<1x256xf32>
    %453 = vector.extract_strided_slice %452 {offsets = [0, 0], sizes = [1, 128], strides = [1, 1]} : vector<1x256xf32> to vector<1x128xf32>
    %454 = vector.extract_strided_slice %452 {offsets = [0, 128], sizes = [1, 128], strides = [1, 1]} : vector<1x256xf32> to vector<1x128xf32>
    %c0_306 = arith.constant 0 : index
    %c0_307 = arith.constant 0 : index
    %455 = vector.load %arg2[%c0_306, %c0_307] : memref<128x128xf32, #tpu.memory_space<vmem>>, vector<128x128xf32>
    %456 = vector.broadcast %453 : vector<1x128xf32> to vector<128x128xf32>
    %457 = arith.mulf %456, %455 : vector<128x128xf32>
    %458 = arith.addf %436, %457 : vector<128x128xf32>
    %c0_308 = arith.constant 0 : index
    %c0_309 = arith.constant 0 : index
    %459 = vector.load %arg3[%c0_308, %c0_309] : memref<128x128xf32, #tpu.memory_space<vmem>>, vector<128x128xf32>
    %460 = vector.broadcast %454 : vector<1x128xf32> to vector<128x128xf32>
    %461 = arith.mulf %460, %459 : vector<128x128xf32>
    %462 = arith.addf %458, %461 : vector<128x128xf32>
    %c0_310 = arith.constant 0 : index
    %c896_311 = arith.constant 896 : index
    %463 = vector.load %arg7[%c0_310, %c896_311] : memref<128x1024xf32, #tpu.memory_space<vmem>>, vector<128x128xf32>
    tpu.vector_store %arg7[%c0_310, %c896_311], %462 {strides = array<i32>} : memref<128x1024xf32, #tpu.memory_space<vmem>>, vector<128x128xf32>,
    %464 = vector.extract_strided_slice %462 {offsets = [0, 0], sizes = [16, 128], strides = [1, 1]} : vector<128x128xf32> to vector<16x128xf32>
    %c7_312 = arith.constant 7 : index
    %c0_313 = arith.constant 0 : index
    %c0_314 = arith.constant 0 : index
    %465 = vector.load %arg6[%c7_312, %c0_313, %c0_314] : memref<8x16x1024xf32, #tpu.memory_space<vmem>>, vector<1x16x128xf32>
    %466 = vector.shape_cast %465 : vector<1x16x128xf32> to vector<16x128xf32>
    %467 = vector.shape_cast %464 : vector<16x128xf32> to vector<1x16x128xf32>
    tpu.vector_store %arg6[%c7_312, %c0_313, %c0_314], %467 {strides = array<i32>} : memref<8x16x1024xf32, #tpu.memory_space<vmem>>, vector<1x16x128xf32>,
    %468 = vector.extract_strided_slice %462 {offsets = [16, 0], sizes = [16, 128], strides = [1, 1]} : vector<128x128xf32> to vector<16x128xf32>
    %c7_315 = arith.constant 7 : index
    %c0_316 = arith.constant 0 : index
    %c128_317 = arith.constant 128 : index
    %469 = vector.load %arg6[%c7_315, %c0_316, %c128_317] : memref<8x16x1024xf32, #tpu.memory_space<vmem>>, vector<1x16x128xf32>
    %470 = vector.shape_cast %469 : vector<1x16x128xf32> to vector<16x128xf32>
    %471 = vector.shape_cast %468 : vector<16x128xf32> to vector<1x16x128xf32>
    tpu.vector_store %arg6[%c7_315, %c0_316, %c128_317], %471 {strides = array<i32>} : memref<8x16x1024xf32, #tpu.memory_space<vmem>>, vector<1x16x128xf32>,
    %472 = vector.extract_strided_slice %462 {offsets = [32, 0], sizes = [16, 128], strides = [1, 1]} : vector<128x128xf32> to vector<16x128xf32>
    %c7_318 = arith.constant 7 : index
    %c0_319 = arith.constant 0 : index
    %c256_320 = arith.constant 256 : index
    %473 = vector.load %arg6[%c7_318, %c0_319, %c256_320] : memref<8x16x1024xf32, #tpu.memory_space<vmem>>, vector<1x16x128xf32>
    %474 = vector.shape_cast %473 : vector<1x16x128xf32> to vector<16x128xf32>
    %475 = vector.shape_cast %472 : vector<16x128xf32> to vector<1x16x128xf32>
    tpu.vector_store %arg6[%c7_318, %c0_319, %c256_320], %475 {strides = array<i32>} : memref<8x16x1024xf32, #tpu.memory_space<vmem>>, vector<1x16x128xf32>,
    %476 = vector.extract_strided_slice %462 {offsets = [48, 0], sizes = [16, 128], strides = [1, 1]} : vector<128x128xf32> to vector<16x128xf32>
    %c7_321 = arith.constant 7 : index
    %c0_322 = arith.constant 0 : index
    %c384_323 = arith.constant 384 : index
    %477 = vector.load %arg6[%c7_321, %c0_322, %c384_323] : memref<8x16x1024xf32, #tpu.memory_space<vmem>>, vector<1x16x128xf32>
    %478 = vector.shape_cast %477 : vector<1x16x128xf32> to vector<16x128xf32>
    %479 = vector.shape_cast %476 : vector<16x128xf32> to vector<1x16x128xf32>
    tpu.vector_store %arg6[%c7_321, %c0_322, %c384_323], %479 {strides = array<i32>} : memref<8x16x1024xf32, #tpu.memory_space<vmem>>, vector<1x16x128xf32>,
    %480 = vector.extract_strided_slice %462 {offsets = [64, 0], sizes = [16, 128], strides = [1, 1]} : vector<128x128xf32> to vector<16x128xf32>
    %c7_324 = arith.constant 7 : index
    %c0_325 = arith.constant 0 : index
    %c512_326 = arith.constant 512 : index
    %481 = vector.load %arg6[%c7_324, %c0_325, %c512_326] : memref<8x16x1024xf32, #tpu.memory_space<vmem>>, vector<1x16x128xf32>
    %482 = vector.shape_cast %481 : vector<1x16x128xf32> to vector<16x128xf32>
    %483 = vector.shape_cast %480 : vector<16x128xf32> to vector<1x16x128xf32>
    tpu.vector_store %arg6[%c7_324, %c0_325, %c512_326], %483 {strides = array<i32>} : memref<8x16x1024xf32, #tpu.memory_space<vmem>>, vector<1x16x128xf32>,
    %484 = vector.extract_strided_slice %462 {offsets = [80, 0], sizes = [16, 128], strides = [1, 1]} : vector<128x128xf32> to vector<16x128xf32>
    %c7_327 = arith.constant 7 : index
    %c0_328 = arith.constant 0 : index
    %c640_329 = arith.constant 640 : index
    %485 = vector.load %arg6[%c7_327, %c0_328, %c640_329] : memref<8x16x1024xf32, #tpu.memory_space<vmem>>, vector<1x16x128xf32>
    %486 = vector.shape_cast %485 : vector<1x16x128xf32> to vector<16x128xf32>
    %487 = vector.shape_cast %484 : vector<16x128xf32> to vector<1x16x128xf32>
    tpu.vector_store %arg6[%c7_327, %c0_328, %c640_329], %487 {strides = array<i32>} : memref<8x16x1024xf32, #tpu.memory_space<vmem>>, vector<1x16x128xf32>,
    %488 = vector.extract_strided_slice %462 {offsets = [96, 0], sizes = [16, 128], strides = [1, 1]} : vector<128x128xf32> to vector<16x128xf32>
    %c7_330 = arith.constant 7 : index
    %c0_331 = arith.constant 0 : index
    %c768_332 = arith.constant 768 : index
    %489 = vector.load %arg6[%c7_330, %c0_331, %c768_332] : memref<8x16x1024xf32, #tpu.memory_space<vmem>>, vector<1x16x128xf32>
    %490 = vector.shape_cast %489 : vector<1x16x128xf32> to vector<16x128xf32>
    %491 = vector.shape_cast %488 : vector<16x128xf32> to vector<1x16x128xf32>
    tpu.vector_store %arg6[%c7_330, %c0_331, %c768_332], %491 {strides = array<i32>} : memref<8x16x1024xf32, #tpu.memory_space<vmem>>, vector<1x16x128xf32>,
    %492 = vector.extract_strided_slice %462 {offsets = [112, 0], sizes = [16, 128], strides = [1, 1]} : vector<128x128xf32> to vector<16x128xf32>
    %c7_333 = arith.constant 7 : index
    %c0_334 = arith.constant 0 : index
    %c896_335 = arith.constant 896 : index
    %493 = vector.load %arg6[%c7_333, %c0_334, %c896_335] : memref<8x16x1024xf32, #tpu.memory_space<vmem>>, vector<1x16x128xf32>
    %494 = vector.shape_cast %493 : vector<1x16x128xf32> to vector<16x128xf32>
    %495 = vector.shape_cast %492 : vector<16x128xf32> to vector<1x16x128xf32>
    tpu.vector_store %arg6[%c7_333, %c0_334, %c896_335], %495 {strides = array<i32>} : memref<8x16x1024xf32, #tpu.memory_space<vmem>>, vector<1x16x128xf32>,
    return
  }
  func.func @transform_0(%arg0: i32) -> (i32, i32, i32) {
    %c0_i32 = arith.constant 0 : i32
    %c0_i32_0 = arith.constant 0 : i32
    %c0_i32_1 = arith.constant 0 : i32
    return %arg0, %c0_i32, %c0_i32_0 : i32, i32, i32
  }
  func.func @transform_1(%arg0: i32) -> (i32, i32) {
    %c0_i32 = arith.constant 0 : i32
    %c0_i32_0 = arith.constant 0 : i32
    %c0_i32_1 = arith.constant 0 : i32
    return %c0_i32, %c0_i32_0 : i32, i32
  }
  func.func @transform_2(%arg0: i32) -> (i32, i32) {
    %c0_i32 = arith.constant 0 : i32
    %c0_i32_0 = arith.constant 0 : i32
    %c0_i32_1 = arith.constant 0 : i32
    return %c0_i32, %c0_i32_0 : i32, i32
  }
  func.func @transform_3(%arg0: i32) -> (i32, i32) {
    %c0_i32 = arith.constant 0 : i32
    %c0_i32_0 = arith.constant 0 : i32
    %c0_i32_1 = arith.constant 0 : i32
    return %c0_i32, %c0_i32_0 : i32, i32
  }
  func.func @transform_4(%arg0: i32) -> (i32, i32) {
    %c0_i32 = arith.constant 0 : i32
    %c0_i32_0 = arith.constant 0 : i32
    %c0_i32_1 = arith.constant 0 : i32
    return %c0_i32, %c0_i32_0 : i32, i32
  }
  func.func @transform_5(%arg0: i32) -> (i32, i32, i32) {
    %c0_i32 = arith.constant 0 : i32
    %c0_i32_0 = arith.constant 0 : i32
    %c0_i32_1 = arith.constant 0 : i32
    return %arg0, %c0_i32, %c0_i32_0 : i32, i32, i32
  }
  func.func @transform_6(%arg0: i32) -> (i32, i32) {
    %c0_i32 = arith.constant 0 : i32
    %c0_i32_0 = arith.constant 0 : i32
    return %c0_i32, %arg0 : i32, i32
  }
}

</mosaic_0001>

<bundles_post_ra>
// kernel: tpu_custom_call.1
= control target key start
LH: loop header
LB: loop body
LE: loop exit
PB: predicated region body
PF: predicated region fallthrough
CT: control target
= control target key end

     0   :  { %12 = vsyncpa [#allocation3], 0  ;;  %s6497_s0 = inlined_call_operand.hbm [shape: f32[16,128,128], index: 0, kind: input, shape index: {}]   ;;  %s6498_s1 = inlined_call_operand.vmem [shape: f32[128,128], index: 1, kind: input, shape index: {}]   ;;  %s6499_s2 = inlined_call_operand.hbm [shape: f32[128,128], index: 2, kind: input, shape index: {}]   ;;  %s6500_s3 = inlined_call_operand.vmem [shape: f32[128,64], index: 3, kind: input, shape index: {}]   ;;  %s6501_s4 = inlined_call_operand.hbm [shape: f32[64,256], index: 4, kind: input, shape index: {}]   ;;  %s6502_s5 = inlined_call_operand.hbm [shape: f32[16,16,1024], index: 5, kind: output, shape index: {0}]   ;;  %s6503_s6 = inlined_call_operand.hbm [shape: f32[128,2048], index: 6, kind: output, shape index: {1}]  }
   0x1   :  { %14 = vsyncpa [#allocation3 + $0x1], 0 }
   0x2   :  { %15 = vsyncpa [#allocation6], 0 }
   0x3   :  { %16 = vsyncpa [#allocation4], 0 }
   0x4   :  { %18 = vsyncpa [#allocation4 + $0x1], 0 }
   0x5   :  { %19 = vsyncpa [#allocation10], 0 }
   0x6   :  { %21 = vsyncpa [#allocation10 + $0x1], 0  ;;  %s3818_s21 = smov 0   ;;  %s3820_s22 = smov 0  }
   0x7   :  { %s3822_s23 = smov 0   ;;  %s3824_s24 = smov 0  }
   0x8 LB: > { %s3839_s25 = sadd.s32 4294967295, %s3771_s24   ;;  %s3162_s26 = sadd.s32 4294967294, %s3771_s24   ;;  %s3771_s24 = sphi %s3824_s24, %s7015_s24   ;;  %s3767_s23 = sphi %s3822_s23, %s7014_s23   ;;  %s3763_s22 = sphi %s3820_s22, %s7013_s22   ;;  %s3759_s21 = sphi %s3818_s21, %s7012_s21  }
   0x9   : > { %p47_p0 = scmp.ne.s32.totalorder %s3763_s22, %s3759_s21  ;;  %p48_p1 = scmp.eq.s32.totalorder %s3839_s25, 0 }
   0xa   : > { %p155_p2 = scmp.eq.s32.totalorder %s3839_s25, 1  ;;  %p161_p3 = scmp.eq.s32.totalorder %s3162_s26, 1 }
   0xb   : > { %p3848_p4 = por %p48_p1, %p47_p0  ;;  %p3163_p5 = scmp.ge.s32.totalorder %s3771_s24, 1 }
   0xc   : > { %p3853_p6 = por %p161_p3, %p47_p0  ;;  %p194_p7 = scmp.lt.s32.totalorder %s3771_s24, 3 }
   0xd   : > { %s208_s7 = sshll.u32 %s6499_s2, 4  ;;  %s3773_s9 = smov [#allocation5]   ;;  %s209_s7 = int_to_ptr.hbm [resolvable:$true] %s208_s7 }
   0xe   : > { %p3861_p8 = pnand %p3163_p5, %p194_p7  ;;  %s210_s10 = sshll.u32 %s3773_s9, 4  ;;  %s211_s10 = int_to_ptr.vmem [resolvable:$true] %s210_s10 }
   0xf   : > { %s225_s13 = sshll.u32 %s6501_s4, 4  ;;  %s6504_s14 = smov 128   ;;  %s226_s13 = int_to_ptr.hbm [resolvable:$true] %s225_s13 }
  0x10   : > { %p3445_p9 = pneg %p3861_p8  ;;  %s6505_s15 = smov 8  }
  0x11   : > { %s3776_s16 = smov [#allocation7]   ;;  %s3777_s18 = smov 256  }
  0x12   : > { %p3446_p10 = pnand %p3445_p9, %p48_p1  ;;  %s227_s17 = sshll.u32 %s3776_s16, 4  ;;  %s228_s17 = int_to_ptr.vmem [resolvable:$true] %s227_s17 }
  0x13   : > { %s3778_s19 = smov 16   ;;  %s3877_s20 = sadd.s32 1, %s3771_s24  }
  0x14   : > { %3448 = dma.hbm_to_vmem [thread:$0]  (!%p3446_p10), %s209_s7, 2048, %s211_s10, [#allocation6], %s6504_s14, %s6504_s14, %s6505_s15  }
  0x15   : > { %3451 = dma.hbm_to_vmem [thread:$0]  (!%p3446_p10), %s226_s13, 2048, %s228_s17, [#allocation6], %s3777_s18, %s3777_s18, %s3778_s19  }
  0x16   : > { %s31_s26 = ssub.s32 %s3771_s24, %s3877_s20  ;;  %s34_s29 = sadd.s32 1, %s3767_s23 }
  0x17   : > { %p32_p12 = scmp.eq.s32.totalorder %s31_s26, 0  ;;  %p41_p13 = scmp.ne.s32.totalorder %s3767_s23, %s3763_s22 }
  0x18   : > { %p42_p0 = scmp.eq.s32.totalorder %s3771_s24, 0  ;;  %p3465_p7 = scmp.lt.s32.totalorder %s3771_s24, 2 }
  0x19   : > { %s3886_s30 = scalar_select %p32_p12, %s3767_s23, %s34_s29  }
  0x1a   : > { %p43_p3 = por %p42_p0, %p41_p13  ;;  %p3890_p5 = por %p155_p2, %p41_p13 }
  0x1b   : > { %s241_s9 = sand.u32 1, %s3767_s23   ;;  %s3427_s11 = sshll.u32 %s3771_s24, 10 }
  0x1c   : > { %s3167_s10 = sshll.u32 %s241_s9, 10  ;;  %s251_s16 = scalar_lea.hbm %s6497_s0, %s3427_s11 }
  0x1d   : > { %s245_s17 = scalar_lea.vmem [#allocation2], %s3167_s10  ;;  %s252_s19 = sshll.u32 %s251_s16, 4  ;;  %s253_s19 = int_to_ptr.hbm [resolvable:$true] %s252_s19 }
  0x1e   : > { %s254_s18 = sshll.u32 %s245_s17, 4  ;;  %p3900_p9 = pnand %p3465_p7, %p43_p3  ;;  %s255_s18 = int_to_ptr.vmem [resolvable:$true] %s254_s18 }
  0x1f   : > { %s242_s29 = scalar_lea.sflag [#allocation3], %s241_s9  ;;  %s3639_s14 = sshra.s32 %s253_s19, 4  ;;  %s3640_s14 = int_to_ptr.hbm [resolvable:$true] %s3639_s14 }
  0x20   : > { %s3641_s15 = scalar_lea.hbm %s3640_s14, 1024  ;;  %p3643_p10 = pneg %p3900_p9 }
  0x21   : > { %p3642_p2 = scmp.ne.s32.totalorder %s3640_s14, %s3641_s15  ;;  %s3646_s12 = scalar_lea.hbm %s6497_s0, 2048 }
  0x22   : > { %p3647_p0 = scmp.lt.s32.totalorder %s3640_s14, %s6497_s0  ;;  %p3648_p3 = scmp.lt.s32.totalorder %s3646_s12, %s3641_s15 }
  0x23   : > { %p3644_p12 = pnand %p3643_p10, %p3642_p2 }
  0x24   : > { %p3649_p7 = por %p3648_p3, %p3647_p0 }
  0x25   : > { %p3645_p13 = pneg %p3644_p12 }
  0x27   : > { %p3650_p11 = pnand %p3649_p7, %p3645_p13 }
  0x29   : > { %3653 = shalt.err (!%p3650_p11)
}
  0x2a   : > { %s6685_s9 = smov 8   ;;  %s6686_s17 = smov 128  }
  0x2b   : > { %3455 = dma.hbm_to_vmem [thread:$0]  (!%p3900_p9), %s253_s19, 16384, %s255_s18, %s242_s29, %s6686_s17, %s6686_s17, %s6685_s9  }
  0x2c   : > { %266 = sbr.rel (%p3861_p8) target bundleno = 1002 (0x3ea), region = 40 }
  0x31   : > { %s3920_s11 = sand.u32 1, %s3763_s22  }
  0x32   : > { %s3923_s14 = sshll.u32 %s3920_s11, 10  ;;  %s269_s15 = scalar_lea.sflag [#allocation3], %s3920_s11 }
  0x33   : > { %s3927_s10 = scalar_lea.vmem [#allocation2], %s3923_s14 }
  0x34   : > { %3742 = dma.done.wait (%p3848_p4), %s269_s15, 16384  }
  0x35   : > { %3744 = vsyncadd (%p3848_p4), %s269_s15, 4294950912 }
  0x36   : > { %3746 = dma.done.wait (%p48_p1), [#allocation6], 4096  }
  0x37   : > { %3748 = vsyncadd (%p48_p1), [#allocation6], 4294963200  ;;  %v3179_v0 = vld [vmem:[%s3927_s10 + $0x80] sm:$0xff]  ;;  %v3180_v3 = vld [vmem:[%s3927_s10 + $0x88] sm:$0xff]  ;;  %vm450_vm1 = vcmask 523264   ;;  %s5045_s13 = scalar_lea.vmem [#allocation9], %s3923_s14 }
  0x38   : > { %v320_v1 = vld [vmem:[%s3927_s10] sm:$0xff]  ;;  %677 = vxpose.xlu1.b32.start [1/16] %v3179_v0, 128  ;;  %v321_v4 = vld [vmem:[%s3927_s10 + $0x8] sm:$0xff]  ;;  %v3181_v6 = vld [vmem:[%s3927_s10 + $0x90] sm:$0xff]  ;;  %s3429_s15 = sshll.u32 %s3839_s25, 10  ;;  %s3430_s19 = sshll.u32 %s3839_s25, 6 }
  0x39   : > { %336 = vxpose.xlu0.b32.start [1/16] %v320_v1, 128  ;;  %v3213_v2 = vld [vmem:[%s3927_s10 + $0x100] sm:$0xff]  ;;  %v3214_v5 = vld [vmem:[%s3927_s10 + $0x108] sm:$0xff]  ;;  %v322_v7 = vld [vmem:[%s3927_s10 + $0x10] sm:$0xff]  ;;  %s3016_s18 = scalar_lea.hbm %s6502_s5, %s3429_s15  ;;  %s3033_s16 = scalar_lea.hbm %s6503_s6, %s3430_s19 }
  0x3a   : > { %1011 = vxpose.xlu2.b32.start [1/16] %v3213_v2, 128  ;;  %v3215_v8 = vld [vmem:[%s3927_s10 + $0x110] sm:$0xff]  ;;  %v3182_v9 = vld [vmem:[%s3927_s10 + $0x98] sm:$0xff]  ;;  %v3183_v12 = vld [vmem:[%s3927_s10 + $0xa0] sm:$0xff]  ;;  %s3019_s29 = sshll.u32 %s3016_s18, 4  ;;  %s3034_s9 = sshll.u32 %s5045_s13, 4  ;;  %s3020_s29 = int_to_ptr.hbm [resolvable:$true] %s3019_s29  ;;  %s6447_s9 = int_to_ptr.vmem [resolvable:$true] %s3034_s9 }
  0x3b   : > { %v323_v10 = vld [vmem:[%s3927_s10 + $0x18] sm:$0xff]  ;;  %v324_v13 = vld [vmem:[%s3927_s10 + $0x20] sm:$0xff]  ;;  %v3184_v15 = vld [vmem:[%s3927_s10 + $0xa8] sm:$0xff]  ;;  %s3036_s25 = sshll.u32 %s3033_s16, 4  ;;  %s2999_s17 = scalar_lea.sflag [#allocation4], %s3920_s11  ;;  %s6450_s25 = int_to_ptr.hbm [resolvable:$true] %s3036_s25 }
  0x3c   : > { %v3216_v11 = vld [vmem:[%s3927_s10 + $0x118] sm:$0xff]  ;;  %v3217_v14 = vld [vmem:[%s3927_s10 + $0x120] sm:$0xff]  ;;  %v325_v16 = vld [vmem:[%s3927_s10 + $0x28] sm:$0xff]  ;;  %s3683_s15 = sshra.s32 %s3020_s29, 4  ;;  %s3689_s18 = scalar_lea.hbm %s6502_s5, 2048  ;;  %s3684_s15 = int_to_ptr.hbm [resolvable:$true] %s3683_s15 }
  0x3d   : > { %v3218_v17 = vld [vmem:[%s3927_s10 + $0x128] sm:$0xff]  ;;  %v3185_v18 = vld [vmem:[%s3927_s10 + $0xb0] sm:$0xff]  ;;  %v3186_v21 = vld [vmem:[%s3927_s10 + $0xb8] sm:$0xff]  ;;  %s3685_s27 = scalar_lea.hbm %s3684_s15, 1024  ;;  %p3690_p11 = scmp.lt.s32.totalorder %s3684_s15, %s6502_s5 }
  0x3e   : > { %v326_v19 = vld [vmem:[%s3927_s10 + $0x30] sm:$0xff]  ;;  %v327_v22 = vld [vmem:[%s3927_s10 + $0x38] sm:$0xff]  ;;  %v3187_v24 = vld [vmem:[%s3927_s10 + $0xc0] sm:$0xff]  ;;  %p3686_p1 = scmp.ne.s32.totalorder %s3684_s15, %s3685_s27  ;;  %p3691_p9 = scmp.lt.s32.totalorder %s3689_s18, %s3685_s27 }
  0x3f   : > { %v3219_v20 = vld [vmem:[%s3927_s10 + $0x130] sm:$0xff]  ;;  %v3220_v23 = vld [vmem:[%s3927_s10 + $0x138] sm:$0xff]  ;;  %v328_v25 = vld [vmem:[%s3927_s10 + $0x40] sm:$0xff] }
  0x40   : > { %678 = vxpose.xlu1.b32.cont [2/16] %v3180_v3, 128  ;;  %v3221_v26 = vld [vmem:[%s3927_s10 + $0x140] sm:$0xff]  ;;  %v3188_v27 = vld [vmem:[%s3927_s10 + $0xc8] sm:$0xff]  ;;  %v3189_v30 = vld [vmem:[%s3927_s10 + $0xd0] sm:$0xff]  ;;  %p3687_p4 = pnand %p3686_p1, %p3890_p5  ;;  %p3692_p2 = por %p3691_p9, %p3690_p11 }
  0x41   : > { %337 = vxpose.xlu0.b32.cont [2/16] %v321_v4, 128  ;;  %v329_v28 = vld [vmem:[%s3927_s10 + $0x48] sm:$0xff]  ;;  %v330_v31 = vld [vmem:[%s3927_s10 + $0x50] sm:$0xff]  ;;  %v3190_v33 = vld [vmem:[%s3927_s10 + $0xd8] sm:$0xff] }
  0x42   : > { %1012 = vxpose.xlu2.b32.cont [2/16] %v3214_v5, 128  ;;  %v3222_v29 = vld [vmem:[%s3927_s10 + $0x148] sm:$0xff]  ;;  %v3223_v32 = vld [vmem:[%s3927_s10 + $0x150] sm:$0xff]  ;;  %v331_v34 = vld [vmem:[%s3927_s10 + $0x58] sm:$0xff]  ;;  %p3688_p8 = pneg %p3687_p4 }
  0x43   : > { %v3224_v35 = vld [vmem:[%s3927_s10 + $0x158] sm:$0xff]  ;;  %v3191_v36 = vld [vmem:[%s3927_s10 + $0xe0] sm:$0xff]  ;;  %v3192_v39 = vld [vmem:[%s3927_s10 + $0xe8] sm:$0xff] }
  0x44   : > { %v332_v37 = vld [vmem:[%s3927_s10 + $0x60] sm:$0xff]  ;;  %v333_v40 = vld [vmem:[%s3927_s10 + $0x68] sm:$0xff]  ;;  %v3193_v42 = vld [vmem:[%s3927_s10 + $0xf0] sm:$0xff]  ;;  %p3693_p10 = pnand %p3692_p2, %p3688_p8 }
  0x45   : > { %v3225_v38 = vld [vmem:[%s3927_s10 + $0x160] sm:$0xff]  ;;  %v3226_v41 = vld [vmem:[%s3927_s10 + $0x168] sm:$0xff]  ;;  %v334_v43 = vld [vmem:[%s3927_s10 + $0x70] sm:$0xff] }
  0x46   : > { %v3227_v44 = vld [vmem:[%s3927_s10 + $0x170] sm:$0xff]  ;;  %v3194_v45 = vld [vmem:[%s3927_s10 + $0xf8] sm:$0xff]  ;;  %v3281_v48 = vld [vmem:[%s3927_s10 + $0x200] sm:$0xff] }
  0x47   : > { %v335_v46 = vld [vmem:[%s3927_s10 + $0x78] sm:$0xff]  ;;  %v3247_v49 = vld [vmem:[%s3927_s10 + $0x180] sm:$0xff]  ;;  %v3282_v51 = vld [vmem:[%s3927_s10 + $0x208] sm:$0xff] }
  0x48   : > { %679 = vxpose.xlu1.b32.cont [3/16] %v3181_v6, 128  ;;  %v3228_v47 = vld [vmem:[%s3927_s10 + $0x178] sm:$0xff]  ;;  %v3315_v50 = vld [vmem:[%s3927_s10 + $0x280] sm:$0xff]  ;;  %v3248_v52 = vld [vmem:[%s3927_s10 + $0x188] sm:$0xff] }
  0x49   : > { %338 = vxpose.xlu0.b32.cont [3/16] %v322_v7, 128  ;;  %v3316_v53 = vld [vmem:[%s3927_s10 + $0x288] sm:$0xff]  ;;  %v3283_v54 = vld [vmem:[%s3927_s10 + $0x210] sm:$0xff]  ;;  %v3284_v57 = vld [vmem:[%s3927_s10 + $0x218] sm:$0xff] }
  0x4a   : > { %1013 = vxpose.xlu2.b32.cont [3/16] %v3215_v8, 128  ;;  %v3249_v55 = vld [vmem:[%s3927_s10 + $0x190] sm:$0xff]  ;;  %v3250_v58 = vld [vmem:[%s3927_s10 + $0x198] sm:$0xff]  ;;  %v3285_v61 = vld [vmem:[%s3927_s10 + $0x220] sm:$0xff] }
  0x4b   : > { %v3317_v56 = vld [vmem:[%s3927_s10 + $0x290] sm:$0xff]  ;;  %v3318_v59 = vld [vmem:[%s3927_s10 + $0x298] sm:$0xff]  ;;  %v3251_v62 = vld [vmem:[%s3927_s10 + $0x1a0] sm:$0xff] }
  0x4c   : > { %v3319_v63 = vld [vmem:[%s3927_s10 + $0x2a0] sm:$0xff]  ;;  %v3286_v3 = vld [vmem:[%s3927_s10 + $0x228] sm:$0xff] }
  0x4d   : > { %v3252_v4 = vld [vmem:[%s3927_s10 + $0x1a8] sm:$0xff] }
  0x4e   : > { %v3320_v5 = vld [vmem:[%s3927_s10 + $0x2a8] sm:$0xff] }
  0x50   : > { %680 = vxpose.xlu1.b32.cont [4/16] %v3182_v9, 128  ;;  %v3287_v9 = vld [vmem:[%s3927_s10 + $0x230] sm:$0xff] }
  0x51   : > { %339 = vxpose.xlu0.b32.cont [4/16] %v323_v10, 128  ;;  %v3253_v10 = vld [vmem:[%s3927_s10 + $0x1b0] sm:$0xff] }
  0x52   : > { %1014 = vxpose.xlu2.b32.cont [4/16] %v3216_v11, 128  ;;  %v3321_v11 = vld [vmem:[%s3927_s10 + $0x2b0] sm:$0xff] }
  0x58   : > { %681 = vxpose.xlu1.b32.cont [5/16] %v3183_v12, 128 }
  0x59   : > { %340 = vxpose.xlu0.b32.cont [5/16] %v324_v13, 128 }
  0x5a   : > { %1015 = vxpose.xlu2.b32.cont [5/16] %v3217_v14, 128 }
  0x60   : > { %682 = vxpose.xlu1.b32.cont [6/16] %v3184_v15, 128  ;;  %v3288_v15 = vld [vmem:[%s3927_s10 + $0x238] sm:$0xff] }
  0x61   : > { %341 = vxpose.xlu0.b32.cont [6/16] %v325_v16, 128  ;;  %v3254_v16 = vld [vmem:[%s3927_s10 + $0x1b8] sm:$0xff] }
  0x62   : > { %1016 = vxpose.xlu2.b32.cont [6/16] %v3218_v17, 128  ;;  %v3322_v17 = vld [vmem:[%s3927_s10 + $0x2b8] sm:$0xff] }
  0x68   : > { %683 = vxpose.xlu1.b32.cont [7/16] %v3185_v18, 128 }
  0x69   : > { %342 = vxpose.xlu0.b32.cont [7/16] %v326_v19, 128 }
  0x6a   : > { %1017 = vxpose.xlu2.b32.cont [7/16] %v3219_v20, 128 }
  0x70   : > { %684 = vxpose.xlu1.b32.cont [8/16] %v3186_v21, 128  ;;  %v3289_v21 = vld [vmem:[%s3927_s10 + $0x240] sm:$0xff] }
  0x71   : > { %343 = vxpose.xlu0.b32.cont [8/16] %v327_v22, 128  ;;  %v3255_v22 = vld [vmem:[%s3927_s10 + $0x1c0] sm:$0xff] }
  0x72   : > { %1018 = vxpose.xlu2.b32.cont [8/16] %v3220_v23, 128  ;;  %v3323_v23 = vld [vmem:[%s3927_s10 + $0x2c0] sm:$0xff] }
  0x78   : > { %685 = vxpose.xlu1.b32.cont [9/16] %v3187_v24, 128 }
  0x79   : > { %344 = vxpose.xlu0.b32.cont [9/16] %v328_v25, 128 }
  0x7a   : > { %1019 = vxpose.xlu2.b32.cont [9/16] %v3221_v26, 128 }
  0x80   : > { %686 = vxpose.xlu1.b32.cont [10/16] %v3188_v27, 128  ;;  %v3290_v27 = vld [vmem:[%s3927_s10 + $0x248] sm:$0xff] }
  0x81   : > { %345 = vxpose.xlu0.b32.cont [10/16] %v329_v28, 128  ;;  %v3256_v28 = vld [vmem:[%s3927_s10 + $0x1c8] sm:$0xff] }
  0x82   : > { %1020 = vxpose.xlu2.b32.cont [10/16] %v3222_v29, 128  ;;  %v3324_v29 = vld [vmem:[%s3927_s10 + $0x2c8] sm:$0xff] }
  0x88   : > { %687 = vxpose.xlu1.b32.cont [11/16] %v3189_v30, 128 }
  0x89   : > { %346 = vxpose.xlu0.b32.cont [11/16] %v330_v31, 128 }
  0x8a   : > { %1021 = vxpose.xlu2.b32.cont [11/16] %v3223_v32, 128 }
  0x90   : > { %688 = vxpose.xlu1.b32.cont [12/16] %v3190_v33, 128  ;;  %v3291_v33 = vld [vmem:[%s3927_s10 + $0x250] sm:$0xff] }
  0x91   : > { %347 = vxpose.xlu0.b32.cont [12/16] %v331_v34, 128  ;;  %v3257_v34 = vld [vmem:[%s3927_s10 + $0x1d0] sm:$0xff] }
  0x92   : > { %1022 = vxpose.xlu2.b32.cont [12/16] %v3224_v35, 128  ;;  %v3325_v35 = vld [vmem:[%s3927_s10 + $0x2d0] sm:$0xff] }
  0x98   : > { %689 = vxpose.xlu1.b32.cont [13/16] %v3191_v36, 128 }
  0x99   : > { %348 = vxpose.xlu0.b32.cont [13/16] %v332_v37, 128 }
  0x9a   : > { %1023 = vxpose.xlu2.b32.cont [13/16] %v3225_v38, 128 }
  0xa0   : > { %690 = vxpose.xlu1.b32.cont [14/16] %v3192_v39, 128  ;;  %v3292_v39 = vld [vmem:[%s3927_s10 + $0x258] sm:$0xff] }
  0xa1   : > { %349 = vxpose.xlu0.b32.cont [14/16] %v333_v40, 128  ;;  %v3258_v40 = vld [vmem:[%s3927_s10 + $0x1d8] sm:$0xff] }
  0xa2   : > { %1024 = vxpose.xlu2.b32.cont [14/16] %v3226_v41, 128  ;;  %v3326_v41 = vld [vmem:[%s3927_s10 + $0x2d8] sm:$0xff] }
  0xa8   : > { %691 = vxpose.xlu1.b32.cont [15/16] %v3193_v42, 128 }
  0xa9   : > { %350 = vxpose.xlu0.b32.cont [15/16] %v334_v43, 128 }
  0xaa   : > { %1025 = vxpose.xlu2.b32.cont [15/16] %v3227_v44, 128 }
  0xb0   : > { %692 = vxpose.xlu1.b32.end [16/16] %v3194_v45, 128 }
  0xb1   : > { %351 = vxpose.xlu0.b32.end [16/16] %v335_v46, 128  ;;  %v3293_v46 = vld [vmem:[%s3927_s10 + $0x260] sm:$0xff] }
  0xb2   : > { %1026 = vxpose.xlu2.b32.end [16/16] %v3228_v47, 128  ;;  %v3259_v47 = vld [vmem:[%s3927_s10 + $0x1e0] sm:$0xff] }
  0xb8   : > { %1679 = vxpose.xlu1.b32.start [1/16] %v3281_v48, 128  ;;  %v4078_v48 = vld [vmem:[%s6500_s3 + $0x78] sm:$0xff] }
  0xb9   : > { %1345 = vxpose.xlu0.b32.start [1/16] %v3247_v49, 128  ;;  %413 = vmatpush.msra.mxu0 %v4078_v48  ;;  %v3327_v49 = vld [vmem:[%s3927_s10 + $0x2e0] sm:$0xff] }
  0xba   : > { %2013 = vxpose.xlu2.b32.start [1/16] %v3315_v50, 128  ;;  %747 = vmatpush.msra.mxu3 %v4078_v48  ;;  %v4086_v50 = vld [vmem:[%s6500_s3 + $0x70] sm:$0xff] }
  0xbb   : > { %414 = vmatpush.msra.mxu0 %v4086_v50 }
  0xbc   : > { %748 = vmatpush.msra.mxu3 %v4086_v50 }
  0xc0   : > { %1680 = vxpose.xlu1.b32.cont [2/16] %v3282_v51, 128  ;;  %v4091_v51 = vld [vmem:[%s6500_s3 + $0x68] sm:$0xff] }
  0xc1   : > { %1346 = vxpose.xlu0.b32.cont [2/16] %v3248_v52, 128  ;;  %415 = vmatpush.msra.mxu0 %v4091_v51 }
  0xc2   : > { %2014 = vxpose.xlu2.b32.cont [2/16] %v3316_v53, 128  ;;  %749 = vmatpush.msra.mxu3 %v4091_v51 }
  0xc8   : > { %1681 = vxpose.xlu1.b32.cont [3/16] %v3283_v54, 128 }
  0xc9   : > { %1347 = vxpose.xlu0.b32.cont [3/16] %v3249_v55, 128 }
  0xca   : > { %2015 = vxpose.xlu2.b32.cont [3/16] %v3317_v56, 128  ;;  %v4107_v56 = vld [vmem:[%s6500_s3 + $0x60] sm:$0xff] }
  0xcb   : > { %416 = vmatpush.msra.mxu0 %v4107_v56  ;;  %750 = vmatpush.msra.mxu3 %v4107_v56 }
  0xd0   : > { %1682 = vxpose.xlu1.b32.cont [4/16] %v3284_v57, 128 }
  0xd1   : > { %1348 = vxpose.xlu0.b32.cont [4/16] %v3250_v58, 128  ;;  %v3294_v58 = vld [vmem:[%s3927_s10 + $0x268] sm:$0xff] }
  0xd2   : > { %2016 = vxpose.xlu2.b32.cont [4/16] %v3318_v59, 128  ;;  %v3260_v59 = vld [vmem:[%s3927_s10 + $0x1e8] sm:$0xff] }
  0xd3   : > { %v3997_v60 = vpop.trf.xlu2 }
  0xd4   : > { %6687 = vst [vmem:[#allocation15_spill] sm:$0xff] %v3997_v60 }
  0xd8   : > { %1683 = vxpose.xlu1.b32.cont [5/16] %v3285_v61, 128  ;;  %v4116_v61 = vld [vmem:[%s6500_s3 + $0x58] sm:$0xff] }
  0xd9   : > { %1349 = vxpose.xlu0.b32.cont [5/16] %v3251_v62, 128  ;;  %v3328_v62 = vld [vmem:[%s3927_s10 + $0x2e8] sm:$0xff]  ;;  %417 = vmatpush.msra.mxu0 %v4116_v61 }
  0xda   : > { %2017 = vxpose.xlu2.b32.cont [5/16] %v3319_v63, 128  ;;  %751 = vmatpush.msra.mxu3 %v4116_v61  ;;  %v4125_v63 = vld [vmem:[%s6500_s3 + $0x50] sm:$0xff] }
  0xdb   : > { %v4002_v0 = vpop.trf.xlu2  ;;  %418 = vmatpush.msra.mxu0 %v4125_v63 }
  0xdc   : > { %6688 = vst [vmem:[#allocation16_spill] sm:$0xff] %v4002_v0  ;;  %v4004_v1 = vpop.trf.xlu1  ;;  %v1043_v45 = vadd.f32 %v4002_v0, %v3997_v60  ;;  %752 = vmatpush.msra.mxu3 %v4125_v63 }
  0xdd   : > { %6689 = vst [vmem:[#allocation17_spill] sm:$0xff] %v4004_v1  ;;  %v4006_v2 = vpop.trf.xlu0 }
  0xe0   : > { %1684 = vxpose.xlu1.b32.cont [6/16] %v3286_v3, 128  ;;  %v4130_v3 = vld [vmem:[%s6500_s3 + $0x48] sm:$0xff] }
  0xe1   : > { %1350 = vxpose.xlu0.b32.cont [6/16] %v3252_v4, 128  ;;  %419 = vmatpush.msra.mxu0 %v4130_v3 }
  0xe2   : > { %2018 = vxpose.xlu2.b32.cont [6/16] %v3320_v5, 128  ;;  %753 = vmatpush.msra.mxu3 %v4130_v3 }
  0xe3   : > { %v4011_v6 = vpop.trf.xlu2 }
  0xe4   : > { %6690 = vst [vmem:[#allocation18_spill] sm:$0xff] %v4011_v6  ;;  %v4013_v7 = vpop.trf.xlu1  ;;  %v1044_v52 = vadd.f32 %v1043_v45, %v4011_v6  ;;  %v4194_v45 = vld [vmem:[%s6500_s3 + $0x18] sm:$0xff]  ;;  %v3353_v6 = vld [vmem:[%s3927_s10 + $0x320] sm:$0xff] }
  0xe5   : > { %6691 = vst [vmem:[#allocation19_spill] sm:$0xff] %v4013_v7  ;;  %v4015_v8 = vpop.trf.xlu0 }
  0xe8   : > { %1685 = vxpose.xlu1.b32.cont [7/16] %v3287_v9, 128 }
  0xe9   : > { %1351 = vxpose.xlu0.b32.cont [7/16] %v3253_v10, 128 }
  0xea   : > { %2019 = vxpose.xlu2.b32.cont [7/16] %v3321_v11, 128  ;;  %v4146_v11 = vld [vmem:[%s6500_s3 + $0x40] sm:$0xff] }
  0xeb   : > { %v4020_v12 = vpop.trf.xlu2  ;;  %420 = vmatpush.msra.mxu0 %v4146_v11  ;;  %754 = vmatpush.msra.mxu3 %v4146_v11 }
  0xec   : > { %6692 = vst [vmem:[#allocation20_spill] sm:$0xff] %v4020_v12  ;;  %v4022_v13 = vpop.trf.xlu1  ;;  %v1045_v57 = vadd.f32 %v1044_v52, %v4020_v12  ;;  %v3387_v12 = vld [vmem:[%s3927_s10 + $0x3a0] sm:$0xff] }
  0xed   : > { %6693 = vst [vmem:[#allocation21_spill] sm:$0xff] %v4022_v13  ;;  %v4024_v14 = vpop.trf.xlu0 }
  0xf0   : > { %1686 = vxpose.xlu1.b32.cont [8/16] %v3288_v15, 128 }
  0xf1   : > { %1352 = vxpose.xlu0.b32.cont [8/16] %v3254_v16, 128  ;;  %v3295_v16 = vld [vmem:[%s3927_s10 + $0x270] sm:$0xff] }
  0xf2   : > { %2020 = vxpose.xlu2.b32.cont [8/16] %v3322_v17, 128  ;;  %v3261_v17 = vld [vmem:[%s3927_s10 + $0x1f0] sm:$0xff] }
  0xf3   : > { %v4029_v18 = vpop.trf.xlu2 }
  0xf4   : > { %6694 = vst [vmem:[#allocation22_spill] sm:$0xff] %v4029_v18  ;;  %v4031_v19 = vpop.trf.xlu1  ;;  %v1046_v4 = vadd.f32 %v1045_v57, %v4029_v18 }
  0xf5   : > { %6695 = vst [vmem:[#allocation23_spill] sm:$0xff] %v4031_v19  ;;  %v4033_v20 = vpop.trf.xlu0 }
  0xf8   : > { %1687 = vxpose.xlu1.b32.cont [9/16] %v3289_v21, 128  ;;  %v4155_v21 = vld [vmem:[%s6500_s3 + $0x38] sm:$0xff] }
  0xf9   : > { %1353 = vxpose.xlu0.b32.cont [9/16] %v3255_v22, 128  ;;  %v3329_v22 = vld [vmem:[%s3927_s10 + $0x2f0] sm:$0xff]  ;;  %421 = vmatpush.msra.mxu0 %v4155_v21 }
  0xfa   : > { %2021 = vxpose.xlu2.b32.cont [9/16] %v3323_v23, 128  ;;  %755 = vmatpush.msra.mxu3 %v4155_v21  ;;  %v4164_v23 = vld [vmem:[%s6500_s3 + $0x30] sm:$0xff] }
  0xfb   : > { %v4038_v24 = vpop.trf.xlu2  ;;  %422 = vmatpush.msra.mxu0 %v4164_v23 }
  0xfc   : > { %6696 = vst [vmem:[#allocation24_spill] sm:$0xff] %v4038_v24  ;;  %v4040_v25 = vpop.trf.xlu1  ;;  %v1047_v15 = vadd.f32 %v1046_v4, %v4038_v24  ;;  %756 = vmatpush.msra.mxu3 %v4164_v23 }
  0xfd   : > { %6697 = vst [vmem:[#allocation25_spill] sm:$0xff] %v4040_v25  ;;  %v4042_v26 = vpop.trf.xlu0 }
 0x100   : > { %1688 = vxpose.xlu1.b32.cont [10/16] %v3290_v27, 128  ;;  %v4169_v27 = vld [vmem:[%s6500_s3 + $0x28] sm:$0xff] }
 0x101   : > { %1354 = vxpose.xlu0.b32.cont [10/16] %v3256_v28, 128  ;;  %423 = vmatpush.msra.mxu0 %v4169_v27 }
 0x102   : > { %2022 = vxpose.xlu2.b32.cont [10/16] %v3324_v29, 128  ;;  %757 = vmatpush.msra.mxu3 %v4169_v27 }
 0x103   : > { %v4047_v30 = vpop.trf.xlu2 }
 0x104   : > { %6698 = vst [vmem:[#allocation26_spill] sm:$0xff] %v4047_v30  ;;  %v4049_v31 = vpop.trf.xlu1  ;;  %v1048_v28 = vadd.f32 %v1047_v15, %v4047_v30  ;;  %v3383_v15 = vld [vmem:[%s3927_s10 + $0x380] sm:$0xff] }
 0x105   : > { %6699 = vst [vmem:[#allocation27_spill] sm:$0xff] %v4049_v31  ;;  %v4051_v32 = vpop.trf.xlu0 }
 0x108   : > { %1689 = vxpose.xlu1.b32.cont [11/16] %v3291_v33, 128 }
 0x109   : > { %1355 = vxpose.xlu0.b32.cont [11/16] %v3257_v34, 128 }
 0x10a   : > { %2023 = vxpose.xlu2.b32.cont [11/16] %v3325_v35, 128  ;;  %v4185_v35 = vld [vmem:[%s6500_s3 + $0x20] sm:$0xff] }
 0x10b   : > { %v4056_v36 = vpop.trf.xlu2  ;;  %424 = vmatpush.msra.mxu0 %v4185_v35  ;;  %758 = vmatpush.msra.mxu3 %v4185_v35 }
 0x10c   : > { %6700 = vst [vmem:[#allocation28_spill] sm:$0xff] %v4056_v36  ;;  %v4058_v37 = vpop.trf.xlu1 }
 0x10d   : > { %6701 = vst [vmem:[#allocation29_spill] sm:$0xff] %v4058_v37  ;;  %v4060_v38 = vpop.trf.xlu0  ;;  %425 = vmatpush.msra.mxu0 %v4194_v45  ;;  %759 = vmatpush.msra.mxu3 %v4194_v45 }
 0x110   : > { %1690 = vxpose.xlu1.b32.cont [12/16] %v3292_v39, 128  ;;  %v1049_v39 = vadd.f32 %v1048_v28, %v4056_v36  ;;  %v3779_v36 = vmov 128.0  }
 0x111   : > { %1356 = vxpose.xlu0.b32.cont [12/16] %v3258_v40, 128  ;;  %v3296_v40 = vld [vmem:[%s3927_s10 + $0x278] sm:$0xff]  ;;  %3511 = vrcp.f32 %v3779_v36 }
 0x112   : > { %2024 = vxpose.xlu2.b32.cont [12/16] %v3326_v41, 128  ;;  %v3262_v41 = vld [vmem:[%s3927_s10 + $0x1f8] sm:$0xff] }
 0x113   : > { %v4065_v42 = vpop.trf.xlu2 }
 0x114   : > { %6702 = vst [vmem:[#allocation30_spill] sm:$0xff] %v4065_v42  ;;  %v4067_v43 = vpop.trf.xlu1  ;;  %v1050_v52 = vadd.f32 %v1049_v39, %v4065_v42 }
 0x115   : > { %6703 = vst [vmem:[#allocation31_spill] sm:$0xff] %v4067_v43  ;;  %v4069_v44 = vpop.trf.xlu0 }
 0x118   : > { %1691 = vxpose.xlu1.b32.cont [13/16] %v3293_v46, 128  ;;  %v3330_v46 = vld [vmem:[%s3927_s10 + $0x2f8] sm:$0xff] }
 0x119   : > { %1357 = vxpose.xlu0.b32.cont [13/16] %v3259_v47, 128  ;;  %v4203_v47 = vld [vmem:[%s6500_s3 + $0x10] sm:$0xff] }
 0x11a   : > { %2025 = vxpose.xlu2.b32.cont [13/16] %v3327_v49, 128  ;;  %v4208_v49 = vld [vmem:[%s6500_s3 + $0x8] sm:$0xff]  ;;  %426 = vmatpush.msra.mxu0 %v4203_v47 }
 0x11b   : > { %v4096_v53 = vpop.trf.xlu2  ;;  %760 = vmatpush.msra.mxu3 %v4203_v47 }
 0x11c   : > { %6704 = vst [vmem:[#allocation32_spill] sm:$0xff] %v4096_v53  ;;  %v4100_v54 = vpop.trf.xlu1  ;;  %427 = vmatpush.msra.mxu0 %v4208_v49  ;;  %v1051_v4 = vadd.f32 %v1050_v52, %v4096_v53 }
 0x11d   : > { %6705 = vst [vmem:[#allocation33_spill] sm:$0xff] %v4100_v54  ;;  %v4102_v55 = vpop.trf.xlu0  ;;  %761 = vmatpush.msra.mxu3 %v4208_v49 }
 0x120   : > { %1692 = vxpose.xlu1.b32.cont [14/16] %v3294_v58, 128 }
 0x121   : > { %1358 = vxpose.xlu0.b32.cont [14/16] %v3260_v59, 128 }
 0x122   : > { %2026 = vxpose.xlu2.b32.cont [14/16] %v3328_v62, 128  ;;  %v4224_v62 = vld [vmem:[%s6500_s3] sm:$0xff] }
 0x123   : > { %v4135_v5 = vpop.trf.xlu2  ;;  %428 = vmatpush.msra.mxu0 %v4224_v62  ;;  %762 = vmatpush.msra.mxu3 %v4224_v62 }
 0x124   : > { %6706 = vst [vmem:[#allocation34_spill] sm:$0xff] %v4135_v5  ;;  %v4139_v9 = vpop.trf.xlu1  ;;  %v1052_v28 = vadd.f32 %v1051_v4, %v4135_v5  ;;  %v3350_v5 = vld [vmem:[%s3927_s10 + $0x308] sm:$0xff] }
 0x125   : > { %6707 = vst [vmem:[#allocation35_spill] sm:$0xff] %v4139_v9  ;;  %v4141_v10 = vpop.trf.xlu0  ;;  %1081 = vmatpush.msrb.mxu0 %v4078_v48  ;;  %1415 = vmatpush.msrb.mxu3 %v4078_v48 }
 0x127   : > { %1082 = vmatpush.msrb.mxu0 %v4086_v50  ;;  %1416 = vmatpush.msrb.mxu3 %v4086_v50 }
 0x128   : > { %1693 = vxpose.xlu1.b32.cont [15/16] %v3295_v16, 128  ;;  %v3349_v16 = vld [vmem:[%s3927_s10 + $0x300] sm:$0xff] }
 0x129   : > { %1359 = vxpose.xlu0.b32.cont [15/16] %v3261_v17, 128  ;;  %v709_v17 = vadd.f32 %v4013_v7, %v4004_v1  ;;  %1083 = vmatpush.msrb.mxu0 %v4091_v51  ;;  %v4506_v7 = vld [vmem:[#allocation7 + $0x18] sm:$0xff]  ;;  %v4517_v1 = vld [vmem:[#allocation7 + $0x8] sm:$0xff] }
 0x12a   : > { %2027 = vxpose.xlu2.b32.cont [15/16] %v3329_v22, 128  ;;  %v368_v22 = vadd.f32 %v4015_v8, %v4006_v2  ;;  %1417 = vmatpush.msrb.mxu3 %v4091_v51 }
 0x12b   : > { %v4174_v29 = vpop.trf.xlu2  ;;  %v710_v39 = vadd.f32 %v709_v17, %v4022_v13  ;;  %1084 = vmatpush.msrb.mxu0 %v4107_v56  ;;  %v4504_v13 = vld [vmem:[#allocation7 + $0x10] sm:$0xff] }
 0x12c   : > { %6708 = vst [vmem:[#allocation36_spill] sm:$0xff] %v4174_v29  ;;  %v4178_v33 = vpop.trf.xlu1  ;;  %v1053_v17 = vadd.f32 %v1052_v28, %v4174_v29  ;;  %1418 = vmatpush.msrb.mxu3 %v4107_v56 }
 0x12d   : > { %6709 = vst [vmem:[#allocation37_spill] sm:$0xff] %v4178_v33  ;;  %v4180_v34 = vpop.trf.xlu0  ;;  %v711_v4 = vadd.f32 %v710_v39, %v4031_v19  ;;  %1085 = vmatpush.msrb.mxu0 %v4116_v61 }
 0x12e   : > { %1419 = vmatpush.msrb.mxu3 %v4116_v61 }
 0x12f   : > { %1086 = vmatpush.msrb.mxu0 %v4125_v63 }
 0x130   : > { %1694 = vxpose.xlu1.b32.end [16/16] %v3296_v40, 128  ;;  %v369_v40 = vadd.f32 %v368_v22, %v4024_v14  ;;  %v712_v22 = vadd.f32 %v711_v4, %v4040_v25  ;;  %1420 = vmatpush.msrb.mxu3 %v4125_v63  ;;  %v4496_v25 = vld [vmem:[#allocation7 + $0x28] sm:$0xff] }
 0x131   : > { %1360 = vxpose.xlu0.b32.end [16/16] %v3262_v41, 128  ;;  %1087 = vmatpush.msrb.mxu0 %v4130_v3 }
 0x132   : > { %2028 = vxpose.xlu2.b32.end [16/16] %v3330_v46, 128  ;;  %v713_v39 = vadd.f32 %v712_v22, %v4049_v31  ;;  %1421 = vmatpush.msrb.mxu3 %v4130_v3  ;;  %v3385_v22 = vld [vmem:[%s3927_s10 + $0x390] sm:$0xff]  ;;  %v4494_v31 = vld [vmem:[#allocation7 + $0x20] sm:$0xff] }
 0x133   : > { %v4213_v57 = vpop.trf.xlu2  ;;  %1088 = vmatpush.msrb.mxu0 %v4146_v11 }
 0x134   : > { %6710 = vst [vmem:[#allocation38_spill] sm:$0xff] %v4213_v57  ;;  %v4217_v58 = vpop.trf.xlu1  ;;  %v714_v4 = vadd.f32 %v713_v39, %v4058_v37  ;;  %1422 = vmatpush.msrb.mxu3 %v4146_v11 }
 0x135   : > { %6711 = vst [vmem:[#allocation39_spill] sm:$0xff] %v4217_v58  ;;  %v4219_v59 = vpop.trf.xlu0  ;;  %1089 = vmatpush.msrb.mxu0 %v4155_v21 }
 0x136   : > { %6712 = vst [vmem:[#allocation40_spill] sm:$0xff] %v4219_v59  ;;  %1423 = vmatpush.msrb.mxu3 %v4155_v21 }
 0x137   : > { %1090 = vmatpush.msrb.mxu0 %v4164_v23 }
 0x138   : > { %2681 = vxpose.xlu1.b32.start [1/16] %v3383_v15, 128  ;;  %v370_v15 = vadd.f32 %v369_v40, %v4033_v20  ;;  %v1054_v40 = vadd.f32 %v1053_v17, %v4213_v57  ;;  %v3351_v57 = vld [vmem:[%s3927_s10 + $0x310] sm:$0xff]  ;;  %1424 = vmatpush.msrb.mxu3 %v4164_v23 }
 0x139   : > { %2347 = vxpose.xlu0.b32.start [1/16] %v3349_v16, 128  ;;  %v3384_v16 = vld [vmem:[%s3927_s10 + $0x388] sm:$0xff]  ;;  %1091 = vmatpush.msrb.mxu0 %v4169_v27 }
 0x13a   : > { %v371_v53 = vadd.f32 %v370_v15, %v4042_v26  ;;  %1425 = vmatpush.msrb.mxu3 %v4169_v27 }
 0x13b   : > { %v4242_v41 = vpop.trf.xlu2  ;;  %1092 = vmatpush.msrb.mxu0 %v4185_v35 }
 0x13c   : > { %6713 = vst [vmem:[#allocation41_spill] sm:$0xff] %v4242_v41  ;;  %v4246_v46 = vpop.trf.xlu1  ;;  %v372_v28 = vadd.f32 %v371_v53, %v4051_v32  ;;  %v715_v53 = vadd.f32 %v714_v4, %v4067_v43  ;;  %v1055_v39 = vadd.f32 %v1054_v40, %v4242_v41  ;;  %v3352_v41 = vld [vmem:[%s3927_s10 + $0x318] sm:$0xff]  ;;  %1426 = vmatpush.msrb.mxu3 %v4185_v35 }
 0x13d   : > { %6714 = vst [vmem:[#allocation42_spill] sm:$0xff] %v4246_v46  ;;  %v4248_v52 = vpop.trf.xlu0  ;;  %1093 = vmatpush.msrb.mxu0 %v4194_v45 }
 0x13e   : > { %6715 = vst [vmem:[#allocation43_spill] sm:$0xff] %v4248_v52  ;;  %v373_v15 = vadd.f32 %v372_v28, %v4060_v38  ;;  %v716_v28 = vadd.f32 %v715_v53, %v4100_v54  ;;  %1427 = vmatpush.msrb.mxu3 %v4194_v45 }
 0x13f   : > { %1094 = vmatpush.msrb.mxu0 %v4203_v47 }
 0x140   : > { %2682 = vxpose.xlu1.b32.cont [2/16] %v3384_v16, 128  ;;  %v374_v17 = vadd.f32 %v373_v15, %v4069_v44  ;;  %v717_v4 = vadd.f32 %v716_v28, %v4139_v9  ;;  %1428 = vmatpush.msrb.mxu3 %v4203_v47 }
 0x141   : > { %2348 = vxpose.xlu0.b32.cont [2/16] %v3350_v5, 128  ;;  %1095 = vmatpush.msrb.mxu0 %v4208_v49 }
 0x142   : > { %v375_v42 = vadd.f32 %v374_v17, %v4102_v55  ;;  %v718_v36 = vadd.f32 %v717_v4, %v4178_v33  ;;  %1429 = vmatpush.msrb.mxu3 %v4208_v49  ;;  %v3354_v33 = vld [vmem:[%s3927_s10 + $0x328] sm:$0xff] }
 0x143   : > { %v4268_v29 = vpop.trf.xlu2  ;;  %1096 = vmatpush.msrb.mxu0 %v4224_v62 }
 0x144   : > { %6716 = vst [vmem:[#allocation44_spill] sm:$0xff] %v4268_v29  ;;  %v4272_v5 = vpop.trf.xlu1  ;;  %v376_v40 = vadd.f32 %v375_v42, %v4141_v10  ;;  %v1056_v15 = vadd.f32 %v1055_v39, %v4268_v29  ;;  %v3512_v42 = vpop.eup %3511  ;;  %v719_v39 = vadd.f32 %v718_v36, %v4217_v58  ;;  %v3386_v29 = vld [vmem:[%s3927_s10 + $0x398] sm:$0xff]  ;;  %1430 = vmatpush.msrb.mxu3 %v4224_v62  ;;  %v3388_v58 = vld [vmem:[%s3927_s10 + $0x3a8] sm:$0xff] }
 0x145   : > { %6717 = vst [vmem:[#allocation45_spill] sm:$0xff] %v4272_v5  ;;  %v4274_v16 = vpop.trf.xlu0  ;;  %v390_v36 = vmul.f32 128.0, %v3512_v42  ;;  %vm394_vm0 = vweird.f32 %v3512_v42 }
 0x146   : > { %6718 = vst [vmem:[#allocation46_spill] sm:$0xff] %v4274_v16  ;;  %v377_v53 = vadd.f32 %v376_v40, %v4180_v34  ;;  %v720_v40 = vadd.f32 %v719_v39, %v4246_v46 }
 0x148   : > { %2683 = vxpose.xlu1.b32.cont [3/16] %v3385_v22, 128  ;;  %v378_v28 = vadd.f32 %v377_v53, %v4219_v59  ;;  %v721_v53 = vadd.f32 %v720_v40, %v4272_v5 }
 0x149   : > { %2349 = vxpose.xlu0.b32.cont [3/16] %v3351_v57, 128 }
 0x14a   : > { %v379_v30 = vadd.f32 %v378_v28, %v4248_v52 }
 0x14b   : > { %v4294_v17 = vpop.trf.xlu2 }
 0x14c   : > { %6719 = vst [vmem:[#allocation47_spill] sm:$0xff] %v4294_v17  ;;  %v4298_v57 = vpop.trf.xlu1  ;;  %v1057_v4 = vadd.f32 %v1056_v15, %v4294_v17  ;;  %v380_v15 = vadd.f32 %v379_v30, %v4274_v16  ;;  %v391_v30 = vsub.f32 1.0, %v390_v36 }
 0x14d   : > { %6720 = vst [vmem:[#allocation48_spill] sm:$0xff] %v4298_v57  ;;  %v4300_v22 = vpop.trf.xlu0  ;;  %v722_v39 = vadd.f32 %v721_v53, %v4298_v57 }
 0x14e   : > { %6721 = vst [vmem:[#allocation49_spill] sm:$0xff] %v4300_v22  ;;  %v1058_v17 = vrot.slane %v1057_v4, 4  ;;  %v381_v28 = vadd.f32 %v380_v15, %v4300_v22  ;;  %v392_v60 = vmul.f32 %v3512_v42, %v391_v30 }
 0x150   : > { %2684 = vxpose.xlu1.b32.cont [4/16] %v3386_v29, 128  ;;  %v1059_v53 = vadd.f32 %v1058_v17, %v1057_v4  ;;  %v393_v4 = vadd.f32 %v3512_v42, %v392_v60 }
 0x151   : > { %2350 = vxpose.xlu0.b32.cont [4/16] %v3352_v41, 128 }
 0x152   : > { %v1060_v5 = vrot.slane %v1059_v53, 2 }
 0x153   : > { %v4319_v24 = vpop.trf.xlu2 }
 0x154   : > { %6722 = vst [vmem:[#allocation50_spill] sm:$0xff] %v4319_v24  ;;  %v4323_v29 = vpop.trf.xlu1  ;;  %v1061_v9 = vadd.f32 %v1060_v5, %v1059_v53  ;;  %v3356_v53 = vld [vmem:[%s3927_s10 + $0x338] sm:$0xff] }
 0x155   : > { %6723 = vst [vmem:[#allocation51_spill] sm:$0xff] %v4323_v29  ;;  %v4325_v41 = vpop.trf.xlu0  ;;  %v723_v40 = vadd.f32 %v722_v39, %v4323_v29 }
 0x156   : > { %6724 = vst [vmem:[#allocation52_spill] sm:$0xff] %v4325_v41  ;;  %v382_v18 = vadd.f32 %v381_v28, %v4325_v41  ;;  %v1062_v30 = vrot.slane %v1061_v9, 1 }
 0x157   : > { %v724_v15 = vrot.slane %v723_v40, 4 }
 0x158   : > { %v383_v0 = vrot.slane %v382_v18, 4  ;;  %2685 = vxpose.xlu1.b32.cont [5/16] %v3387_v12, 128 }
 0x159   : > { %2351 = vxpose.xlu0.b32.cont [5/16] %v3353_v6, 128  ;;  %v725_v57 = vadd.f32 %v724_v15, %v723_v40 }
 0x15a   : > { %v384_v36 = vadd.f32 %v383_v0, %v382_v18  ;;  %v4341_v18 = vsel %vm394_vm0, %v3512_v42, %v393_v4  ;;  %v1063_v42 = vadd.f32 %v1062_v30, %v1061_v9  ;;  %v3358_v4 = vld [vmem:[%s3927_s10 + $0x348] sm:$0xff]  ;;  %v3360_v30 = vld [vmem:[%s3927_s10 + $0x358] sm:$0xff] }
 0x15b   : > { %v726_v39 = vrot.slane %v725_v57, 2  ;;  %v4333_v28 = vpop.trf.xlu2 }
 0x15c   : > { %v385_v29 = vrot.slane %v384_v36, 2  ;;  %6725 = vst [vmem:[#allocation53_spill] sm:$0xff] %v4333_v28  ;;  %v4335_v46 = vpop.trf.xlu1 }
 0x15d   : > { %6726 = vst [vmem:[#allocation54_spill] sm:$0xff] %v4335_v46  ;;  %v4337_v17 = vpop.trf.xlu0  ;;  %v727_v12 = vadd.f32 %v726_v39, %v725_v57  ;;  %v3357_v39 = vld [vmem:[%s3927_s10 + $0x340] sm:$0xff] }
 0x15e   : > { %6727 = vst [vmem:[#allocation55_spill] sm:$0xff] %v4337_v17  ;;  %v386_v54 = vadd.f32 %v385_v29, %v384_v36 }
 0x15f   : > { %v728_v0 = vrot.slane %v727_v12, 1 }
 0x160   : > { %v387_v6 = vrot.slane %v386_v54, 1  ;;  %2686 = vxpose.xlu1.b32.cont [6/16] %v3388_v58, 128  ;;  %v3389_v58 = vld [vmem:[%s3927_s10 + $0x3b0] sm:$0xff] }
 0x161   : > { %2352 = vxpose.xlu0.b32.cont [6/16] %v3354_v33, 128  ;;  %v729_v15 = vadd.f32 %v728_v0, %v727_v12  ;;  %v3355_v33 = vld [vmem:[%s3927_s10 + $0x330] sm:$0xff]  ;;  %v3394_v0 = vld [vmem:[%s3927_s10 + $0x3d8] sm:$0xff] }
 0x162   : > { %v388_v40 = vadd.f32 %v387_v6, %v386_v54  ;;  %v1064_v54 = vmul.f32 %v1063_v42, %v4341_v18  ;;  %v3359_v12 = vld [vmem:[%s3927_s10 + $0x350] sm:$0xff] }
 0x163   : > { %v730_v60 = vmul.f32 %v729_v15, %v4341_v18  ;;  %v4345_v37 = vpop.trf.xlu2 }
 0x164   : > { %v396_v43 = vmul.f32 %v4341_v18, %v388_v40  ;;  %6728 = vst [vmem:[#allocation56_spill] sm:$0xff] %v4345_v37  ;;  %v4347_v5 = vpop.trf.xlu1 }
 0x165   : > { %6729 = vst [vmem:[#allocation57_spill] sm:$0xff] %v4347_v5  ;;  %v4349_v57 = vpop.trf.xlu0  ;;  %763 = vmatmul.f32.vlgmr.msra.gmra.mxu3 %v730_v60  ;;  %v3361_v60 = vld [vmem:[%s3927_s10 + $0x360] sm:$0xff] }
 0x166   : > { %6730 = vst [vmem:[#allocation58_spill] sm:$0xff] %v4349_v57  ;;  %429 = vmatmul.f32.vlgmr.msra.gmra.mxu0 %v396_v43  ;;  %2083 = vmatpush.msra.mxu3 %v4078_v48 }
 0x167   : > { %1749 = vmatpush.msra.mxu0 %v4078_v48  ;;  %v3390_v48 = vld [vmem:[%s3927_s10 + $0x3b8] sm:$0xff] }
 0x168   : > { %2687 = vxpose.xlu1.b32.cont [7/16] %v3389_v58, 128  ;;  %2084 = vmatpush.msra.mxu3 %v4086_v50  ;;  %v2045_v58 = vadd.f32 %v4333_v28, %v4319_v24  ;;  %v3398_v24 = vld [vmem:[%s3927_s10 + $0x3f8] sm:$0xff] }
 0x169   : > { %2353 = vxpose.xlu0.b32.cont [7/16] %v3355_v33, 128  ;;  %1750 = vmatpush.msra.mxu0 %v4086_v50 }
 0x16a   : > { %2085 = vmatpush.msra.mxu3 %v4091_v51  ;;  %v2046_v42 = vadd.f32 %v2045_v58, %v4345_v37  ;;  %v4461_v58 = vld [vmem:[#allocation7 + $0x60] sm:$0xff] }
 0x16b   : > { %v4358_v29 = vpop.trf.xlu2  ;;  %1751 = vmatpush.msra.mxu0 %v4091_v51 }
 0x16c   : > { %6731 = vst [vmem:[#allocation59_spill] sm:$0xff] %v4358_v29  ;;  %v4362_v43 = vpop.trf.xlu1  ;;  %2086 = vmatpush.msra.mxu3 %v4107_v56 }
 0x16d   : > { %6732 = vst [vmem:[#allocation60_spill] sm:$0xff] %v4362_v43  ;;  %v4364_v9 = vpop.trf.xlu0  ;;  %1752 = vmatpush.msra.mxu0 %v4107_v56  ;;  %v3391_v56 = vld [vmem:[%s3927_s10 + $0x3c0] sm:$0xff] }
 0x16e   : > { %6733 = vst [vmem:[#allocation61_spill] sm:$0xff] %v4364_v9  ;;  %1097 = vmatmul.f32.vlgmr.msrb.gmra.mxu0 %v1064_v54  ;;  %2087 = vmatpush.msra.mxu3 %v4116_v61 }
 0x16f   : > { %1753 = vmatpush.msra.mxu0 %v4116_v61 }
 0x170   : > { %2688 = vxpose.xlu1.b32.cont [8/16] %v3390_v48, 128  ;;  %2088 = vmatpush.msra.mxu3 %v4125_v63 }
 0x171   : > { %2354 = vxpose.xlu0.b32.cont [8/16] %v3356_v53, 128  ;;  %1754 = vmatpush.msra.mxu0 %v4125_v63  ;;  %v3396_v53 = vld [vmem:[%s3927_s10 + $0x3e8] sm:$0xff] }
 0x172   : > { %2089 = vmatpush.msra.mxu3 %v4130_v3 }
 0x173   : > { %v4373_v50 = vpop.trf.xlu2  ;;  %1755 = vmatpush.msra.mxu0 %v4130_v3 }
 0x174   : > { %6734 = vst [vmem:[#allocation62_spill] sm:$0xff] %v4373_v50  ;;  %v4377_v51 = vpop.trf.xlu1  ;;  %2090 = vmatpush.msra.mxu3 %v4146_v11 }
 0x175   : > { %6735 = vst [vmem:[#allocation63_spill] sm:$0xff] %v4377_v51  ;;  %v4379_v36 = vpop.trf.xlu0  ;;  %1756 = vmatpush.msra.mxu0 %v4146_v11  ;;  %v3392_v11 = vld [vmem:[%s3927_s10 + $0x3c8] sm:$0xff] }
 0x176   : > { %6736 = vst [vmem:[#allocation64_spill] sm:$0xff] %v4379_v36  ;;  %2091 = vmatpush.msra.mxu3 %v4155_v21 }
 0x177   : > { %1757 = vmatpush.msra.mxu0 %v4155_v21 }
 0x178   : > { %2689 = vxpose.xlu1.b32.cont [9/16] %v3391_v56, 128  ;;  %2092 = vmatpush.msra.mxu3 %v4164_v23  ;;  %v3362_v56 = vld [vmem:[%s3927_s10 + $0x368] sm:$0xff] }
 0x179   : > { %2355 = vxpose.xlu0.b32.cont [9/16] %v3357_v39, 128  ;;  %1758 = vmatpush.msra.mxu0 %v4164_v23  ;;  %v2047_v39 = vadd.f32 %v2046_v42, %v4358_v29  ;;  %v4463_v42 = vld [vmem:[#allocation7 + $0x68] sm:$0xff] }
 0x17a   : > { %2093 = vmatpush.msra.mxu3 %v4169_v27 }
 0x17b   : > { %v4389_v61 = vpop.trf.xlu2  ;;  %1759 = vmatpush.msra.mxu0 %v4169_v27 }
 0x17c   : > { %6737 = vst [vmem:[#allocation65_spill] sm:$0xff] %v4389_v61  ;;  %v4393_v63 = vpop.trf.xlu1  ;;  %2094 = vmatpush.msra.mxu3 %v4185_v35 }
 0x17d   : > { %6738 = vst [vmem:[#allocation66_spill] sm:$0xff] %v4393_v63  ;;  %v4395_v3 = vpop.trf.xlu0  ;;  %1760 = vmatpush.msra.mxu0 %v4185_v35  ;;  %v3393_v35 = vld [vmem:[%s3927_s10 + $0x3d0] sm:$0xff] }
 0x17e   : > { %6739 = vst [vmem:[#allocation67_spill] sm:$0xff] %v4395_v3  ;;  %2095 = vmatpush.msra.mxu3 %v4194_v45 }
 0x17f   : > { %1761 = vmatpush.msra.mxu0 %v4194_v45 }
 0x180   : > { %2690 = vxpose.xlu1.b32.cont [10/16] %v3392_v11, 128  ;;  %2096 = vmatpush.msra.mxu3 %v4203_v47 }
 0x181   : > { %2356 = vxpose.xlu0.b32.cont [10/16] %v3358_v4, 128  ;;  %1762 = vmatpush.msra.mxu0 %v4203_v47  ;;  %v2048_v4 = vadd.f32 %v2047_v39, %v4373_v50  ;;  %v4470_v39 = vld [vmem:[#allocation7 + $0x50] sm:$0xff]  ;;  %v4472_v50 = vld [vmem:[#allocation7 + $0x58] sm:$0xff] }
 0x182   : > { %2097 = vmatpush.msra.mxu3 %v4208_v49 }
 0x183   : > { %v4405_v21 = vpop.trf.xlu2  ;;  %1763 = vmatpush.msra.mxu0 %v4208_v49 }
 0x184   : > { %6740 = vst [vmem:[#allocation68_spill] sm:$0xff] %v4405_v21  ;;  %v4409_v23 = vpop.trf.xlu1  ;;  %2098 = vmatpush.msra.mxu3 %v4224_v62 }
 0x185   : > { %6741 = vst [vmem:[#allocation69_spill] sm:$0xff] %v4409_v23  ;;  %v4411_v27 = vpop.trf.xlu0  ;;  %1764 = vmatpush.msra.mxu0 %v4224_v62  ;;  %v3395_v62 = vld [vmem:[%s3927_s10 + $0x3e0] sm:$0xff] }
 0x186   : > { %6742 = vst [vmem:[#allocation70_spill] sm:$0xff] %v4411_v27 }
 0x188   : > { %2691 = vxpose.xlu1.b32.cont [11/16] %v3393_v35, 128 }
 0x189   : > { %2357 = vxpose.xlu0.b32.cont [11/16] %v3359_v12, 128 }
 0x18b   : > { %v4418_v45 = vpop.trf.xlu2 }
 0x18c   : > { %6743 = vst [vmem:[#allocation71_spill] sm:$0xff] %v4418_v45  ;;  %v4420_v47 = vpop.trf.xlu1 }
 0x18d   : > { %6744 = vst [vmem:[#allocation72_spill] sm:$0xff] %v4420_v47  ;;  %v4422_v6 = vpop.trf.xlu0 }
 0x18e   : > { %6745 = vst [vmem:[#allocation73_spill] sm:$0xff] %v4422_v6 }
 0x190   : > { %2692 = vxpose.xlu1.b32.cont [12/16] %v3394_v0, 128  ;;  %v3397_v0 = vld [vmem:[%s3927_s10 + $0x3f0] sm:$0xff] }
 0x191   : > { %2358 = vxpose.xlu0.b32.cont [12/16] %v3360_v30, 128  ;;  %v3363_v30 = vld [vmem:[%s3927_s10 + $0x370] sm:$0xff] }
 0x193   : > { %v4426_v49 = vpop.trf.xlu2 }
 0x194   : > { %6746 = vst [vmem:[#allocation74_spill] sm:$0xff] %v4426_v49  ;;  %v4428_v40 = vpop.trf.xlu1 }
 0x195   : > { %6747 = vst [vmem:[#allocation75_spill] sm:$0xff] %v4428_v40  ;;  %v4430_v15 = vpop.trf.xlu0 }
 0x196   : > { %6748 = vst [vmem:[#allocation76_spill] sm:$0xff] %v4430_v15 }
 0x198   : > { %2693 = vxpose.xlu1.b32.cont [13/16] %v3395_v62, 128  ;;  %v4455_v62 = vld [vmem:[#allocation7 + $0x70] sm:$0xff] }
 0x199   : > { %2359 = vxpose.xlu0.b32.cont [13/16] %v3361_v60, 128  ;;  %v4457_v60 = vld [vmem:[#allocation7 + $0x78] sm:$0xff]  ;;  %462 = vmatpush.msra.mxu1 %v4455_v62 }
 0x19a   : > { %482 = vmatpush.msra.mxu2 %v4457_v60 }
 0x19b   : > { %v4436_v33 = vpop.trf.xlu2  ;;  %463 = vmatpush.msra.mxu1 %v4461_v58 }
 0x19c   : > { %6749 = vst [vmem:[#allocation77_spill] sm:$0xff] %v4436_v33  ;;  %v4439_v54 = vpop.trf.xlu1  ;;  %483 = vmatpush.msra.mxu2 %v4463_v42 }
 0x19d   : > { %6750 = vst [vmem:[#allocation78_spill] sm:$0xff] %v4439_v54  ;;  %v4441_v48 = vpop.trf.xlu0  ;;  %464 = vmatpush.msra.mxu1 %v4470_v39 }
 0x19e   : > { %6751 = vst [vmem:[#allocation79_spill] sm:$0xff] %v4441_v48  ;;  %484 = vmatpush.msra.mxu2 %v4472_v50 }
 0x1a0   : > { %2694 = vxpose.xlu1.b32.cont [14/16] %v3396_v53, 128  ;;  %v2049_v53 = vadd.f32 %v2048_v4, %v4389_v61  ;;  %v3364_v4 = vld [vmem:[%s3927_s10 + $0x378] sm:$0xff]  ;;  %v4489_v61 = vld [vmem:[#allocation7 + $0x30] sm:$0xff]  ;;  %s5163_s10 = scalar_lea.vmem [#allocation8], %s3923_s14 }
 0x1a1   : > { %2360 = vxpose.xlu0.b32.cont [14/16] %v3362_v56, 128  ;;  %s3017_s26 = sshll.u32 %s5163_s10, 4  ;;  %s6441_s26 = int_to_ptr.vmem [resolvable:$true] %s3017_s26 }
 0x1a2   : > { %v2050_v29 = vadd.f32 %v2049_v53, %v4405_v21  ;;  %v4491_v53 = vld [vmem:[#allocation7 + $0x38] sm:$0xff] }
 0x1a3   : > { %v4446_v11 = vpop.trf.xlu2 }
 0x1a4   : > { %6752 = vst [vmem:[#allocation80_spill] sm:$0xff] %v4446_v11  ;;  %v4449_v35 = vpop.trf.xlu1  ;;  %v2051_v21 = vadd.f32 %v2050_v29, %v4418_v45  ;;  %v4515_v45 = vld [vmem:[#allocation7] sm:$0xff] }
 0x1a5   : > { %6753 = vst [vmem:[#allocation81_spill] sm:$0xff] %v4449_v35  ;;  %v4451_v12 = vpop.trf.xlu0 }
 0x1a6   : > { %6754 = vst [vmem:[#allocation82_spill] sm:$0xff] %v4451_v12 }
 0x1a8   : > { %2695 = vxpose.xlu1.b32.cont [15/16] %v3397_v0, 128  ;;  %v4483_v0 = vld [vmem:[#allocation7 + $0x40] sm:$0xff] }
 0x1a9   : > { %2361 = vxpose.xlu0.b32.cont [15/16] %v3363_v30, 128  ;;  %v4485_v30 = vld [vmem:[#allocation7 + $0x48] sm:$0xff]  ;;  %465 = vmatpush.msra.mxu1 %v4483_v0 }
 0x1aa   : > { %485 = vmatpush.msra.mxu2 %v4485_v30 }
 0x1ab   : > { %v4468_v56 = vpop.trf.xlu2  ;;  %466 = vmatpush.msra.mxu1 %v4489_v61 }
 0x1ac   : > { %6755 = vst [vmem:[#allocation83_spill] sm:$0xff] %v4468_v56  ;;  %v4475_v37 = vpop.trf.xlu1  ;;  %486 = vmatpush.msra.mxu2 %v4491_v53 }
 0x1ad   : > { %6756 = vst [vmem:[#allocation84_spill] sm:$0xff] %v4475_v37  ;;  %v4477_v28 = vpop.trf.xlu0  ;;  %467 = vmatpush.msra.mxu1 %v4494_v31 }
 0x1ae   : > { %6757 = vst [vmem:[#allocation85_spill] sm:$0xff] %v4477_v28  ;;  %487 = vmatpush.msra.mxu2 %v4496_v25 }
 0x1af   : > { %468 = vmatpush.msra.mxu1 %v4504_v13 }
 0x1b0   : > { %2696 = vxpose.xlu1.b32.end [16/16] %v3398_v24, 128  ;;  %v2052_v24 = vadd.f32 %v2051_v21, %v4426_v49  ;;  %488 = vmatpush.msra.mxu2 %v4506_v7  ;;  %v1711_v21 = vadd.f32 %v4347_v5, %v4335_v46  ;;  %v1377_v49 = vadd.f32 %v4349_v57, %v4337_v17  ;;  %v4964_v57 = vld [vmem:[#allocation7 + $0x58] sm:$0xff]  ;;  %v4969_v17 = vld [vmem:[#allocation5 + $0x28] sm:$0xff] }
 0x1b1   : > { %2362 = vxpose.xlu0.b32.end [16/16] %v3364_v4, 128  ;;  %469 = vmatpush.msra.mxu1 %v4515_v45  ;;  %6827 = vst [vmem:[#allocation153_spill] sm:$0xff] %v4964_v57 }
 0x1b2   : > { %489 = vmatpush.msra.mxu2 %v4517_v1  ;;  %v2053_v41 = vadd.f32 %v2052_v24, %v4436_v33  ;;  %v1712_v22 = vadd.f32 %v1711_v21, %v4362_v43  ;;  %v1378_v16 = vadd.f32 %v1377_v49, %v4364_v9  ;;  %v4962_v9 = vld [vmem:[#allocation7 + $0x50] sm:$0xff]  ;;  %6828 = vst [vmem:[#allocation154_spill] sm:$0xff] %v4969_v17 }
 0x1b3   : > { %v4500_v19 = vpop.trf.xlu2  ;;  %795 = vmatpush.msrb.mxu1 %v4455_v62  ;;  %6826 = vst [vmem:[#allocation152_spill] sm:$0xff] %v4962_v9 }
 0x1b4   : > { %6758 = vst [vmem:[#allocation86_spill] sm:$0xff] %v4500_v19  ;;  %v4509_v29 = vpop.trf.xlu1  ;;  %815 = vmatpush.msrb.mxu2 %v4457_v60  ;;  %v2054_v24 = vadd.f32 %v2053_v41, %v4446_v11  ;;  %v1713_v5 = vadd.f32 %v1712_v22, %v4377_v51  ;;  %v1379_v46 = vadd.f32 %v1378_v16, %v4379_v36 }
 0x1b5   : > { %6759 = vst [vmem:[#allocation87_spill] sm:$0xff] %v4509_v29  ;;  %v4511_v4 = vpop.trf.xlu0  ;;  %796 = vmatpush.msrb.mxu1 %v4461_v58 }
 0x1b6   : > { %6760 = vst [vmem:[#allocation88_spill] sm:$0xff] %v4511_v4  ;;  %816 = vmatpush.msrb.mxu2 %v4463_v42  ;;  %v1714_v49 = vadd.f32 %v1713_v5, %v4393_v63  ;;  %v1380_v41 = vadd.f32 %v1379_v46, %v4395_v3  ;;  %v2055_v21 = vadd.f32 %v2054_v24, %v4468_v56  ;;  %v4956_v3 = vld [vmem:[#allocation5 + $0x20] sm:$0xff] }
 0x1b7   : > { %797 = vmatpush.msrb.mxu1 %v4470_v39  ;;  %6825 = vst [vmem:[#allocation151_spill] sm:$0xff] %v4956_v3 }
 0x1b8   : > { %817 = vmatpush.msrb.mxu2 %v4472_v50  ;;  %v1715_v11 = vadd.f32 %v1714_v49, %v4409_v23  ;;  %v1381_v22 = vadd.f32 %v1380_v41, %v4411_v27  ;;  %v2056_v56 = vadd.f32 %v2055_v21, %v4500_v19 }
 0x1b9   : > { %798 = vmatpush.msrb.mxu1 %v4483_v0 }
 0x1ba   : > { %818 = vmatpush.msrb.mxu2 %v4485_v30  ;;  %v1716_v16 = vadd.f32 %v1715_v11, %v4420_v47  ;;  %v1382_v5 = vadd.f32 %v1381_v22, %v4422_v6 }
 0x1bb   : > { %v4532_v52 = vpop.trf.xlu2  ;;  %799 = vmatpush.msrb.mxu1 %v4489_v61 }
 0x1bc   : > { %6761 = vst [vmem:[#allocation89_spill] sm:$0xff] %v4532_v52  ;;  %v4535_v33 = vpop.trf.xlu1  ;;  %819 = vmatpush.msrb.mxu2 %v4491_v53  ;;  %v1717_v49 = vadd.f32 %v1716_v16, %v4428_v40  ;;  %v1383_v41 = vadd.f32 %v1382_v5, %v4430_v15  ;;  %v2057_v47 = vadd.f32 %v2056_v56, %v4532_v52  ;;  %v4940_v15 = vld [vmem:[%s6498_s1 + $0x78] sm:$0xff] }
 0x1bd   : > { %6762 = vst [vmem:[#allocation90_spill] sm:$0xff] %v4535_v33  ;;  %v4537_v59 = vpop.trf.xlu0  ;;  %800 = vmatpush.msrb.mxu1 %v4494_v31 }
 0x1be   : > { %6763 = vst [vmem:[#allocation91_spill] sm:$0xff] %v4537_v59  ;;  %820 = vmatpush.msrb.mxu2 %v4496_v25  ;;  %v1718_v11 = vadd.f32 %v1717_v49, %v4439_v54  ;;  %v1384_v22 = vadd.f32 %v1383_v41, %v4441_v48 }
 0x1bf   : > { %801 = vmatpush.msrb.mxu1 %v4504_v13  ;;  %6823 = vst [vmem:[#allocation149_spill] sm:$0xff] %v4940_v15 }
 0x1c0   : > { %821 = vmatpush.msrb.mxu2 %v4506_v7  ;;  %v1719_v21 = vadd.f32 %v1718_v11, %v4449_v35  ;;  %v1385_v19 = vadd.f32 %v1384_v22, %v4451_v12  ;;  %v4933_v12 = vld [vmem:[#allocation5 + $0x10] sm:$0xff] }
 0x1c1   : > { %802 = vmatpush.msrb.mxu1 %v4515_v45  ;;  %6822 = vst [vmem:[#allocation148_spill] sm:$0xff] %v4933_v12 }
 0x1c2   : > { %822 = vmatpush.msrb.mxu2 %v4517_v1  ;;  %v1720_v23 = vadd.f32 %v1719_v21, %v4475_v37  ;;  %v1386_v16 = vadd.f32 %v1385_v19, %v4477_v28  ;;  %v4931_v28 = vld [vmem:[#allocation5 + $0x8] sm:$0xff] }
 0x1c3   : > { %v4556_v63 = vpop.trf.xlu2  ;;  %6821 = vst [vmem:[#allocation147_spill] sm:$0xff] %v4931_v28 }
 0x1c4   : > { %6764 = vst [vmem:[#allocation92_spill] sm:$0xff] %v4556_v63  ;;  %v4558_v46 = vpop.trf.xlu1  ;;  %v2058_v51 = vadd.f32 %v2057_v47, %v4556_v63  ;;  %v1721_v49 = vadd.f32 %v1720_v23, %v4509_v29  ;;  %v1387_v41 = vadd.f32 %v1386_v16, %v4511_v4  ;;  %v4929_v4 = vld [vmem:[#allocation5] sm:$0xff] }
 0x1c5   : > { %6765 = vst [vmem:[#allocation93_spill] sm:$0xff] %v4558_v46  ;;  %v4560_v24 = vpop.trf.xlu0 }
 0x1c6   : > { %6766 = vst [vmem:[#allocation94_spill] sm:$0xff] %v4560_v24  ;;  %v1722_v56 = vadd.f32 %v1721_v49, %v4535_v33  ;;  %v1388_v11 = vadd.f32 %v1387_v41, %v4537_v59 }
 0x1c7   : > { %6820 = vst [vmem:[#allocation146_spill] sm:$0xff] %v4929_v4 }
 0x1c8   : > { %v1723_v19 = vadd.f32 %v1722_v56, %v4558_v46  ;;  %v1389_v21 = vadd.f32 %v1388_v11, %v4560_v24 }
 0x1cb   : > { %v4583_v54 = vpop.trf.xlu2 }
 0x1cc   : > { %v4576_v40 = vpop.trf.xlu1  ;;  %6769 = vst [vmem:[#allocation97_spill] sm:$0xff] %v4583_v54  ;;  %v2059_v22 = vadd.f32 %v2058_v51, %v4583_v54 }
 0x1cd   : > { %6767 = vst [vmem:[#allocation95_spill] sm:$0xff] %v4576_v40  ;;  %v4578_v5 = vpop.trf.xlu0  ;;  %v1724_v52 = vadd.f32 %v1723_v19, %v4576_v40 }
 0x1ce   : > { %6768 = vst [vmem:[#allocation96_spill] sm:$0xff] %v4578_v5  ;;  %v1390_v47 = vadd.f32 %v1389_v21, %v4578_v5  ;;  %v2060_v16 = vrot.slane %v2059_v22, 4 }
 0x1d0   : > { %v2061_v51 = vadd.f32 %v2060_v16, %v2059_v22 }
 0x1d2   : > { %v2062_v21 = vrot.slane %v2061_v51, 2 }
 0x1d4   : > { %v4592_v63 = vpop.trf.xlu1  ;;  %v2063_v24 = vadd.f32 %v2062_v21, %v2061_v51 }
 0x1d5   : > { %6770 = vst [vmem:[#allocation98_spill] sm:$0xff] %v4592_v63  ;;  %v4594_v23 = vpop.trf.xlu0  ;;  %v1725_v29 = vadd.f32 %v1724_v52, %v4592_v63 }
 0x1d6   : > { %6771 = vst [vmem:[#allocation99_spill] sm:$0xff] %v4594_v23  ;;  %v1391_v49 = vadd.f32 %v1390_v47, %v4594_v23  ;;  %v2064_v22 = vrot.slane %v2063_v24, 1 }
 0x1d7   : > { %v1726_v41 = vrot.slane %v1725_v29, 4 }
 0x1d8   : > { %v1392_v33 = vrot.slane %v1391_v49, 4 }
 0x1d9   : > { %v1727_v54 = vadd.f32 %v1726_v41, %v1725_v29 }
 0x1da   : > { %v1393_v56 = vadd.f32 %v1392_v33, %v1391_v49 }
 0x1db   : > { %v1728_v46 = vrot.slane %v1727_v54, 2 }
 0x1dc   : > { %v1394_v11 = vrot.slane %v1393_v56, 2  ;;  %v4598_v37 = vpop.trf.xlu1 }
 0x1dd   : > { %6772 = vst [vmem:[#allocation100_spill] sm:$0xff] %v4598_v37  ;;  %v4600_v19 = vpop.trf.xlu0  ;;  %v1729_v40 = vadd.f32 %v1728_v46, %v1727_v54 }
 0x1de   : > { %6773 = vst [vmem:[#allocation101_spill] sm:$0xff] %v4600_v19  ;;  %v1395_v35 = vadd.f32 %v1394_v11, %v1393_v56 }
 0x1df   : > { %v1730_v43 = vrot.slane %v1729_v40, 1 }
 0x1e0   : > { %v1396_v5 = vrot.slane %v1395_v35, 1 }
 0x1e1   : > { %v1731_v52 = vadd.f32 %v1730_v43, %v1729_v40  ;;  %v2065_v43 = vadd.f32 %v2064_v22, %v2063_v24  ;;  %v2408_v22 = vld [vmem:[%s6500_s3 + $0x38] sm:$0xff] }
 0x1e2   : > { %v1397_v63 = vadd.f32 %v1396_v5, %v1395_v35 }
 0x1e3   : > { %v430_v47 = vpop.f32.mrf.mxu0  ;;  %v1732_v33 = vmul.f32 %v1731_v52, %v4341_v18  ;;  %v2066_v46 = vmul.f32 %v2065_v43, %v4341_v18  ;;  %v2410_v52 = vld [vmem:[%s6500_s3 + $0x48] sm:$0xff]  ;;  %v2407_v43 = vld [vmem:[%s6500_s3 + $0x30] sm:$0xff] }
 0x1e4   : > { %v433_v23 = vmax.f32 %v430_v47, 0.0  ;;  %v1398_v29 = vmul.f32 %v1397_v63, %v4341_v18  ;;  %v4604_v16 = vpop.trf.xlu1 }
 0x1e5   : > { %6774 = vst [vmem:[#allocation102_spill] sm:$0xff] %v4604_v16  ;;  %v4606_v49 = vpop.trf.xlu0  ;;  %1765 = vmatmul.f32.vlgmr.msra.gmra.mxu0 %v1732_v33  ;;  %v2409_v33 = vld [vmem:[%s6500_s3 + $0x40] sm:$0xff] }
 0x1e6   : > { %6775 = vst [vmem:[#allocation103_spill] sm:$0xff] %v4606_v49  ;;  %3177 = vmatmul.msk.f32.vlgmr.msra.gmra.mxu1 %vm450_vm1, %v433_v23  ;;  %3178 = vmatmul.msk.f32.vlgmr.msra.gmra.mxu2 %vm450_vm1, %v433_v23 }
 0x1e7   : > { %1431 = vmatmul.f32.vlgmr.msrb.gmra.mxu3 %v1398_v29  ;;  %1129 = vmatpush.msra.mxu1 %v4455_v62 }
 0x1e8   : > { %1149 = vmatpush.msra.mxu2 %v4457_v60  ;;  %v764_v40 = vpop.f32.mrf.mxu3 }
 0x1e9   : > { %1130 = vmatpush.msra.mxu1 %v4461_v58  ;;  %v767_v63 = vmax.f32 %v764_v40, 0.0  ;;  %v2713_v40 = vadd.f32 %v4604_v16, %v4598_v37 }
 0x1ea   : > { %1150 = vmatpush.msra.mxu2 %v4463_v42 }
 0x1eb   : > { %1131 = vmatpush.msra.mxu1 %v4470_v39  ;;  %v1098_v24 = vpop.f32.mrf.mxu0 }
 0x1ec   : > { %1151 = vmatpush.msra.mxu2 %v4472_v50  ;;  %v4616_v54 = vpop.trf.xlu1  ;;  %v1101_v5 = vmax.f32 %v1098_v24, 0.0 }
 0x1ed   : > { %6776 = vst [vmem:[#allocation104_spill] sm:$0xff] %v4616_v54  ;;  %v4618_v35 = vpop.trf.xlu0  ;;  %1132 = vmatpush.msra.mxu1 %v4483_v0  ;;  %v2714_v24 = vadd.f32 %v2713_v40, %v4616_v54 }
 0x1ee   : > { %6777 = vst [vmem:[#allocation105_spill] sm:$0xff] %v4618_v35  ;;  %1152 = vmatpush.msra.mxu2 %v4485_v30  ;;  %3195 = vmatmul.msk.f32.vlgmr.msrb.gmra.mxu1 %vm450_vm1, %v767_v63 }
 0x1ef   : > { %3196 = vmatmul.msk.f32.vlgmr.msrb.gmra.mxu2 %vm450_vm1, %v767_v63  ;;  %1133 = vmatpush.msra.mxu1 %v4489_v61  ;;  %v2379_v63 = vadd.f32 %v4606_v49, %v4600_v19 }
 0x1f0   : > { %1153 = vmatpush.msra.mxu2 %v4491_v53  ;;  %2099 = vmatmul.f32.vlgmr.msra.gmra.mxu3 %v2066_v46  ;;  %v2406_v46 = vld [vmem:[%s6500_s3 + $0x28] sm:$0xff] }
 0x1f1   : > { %1134 = vmatpush.msra.mxu1 %v4494_v31 }
 0x1f2   : > { %1154 = vmatpush.msra.mxu2 %v4496_v25 }
 0x1f3   : > { %1135 = vmatpush.msra.mxu1 %v4504_v13 }
 0x1f4   : > { %1155 = vmatpush.msra.mxu2 %v4506_v7  ;;  %v4631_v23 = vpop.trf.xlu1 }
 0x1f5   : > { %6778 = vst [vmem:[#allocation106_spill] sm:$0xff] %v4631_v23  ;;  %v4633_v41 = vpop.trf.xlu0  ;;  %1136 = vmatpush.msra.mxu1 %v4515_v45 }
 0x1f6   : > { %6779 = vst [vmem:[#allocation107_spill] sm:$0xff] %v4633_v41  ;;  %1156 = vmatpush.msra.mxu2 %v4517_v1  ;;  %3229 = vmatmul.msk.f32.vlgmr.msra.gmra.mxu1 %vm450_vm1, %v1101_v5 }
 0x1f7   : > { %3230 = vmatmul.msk.f32.vlgmr.msra.gmra.mxu2 %vm450_vm1, %v1101_v5  ;;  %1463 = vmatpush.msrb.mxu1 %v4455_v62  ;;  %v2380_v5 = vadd.f32 %v2379_v63, %v4618_v35 }
 0x1f8   : > { %1483 = vmatpush.msrb.mxu2 %v4457_v60 }
 0x1f9   : > { %1464 = vmatpush.msrb.mxu1 %v4461_v58 }
 0x1fa   : > { %1484 = vmatpush.msrb.mxu2 %v4463_v42 }
 0x1fb   : > { %1465 = vmatpush.msrb.mxu1 %v4470_v39 }
 0x1fc   : > { %1485 = vmatpush.msrb.mxu2 %v4472_v50  ;;  %v4645_v51 = vpop.trf.xlu1 }
 0x1fd   : > { %6780 = vst [vmem:[#allocation108_spill] sm:$0xff] %v4645_v51  ;;  %v4647_v56 = vpop.trf.xlu0  ;;  %1466 = vmatpush.msrb.mxu1 %v4483_v0 }
 0x1fe   : > { %6781 = vst [vmem:[#allocation109_spill] sm:$0xff] %v4647_v56  ;;  %1486 = vmatpush.msrb.mxu2 %v4485_v30 }
 0x1ff   : > { %1467 = vmatpush.msrb.mxu1 %v4489_v61 }
 0x200   : > { %1487 = vmatpush.msrb.mxu2 %v4491_v53 }
 0x201   : > { %1468 = vmatpush.msrb.mxu1 %v4494_v31 }
 0x202   : > { %1488 = vmatpush.msrb.mxu2 %v4496_v25 }
 0x203   : > { %1469 = vmatpush.msrb.mxu1 %v4504_v13 }
 0x204   : > { %1489 = vmatpush.msrb.mxu2 %v4506_v7  ;;  %v4657_v11 = vpop.trf.xlu1 }
 0x205   : > { %6782 = vst [vmem:[#allocation110_spill] sm:$0xff] %v4657_v11  ;;  %v4659_v21 = vpop.trf.xlu0  ;;  %1470 = vmatpush.msrb.mxu1 %v4515_v45 }
 0x206   : > { %6783 = vst [vmem:[#allocation111_spill] sm:$0xff] %v4659_v21  ;;  %1490 = vmatpush.msrb.mxu2 %v4517_v1 }
 0x207   : > { %1797 = vmatpush.msra.mxu1 %v4455_v62 }
 0x208   : > { %1817 = vmatpush.msra.mxu2 %v4457_v60 }
 0x209   : > { %1798 = vmatpush.msra.mxu1 %v4461_v58 }
 0x20a   : > { %1818 = vmatpush.msra.mxu2 %v4463_v42 }
 0x20b   : > { %1799 = vmatpush.msra.mxu1 %v4470_v39 }
 0x20c   : > { %1819 = vmatpush.msra.mxu2 %v4472_v50  ;;  %v4669_v7 = vpop.trf.xlu1 }
 0x20d   : > { %6784 = vst [vmem:[#allocation112_spill] sm:$0xff] %v4669_v7  ;;  %v4671_v13 = vpop.trf.xlu0  ;;  %1800 = vmatpush.msra.mxu1 %v4483_v0  ;;  %v2413_v0 = vld [vmem:[%s6500_s3 + $0x60] sm:$0xff] }
 0x20e   : > { %6785 = vst [vmem:[#allocation113_spill] sm:$0xff] %v4671_v13  ;;  %1820 = vmatpush.msra.mxu2 %v4485_v30  ;;  %v2412_v30 = vld [vmem:[%s6500_s3 + $0x58] sm:$0xff] }
 0x20f   : > { %1801 = vmatpush.msra.mxu1 %v4489_v61  ;;  %v2416_v61 = vld [vmem:[%s6500_s3 + $0x78] sm:$0xff] }
 0x210   : > { %1821 = vmatpush.msra.mxu2 %v4491_v53  ;;  %2417 = vmatpush.msrb.mxu0 %v2416_v61  ;;  %v2411_v53 = vld [vmem:[%s6500_s3 + $0x50] sm:$0xff] }
 0x211   : > { %1802 = vmatpush.msra.mxu1 %v4494_v31  ;;  %2751 = vmatpush.msrb.mxu3 %v2416_v61  ;;  %v2414_v31 = vld [vmem:[%s6500_s3 + $0x68] sm:$0xff] }
 0x212   : > { %1822 = vmatpush.msra.mxu2 %v4496_v25  ;;  %v2415_v25 = vld [vmem:[%s6500_s3 + $0x70] sm:$0xff] }
 0x213   : > { %2418 = vmatpush.msrb.mxu0 %v2415_v25  ;;  %2752 = vmatpush.msrb.mxu3 %v2415_v25 }
 0x214   : > { %v4679_v1 = vpop.trf.xlu1 }
 0x215   : > { %6786 = vst [vmem:[#allocation114_spill] sm:$0xff] %v4679_v1  ;;  %v4681_v45 = vpop.trf.xlu0  ;;  %2419 = vmatpush.msrb.mxu0 %v2414_v31  ;;  %2753 = vmatpush.msrb.mxu3 %v2414_v31  ;;  %v2405_v31 = vld [vmem:[%s6500_s3 + $0x20] sm:$0xff] }
 0x216   : > { %6787 = vst [vmem:[#allocation115_spill] sm:$0xff] %v4681_v45 }
 0x217   : > { %2420 = vmatpush.msrb.mxu0 %v2413_v0  ;;  %2754 = vmatpush.msrb.mxu3 %v2413_v0  ;;  %v2715_v0 = vadd.f32 %v2714_v24, %v4631_v23 }
 0x219   : > { %2421 = vmatpush.msrb.mxu0 %v2412_v30  ;;  %2755 = vmatpush.msrb.mxu3 %v2412_v30  ;;  %v2381_v30 = vadd.f32 %v2380_v5, %v4633_v41 }
 0x21b   : > { %2422 = vmatpush.msrb.mxu0 %v2411_v53  ;;  %2756 = vmatpush.msrb.mxu3 %v2411_v53  ;;  %v2404_v53 = vld [vmem:[%s6500_s3 + $0x18] sm:$0xff] }
 0x21c   : > { %v4683_v50 = vpop.trf.xlu1 }
 0x21d   : > { %6788 = vst [vmem:[#allocation116_spill] sm:$0xff] %v4683_v50  ;;  %v4685_v62 = vpop.trf.xlu0  ;;  %2423 = vmatpush.msrb.mxu0 %v2410_v52  ;;  %2757 = vmatpush.msrb.mxu3 %v2410_v52  ;;  %v2716_v52 = vadd.f32 %v2715_v0, %v4645_v51 }
 0x21e   : > { %6789 = vst [vmem:[#allocation117_spill] sm:$0xff] %v4685_v62 }
 0x21f   : > { %2424 = vmatpush.msrb.mxu0 %v2409_v33  ;;  %2758 = vmatpush.msrb.mxu3 %v2409_v33  ;;  %v2382_v33 = vadd.f32 %v2381_v30, %v4647_v56  ;;  %v2402_v30 = vld [vmem:[%s6500_s3 + $0x8] sm:$0xff] }
 0x221   : > { %2425 = vmatpush.msrb.mxu0 %v2408_v22  ;;  %2759 = vmatpush.msrb.mxu3 %v2408_v22  ;;  %v2403_v22 = vld [vmem:[%s6500_s3 + $0x10] sm:$0xff]  ;;  %v2383_v40 = vadd.f32 %v2382_v33, %v4659_v21  ;;  %v2401_v33 = vld [vmem:[%s6500_s3] sm:$0xff] }
 0x222   : > { %v4920_v21 = vld [vmem:[%s6498_s1 + $0x70] sm:$0xff] }
 0x223   : > { %2426 = vmatpush.msrb.mxu0 %v2407_v43  ;;  %2760 = vmatpush.msrb.mxu3 %v2407_v43  ;;  %v2717_v43 = vadd.f32 %v2716_v52, %v4657_v11  ;;  %6819 = vst [vmem:[#allocation145_spill] sm:$0xff] %v4920_v21 }
 0x224   : > { %v4687_v60 = vpop.trf.xlu1 }
 0x225   : > { %6790 = vst [vmem:[#allocation118_spill] sm:$0xff] %v4687_v60  ;;  %v4689_v58 = vpop.trf.xlu0  ;;  %2427 = vmatpush.msrb.mxu0 %v2406_v46  ;;  %2761 = vmatpush.msrb.mxu3 %v2406_v46  ;;  %v2718_v63 = vadd.f32 %v2717_v43, %v4669_v7  ;;  %v2384_v46 = vadd.f32 %v2383_v40, %v4671_v13  ;;  %v4915_v13 = vld [vmem:[%s6498_s1 + $0x68] sm:$0xff] }
 0x226   : > { %6791 = vst [vmem:[#allocation119_spill] sm:$0xff] %v4689_v58 }
 0x227   : > { %2428 = vmatpush.msrb.mxu0 %v2405_v31  ;;  %2762 = vmatpush.msrb.mxu3 %v2405_v31  ;;  %v2719_v31 = vadd.f32 %v2718_v63, %v4679_v1  ;;  %v2385_v0 = vadd.f32 %v2384_v46, %v4681_v45  ;;  %v4910_v45 = vld [vmem:[%s6498_s1 + $0x60] sm:$0xff]  ;;  %6818 = vst [vmem:[#allocation144_spill] sm:$0xff] %v4915_v13 }
 0x228   : > { %6817 = vst [vmem:[#allocation143_spill] sm:$0xff] %v4910_v45 }
 0x229   : > { %2429 = vmatpush.msrb.mxu0 %v2404_v53  ;;  %2763 = vmatpush.msrb.mxu3 %v2404_v53  ;;  %v2720_v53 = vadd.f32 %v2719_v31, %v4683_v50  ;;  %v2386_v52 = vadd.f32 %v2385_v0, %v4685_v62 }
 0x22b   : > { %2430 = vmatpush.msrb.mxu0 %v2403_v22  ;;  %2764 = vmatpush.msrb.mxu3 %v2403_v22  ;;  %v2721_v22 = vadd.f32 %v2720_v53, %v4687_v60  ;;  %v2387_v43 = vadd.f32 %v2386_v52, %v4689_v58  ;;  %v4898_v58 = vld [vmem:[%s6498_s1 + $0x58] sm:$0xff] }
 0x22c   : > { %v4700_v42 = vpop.trf.xlu1  ;;  %6816 = vst [vmem:[#allocation142_spill] sm:$0xff] %v4898_v58 }
 0x22d   : > { %6792 = vst [vmem:[#allocation120_spill] sm:$0xff] %v4700_v42  ;;  %v4702_v39 = vpop.trf.xlu0  ;;  %2431 = vmatpush.msrb.mxu0 %v2402_v30  ;;  %2765 = vmatpush.msrb.mxu3 %v2402_v30  ;;  %v2722_v40 = vadd.f32 %v2721_v22, %v4700_v42 }
 0x22e   : > { %6793 = vst [vmem:[#allocation121_spill] sm:$0xff] %v4702_v39  ;;  %v2388_v63 = vadd.f32 %v2387_v43, %v4702_v39 }
 0x22f   : > { %2432 = vmatpush.msrb.mxu0 %v2401_v33  ;;  %2766 = vmatpush.msrb.mxu3 %v2401_v33 }
 0x234   : > { %v4716_v47 = vpop.trf.xlu1 }
 0x235   : > { %6794 = vst [vmem:[#allocation122_spill] sm:$0xff] %v4716_v47  ;;  %v4718_v29 = vpop.trf.xlu0  ;;  %v2723_v0 = vadd.f32 %v2722_v40, %v4716_v47 }
 0x236   : > { %6795 = vst [vmem:[#allocation123_spill] sm:$0xff] %v4718_v29  ;;  %v2389_v30 = vadd.f32 %v2388_v63, %v4718_v29 }
 0x23c   : > { %v4738_v61 = vpop.trf.xlu1 }
 0x23d   : > { %6796 = vst [vmem:[#allocation124_spill] sm:$0xff] %v4738_v61  ;;  %v4740_v25 = vpop.trf.xlu0  ;;  %v2724_v50 = vadd.f32 %v2723_v0, %v4738_v61 }
 0x23e   : > { %6797 = vst [vmem:[#allocation125_spill] sm:$0xff] %v4740_v25  ;;  %v2390_v53 = vadd.f32 %v2389_v30, %v4740_v25 }
 0x244   : > { %v4759_v24 = vpop.trf.xlu1 }
 0x245   : > { %6798 = vst [vmem:[#allocation126_spill] sm:$0xff] %v4759_v24  ;;  %v4761_v5 = vpop.trf.xlu0  ;;  %v2725_v52 = vadd.f32 %v2724_v50, %v4759_v24 }
 0x246   : > { %6799 = vst [vmem:[#allocation127_spill] sm:$0xff] %v4761_v5  ;;  %v2391_v33 = vadd.f32 %v2390_v53, %v4761_v5 }
 0x24c   : > { %v4777_v46 = vpop.trf.xlu1 }
 0x24d   : > { %6800 = vst [vmem:[#allocation128_spill] sm:$0xff] %v4777_v46  ;;  %v4779_v31 = vpop.trf.xlu0  ;;  %v2726_v22 = vadd.f32 %v2725_v52, %v4777_v46 }
 0x24e   : > { %6801 = vst [vmem:[#allocation129_spill] sm:$0xff] %v4779_v31  ;;  %v2392_v43 = vadd.f32 %v2391_v33, %v4779_v31 }
 0x254   : > { %v4789_v42 = vpop.trf.xlu1 }
 0x255   : > { %6802 = vst [vmem:[#allocation130_spill] sm:$0xff] %v4789_v42  ;;  %v4791_v60 = vpop.trf.xlu0  ;;  %v2727_v40 = vadd.f32 %v2726_v22, %v4789_v42 }
 0x256   : > { %6803 = vst [vmem:[#allocation131_spill] sm:$0xff] %v4791_v60  ;;  %v2393_v63 = vadd.f32 %v2392_v43, %v4791_v60 }
 0x257   : > { %v2728_v47 = vrot.slane %v2727_v40, 4 }
 0x258   : > { %v2394_v0 = vrot.slane %v2393_v63, 4 }
 0x259   : > { %v2729_v61 = vadd.f32 %v2728_v47, %v2727_v40 }
 0x25a   : > { %v2395_v30 = vadd.f32 %v2394_v0, %v2393_v63  ;;  %v4797_v0 = vld [vmem:[#allocation7 + $0x10] sm:$0xff] }
 0x25b   : > { %v2730_v1 = vrot.slane %v2729_v61, 2  ;;  %1803 = vmatpush.msra.mxu1 %v4797_v0 }
 0x25c   : > { %v2396_v50 = vrot.slane %v2395_v30, 2 }
 0x25d   : > { %v2731_v24 = vadd.f32 %v2730_v1, %v2729_v61 }
 0x25e   : > { %v2397_v53 = vadd.f32 %v2396_v50, %v2395_v30  ;;  %v4813_v50 = vld [vmem:[#allocation7 + $0x78] sm:$0xff] }
 0x25f   : > { %v2732_v7 = vrot.slane %v2731_v24, 1 }
 0x260   : > { %v2398_v52 = vrot.slane %v2397_v53, 1 }
 0x261   : > { %v2733_v46 = vadd.f32 %v2732_v7, %v2731_v24 }
 0x262   : > { %v2399_v33 = vadd.f32 %v2398_v52, %v2397_v53  ;;  %v4818_v52 = vld [vmem:[#allocation7 + $0x60] sm:$0xff] }
 0x263   : > { %v471_v11 = vpop.f32.mrf.mxu1  ;;  %v2734_v22 = vmul.f32 %v2733_v46, %v4341_v18  ;;  %v4809_v46 = vld [vmem:[#allocation7 + $0x70] sm:$0xff] }
 0x264   : > { %v494_v51 = vsub.f32 0.0, %v471_v11  ;;  %v2400_v23 = vmul.f32 %v2399_v33, %v4341_v18  ;;  %v4799_v11 = vld [vmem:[#allocation7 + $0x18] sm:$0xff]  ;;  %v4820_v33 = vld [vmem:[#allocation7 + $0x68] sm:$0xff] }
 0x265   : > { %2767 = vmatmul.f32.vlgmr.msrb.gmra.mxu3 %v2734_v22  ;;  %1823 = vmatpush.msra.mxu2 %v4799_v11 }
 0x266   : > { %v496_v42 = vmul.f32 1.442695, %v494_v51  ;;  %2433 = vmatmul.f32.vlgmr.msrb.gmra.mxu0 %v2400_v23  ;;  %v4805_v51 = vld [vmem:[#allocation7] sm:$0xff] }
 0x267   : > { %1804 = vmatpush.msra.mxu1 %v4805_v51 }
 0x268   : > { %3513 = vpow2.f32 %v496_v42  ;;  %v4807_v42 = vld [vmem:[#allocation7 + $0x8] sm:$0xff] }
 0x269   : > { %v491_v47 = vpop.f32.mrf.mxu2  ;;  %1824 = vmatpush.msra.mxu2 %v4807_v42 }
 0x26a   : > { %v495_v43 = vsub.f32 0.0, %v491_v47  ;;  %v1432_v61 = vpop.f32.mrf.mxu3 }
 0x26b   : > { %v1435_v7 = vmax.f32 %v1432_v61, 0.0  ;;  %v804_v30 = vpop.f32.mrf.mxu1 }
 0x26c   : > { %v498_v40 = vmul.f32 1.442695, %v495_v43  ;;  %v827_v23 = vsub.f32 0.0, %v804_v30  ;;  %v1766_v43 = vpop.f32.mrf.mxu0 }
 0x26d   : > { %3263 = vmatmul.msk.f32.vlgmr.msrb.gmra.mxu1 %vm450_vm1, %v1435_v7  ;;  %3264 = vmatmul.msk.f32.vlgmr.msrb.gmra.mxu2 %vm450_vm1, %v1435_v7  ;;  %v1769_v7 = vmax.f32 %v1766_v43, 0.0 }
 0x26e   : > { %v3514_v63 = vpop.eup %3513  ;;  %3515 = vpow2.f32 %v498_v40  ;;  %v829_v47 = vmul.f32 1.442695, %v827_v23  ;;  %2131 = vmatpush.msrb.mxu1 %v4809_v46  ;;  %2151 = vmatpush.msrb.mxu2 %v4813_v50 }
 0x26f   : > { %v500_v1 = vadd.f32 1.0, %v3514_v63 }
 0x270   : > { %2132 = vmatpush.msrb.mxu1 %v4818_v52  ;;  %2152 = vmatpush.msrb.mxu2 %v4820_v33 }
 0x271   : > { %3517 = vrcp.f32 %v500_v1  ;;  %v513_v54 = vand.u32 2147483648, %v500_v1  ;;  %vm507_vm3 = vweird.f32 %v500_v1  ;;  %v511_v37 = vand.u32 2147483647, %v500_v1 }
 0x272   : > { %v824_v63 = vpop.f32.mrf.mxu2  ;;  %2133 = vmatpush.msrb.mxu1 %v4962_v9  ;;  %2153 = vmatpush.msrb.mxu2 %v4964_v57 }
 0x273   : > { %v828_v30 = vsub.f32 0.0, %v824_v63  ;;  %v514_v31 = vor.u32 1.1754944e-38, %v513_v54  ;;  %vm512_vm5 = vcmp.eq.f32.partialorder %v511_v37, 8.507059e+37  ;;  %v4847_v54 = vld [vmem:[%s6498_s1 + $0x10] sm:$0xff] }
 0x274   : > { %v3516_v24 = vpop.eup %3515  ;;  %6805 = vst [vmem:[#allocation133_spill] sm:$0xff] %v4847_v54 }
 0x275   : > { %v4801_v18 = vadd.f32 1.0, %v3516_v24  ;;  %3297 = vmatmul.msk.f32.vlgmr.msra.gmra.mxu1 %vm450_vm1, %v1769_v7  ;;  %3298 = vmatmul.msk.f32.vlgmr.msra.gmra.mxu2 %vm450_vm1, %v1769_v7  ;;  %v831_v60 = vmul.f32 1.442695, %v828_v30  ;;  %v4867_v30 = vld [vmem:[%s6498_s1 + $0x30] sm:$0xff] }
 0x276   : > { %6809 = vst [vmem:[#allocation137_spill] sm:$0xff] %v4867_v30 }
 0x277   : > { %v3518_v53 = vpop.eup %3517  ;;  %3519 = vrcp.f32 %v4801_v18  ;;  %v527_v7 = vand.u32 2147483648, %v4801_v18  ;;  %vm521_vm7 = vweird.f32 %v4801_v18 }
 0x278   : > { %v503_v22 = vmul.f32 %v3518_v53, %v500_v1  ;;  %3521 = vpow2.f32 %v829_v47  ;;  %vm508_vm2 = vweird.f32 %v3518_v53  ;;  %v4837_v1 = vld [vmem:[%s6498_s1] sm:$0xff] }
 0x279   : > { %vm509_vm4 = vmor %vm507_vm3, %vm508_vm2  ;;  %3523 = vpow2.f32 %v831_v60  ;;  %v4852_v60 = vld [vmem:[%s6498_s1 + $0x18] sm:$0xff]  ;;  %v528_v29 = vor.u32 1.1754944e-38, %v527_v7 }
 0x27a   : > { %v504_v40 = vsub.f32 1.0, %v503_v22  ;;  %6806 = vst [vmem:[#allocation134_spill] sm:$0xff] %v4852_v60 }
 0x27c   : > { %v505_v61 = vmul.f32 %v3518_v53, %v504_v40 }
 0x27d   : > { %v3520_v24 = vpop.eup %3519 }
 0x27e   : > { %v506_v23 = vadd.f32 %v3518_v53, %v505_v61  ;;  %v517_v16 = vmul.f32 %v3520_v24, %v4801_v18  ;;  %v3522_v22 = vpop.eup %3521  ;;  %v525_v61 = vand.u32 2147483647, %v4801_v18  ;;  %vm522_vm6 = vweird.f32 %v3520_v24  ;;  %v4893_v18 = vld [vmem:[%s6498_s1 + $0x50] sm:$0xff] }
 0x27f   : > { %v4829_v43 = vadd.f32 1.0, %v3522_v22  ;;  %v3524_v22 = vpop.eup %3523  ;;  %6815 = vst [vmem:[#allocation141_spill] sm:$0xff] %v4893_v18  ;;  %vm523_vm9 = vmor %vm521_vm7, %vm522_vm6 }
 0x280   : > { %v510_v47 = vsel %vm509_vm4, %v3518_v53, %v506_v23  ;;  %v518_v40 = vsub.f32 1.0, %v517_v16  ;;  %v4842_v16 = vld [vmem:[%s6498_s1 + $0x8] sm:$0xff]  ;;  %v4872_v23 = vld [vmem:[%s6498_s1 + $0x38] sm:$0xff]  ;;  %vm4885_vm8 = vcmp.eq.f32.partialorder %v525_v61, 8.507059e+37  ;;  %v4935_v48 = vadd.f32 1.0, %v3524_v22 }
 0x281   : > { %v515_v63 = vsel %vm512_vm5, %v514_v31, %v510_v47  ;;  %3525 = vrcp.f32 %v4829_v43  ;;  %6804 = vst [vmem:[#allocation132_spill] sm:$0xff] %v4842_v16  ;;  %v4857_v31 = vld [vmem:[%s6498_s1 + $0x20] sm:$0xff]  ;;  %v4862_v53 = vld [vmem:[%s6498_s1 + $0x28] sm:$0xff]  ;;  %vm840_vm10 = vweird.f32 %v4829_v43 }
 0x282   : > { %v519_v5 = vmul.f32 %v3520_v24, %v518_v40  ;;  %v546_v37 = vperm.slane %v515_v63, 0  ;;  %6807 = vst [vmem:[#allocation135_spill] sm:$0xff] %v4857_v31  ;;  %v4878_v47 = vld [vmem:[%s6498_s1 + $0x40] sm:$0xff]  ;;  %v4883_v40 = vld [vmem:[%s6498_s1 + $0x48] sm:$0xff]  ;;  %3527 = vrcp.f32 %v4935_v48  ;;  %vm854_vm15 = vweird.f32 %v4935_v48 }
 0x283   : > { %6808 = vst [vmem:[#allocation136_spill] sm:$0xff] %v4862_v53 }
 0x284   : > { %6810 = vst [vmem:[#allocation138_spill] sm:$0xff] %v4872_v23  ;;  %v520_v63 = vadd.f32 %v3520_v24, %v519_v5  ;;  %v547_v62 = vmul.f32 %v546_v37, %v4837_v1  ;;  %v548_v5 = vmul.f32 %v546_v37, %v4842_v16  ;;  %v549_v61 = vmul.f32 %v546_v37, %v4847_v54 }
 0x285   : > { %6811 = vst [vmem:[#allocation139_spill] sm:$0xff] %v4878_v47  ;;  %v550_v56 = vmul.f32 %v546_v37, %v4852_v60  ;;  %v551_v7 = vmul.f32 %v546_v37, %v4857_v31  ;;  %v552_v41 = vmul.f32 %v546_v37, %v4862_v53  ;;  %v553_v49 = vmul.f32 %v546_v37, %v4867_v30  ;;  %v5002_v30 = vld [vmem:[#allocation5 + $0x40] sm:$0xff] }
 0x286   : > { %6812 = vst [vmem:[#allocation140_spill] sm:$0xff] %v4883_v40  ;;  %v524_v35 = vsel %vm523_vm9, %v3520_v24, %v520_v63  ;;  %v554_v19 = vmul.f32 %v546_v37, %v4872_v23  ;;  %v555_v24 = vmul.f32 %v546_v37, %v4878_v47  ;;  %v556_v63 = vmul.f32 %v546_v37, %v4883_v40 }
 0x287   : > { %v4905_v39 = vpop.eup %3525  ;;  %v529_v59 = vsel %vm4885_vm8, %v528_v29, %v524_v35  ;;  %v557_v25 = vmul.f32 %v546_v37, %v4893_v18  ;;  %v4945_v35 = vld [vmem:[#allocation5 + $0x18] sm:$0xff]  ;;  %v558_v6 = vmul.f32 %v546_v37, %v4898_v58  ;;  %v4951_v22 = vmul.f32 %v546_v37, %v4910_v45 }
 0x288   : > { %6824 = vst [vmem:[#allocation150_spill] sm:$0xff] %v4945_v35  ;;  %v4947_v29 = vperm.slane %v529_v59, 0  ;;  %v4954_v27 = vmul.f32 %v546_v37, %v4915_v13  ;;  %v4960_v36 = vmul.f32 %v4905_v39, %v4829_v43  ;;  %v4967_v59 = vmul.f32 %v546_v37, %v4920_v21  ;;  %v4982_v21 = vld [vmem:[#allocation5 + $0x30] sm:$0xff] }
 0x289   : > { %v4979_v18 = vmul.f32 %v546_v37, %v4940_v15  ;;  %v563_v40 = vadd.f32 %v547_v62, %v4006_v2  ;;  %v565_v37 = vadd.f32 %v549_v61, %v4024_v14  ;;  %v566_v15 = vadd.f32 %v550_v56, %v4033_v20  ;;  %v4995_v2 = vld [vmem:[#allocation5 + $0x38] sm:$0xff]  ;;  %v5008_v20 = vld [vmem:[#allocation7 + $0x30] sm:$0xff] }
 0x28a   : > { %v596_v45 = vmul.f32 %v4947_v29, %v4929_v4  ;;  %v597_v13 = vmul.f32 %v4947_v29, %v4931_v28  ;;  %v598_v58 = vmul.f32 %v4947_v29, %v4933_v12  ;;  %v599_v47 = vmul.f32 %v4947_v29, %v4945_v35  ;;  %v4988_v28 = vld [vmem:[#allocation7 + $0x40] sm:$0xff]  ;;  %v4990_v4 = vld [vmem:[#allocation7 + $0x48] sm:$0xff]  ;;  %v5010_v56 = vld [vmem:[#allocation7 + $0x38] sm:$0xff] }
 0x28b   : > { %6829 = vst [vmem:[#allocation155_spill] sm:$0xff] %v4988_v28  ;;  %v564_v12 = vadd.f32 %v548_v5, %v4015_v8  ;;  %v600_v62 = vmul.f32 %v4947_v29, %v4956_v3  ;;  %2134 = vmatpush.msrb.mxu1 %v4988_v28  ;;  %v567_v35 = vadd.f32 %v551_v7, %v4042_v26  ;;  %v837_v14 = vsub.f32 1.0, %v4960_v36  ;;  %v5012_v5 = vld [vmem:[#allocation5 + $0x48] sm:$0xff] }
 0x28c   : > { %6830 = vst [vmem:[#allocation156_spill] sm:$0xff] %v4990_v4  ;;  %v568_v23 = vadd.f32 %v552_v41, %v4051_v32  ;;  %v601_v8 = vmul.f32 %v4947_v29, %v4969_v17  ;;  %2154 = vmatpush.msrb.mxu2 %v4990_v4  ;;  %v602_v26 = vmul.f32 %v4947_v29, %v4982_v21  ;;  %v5025_v17 = vld [vmem:[#allocation5 + $0x50] sm:$0xff]  ;;  %vm841_vm11 = vweird.f32 %v4905_v39 }
 0x28d   : > { %v5016_v61 = vadd.f32 %v596_v45, %v563_v40  ;;  %v5018_v32 = vadd.f32 %v597_v13, %v564_v12  ;;  %v5020_v41 = vadd.f32 %v598_v58, %v565_v37  ;;  %2135 = vmatpush.msrb.mxu1 %v5008_v20  ;;  %v569_v36 = vadd.f32 %v553_v49, %v4060_v38  ;;  %v5032_v12 = vld [vmem:[#allocation7 + $0x20] sm:$0xff]  ;;  %v5034_v13 = vld [vmem:[#allocation7 + $0x28] sm:$0xff]  ;;  %v5038_v38 = vld [vmem:[#allocation5 + $0x58] sm:$0xff] }
 0x28e   : > { %v570_v7 = vadd.f32 %v554_v19, %v4069_v44  ;;  %6831 = vst [vmem:[#allocation157_spill] sm:$0xff] %v5025_v17  ;;  %v603_v3 = vmul.f32 %v4947_v29, %v4995_v2  ;;  %v5029_v53 = vadd.f32 %v599_v47, %v566_v15  ;;  %2155 = vmatpush.msrb.mxu2 %v5010_v56  ;;  %v1138_v15 = vpop.f32.mrf.mxu1  ;;  %v6832_v49 = vld [vmem:[#allocation40_spill] sm:$0xff]  ;;  %v5054_v40 = vld [vmem:[#allocation5 + $0x60] sm:$0xff]  ;;  %vm842_vm12 = vmor %vm840_vm10, %vm841_vm11 }
 0x28f   : > { %v571_v45 = vadd.f32 %v555_v24, %v4102_v55  ;;  %v572_v58 = vadd.f32 %v556_v63, %v4141_v10  ;;  %v604_v44 = vmul.f32 %v4947_v29, %v5002_v30  ;;  %v5042_v19 = vadd.f32 %v600_v62, %v567_v35  ;;  %628 = vst [vmem:[%s5045_s13] sm:$0xff] %v5016_v61  ;;  %v5050_v55 = vpop.eup %3527  ;;  %v5062_v35 = vld [vmem:[#allocation5 + $0x68] sm:$0xff] }
 0x290   : > { %v573_v10 = vadd.f32 %v557_v25, %v4180_v34  ;;  %v574_v47 = vadd.f32 %v558_v6, %v6832_v49  ;;  %v605_v24 = vmul.f32 %v4947_v29, %v5012_v5  ;;  %v5058_v63 = vadd.f32 %v601_v8, %v568_v23  ;;  %629 = vst [vmem:[%s5045_s13 + $0x40] sm:$0xff] %v5018_v32  ;;  %v6834_v6 = vld [vmem:[#allocation43_spill] sm:$0xff]  ;;  %v5075_v25 = vld [vmem:[#allocation5 + $0x70] sm:$0xff] }
 0x291   : > { %6833 = vst [vmem:[#allocation40_spill] sm:$0xff] %v5062_v35  ;;  %v606_v37 = vmul.f32 %v4947_v29, %v5025_v17  ;;  %v5066_v62 = vadd.f32 %v602_v26, %v569_v36  ;;  %v838_v34 = vmul.f32 %v4905_v39, %v837_v14  ;;  %2136 = vmatpush.msrb.mxu1 %v5032_v12  ;;  %v1161_v26 = vsub.f32 0.0, %v1138_v15  ;;  %v5083_v14 = vld [vmem:[#allocation5 + $0x78] sm:$0xff] }
 0x292   : > { %630 = vst [vmem:[%s5045_s13 + $0x80] sm:$0xff] %v5020_v41  ;;  %2156 = vmatpush.msrb.mxu2 %v5034_v13  ;;  %v575_v23 = vadd.f32 %v4951_v22, %v6834_v6  ;;  %v607_v8 = vmul.f32 %v4947_v29, %v5038_v38  ;;  %v5079_v49 = vadd.f32 %v603_v3, %v570_v7  ;;  %vm855_vm14 = vweird.f32 %v5050_v55 }
 0x293   : > { %631 = vst [vmem:[%s5045_s13 + $0xc0] sm:$0xff] %v5029_v53  ;;  %v608_v36 = vmul.f32 %v4947_v29, %v5054_v40  ;;  %v5087_v17 = vadd.f32 %v604_v44, %v571_v45  ;;  %v850_v22 = vmul.f32 %v5050_v55, %v4935_v48  ;;  %2137 = vmatpush.msrb.mxu1 %v4797_v0  ;;  %v1163_v45 = vmul.f32 1.442695, %v1161_v26  ;;  %vm856_vm0 = vmor %vm854_vm15, %vm855_vm14 }
 0x294   : > { %632 = vst [vmem:[%s5045_s13 + $0x100] sm:$0xff] %v5042_v19  ;;  %2157 = vmatpush.msrb.mxu2 %v4799_v11  ;;  %v609_v3 = vmul.f32 %v4947_v29, %v5062_v35  ;;  %v5097_v7 = vadd.f32 %v605_v24, %v572_v58  ;;  %v610_v44 = vmul.f32 %v4947_v29, %v5075_v25  ;;  %v6835_v58 = vld [vmem:[#allocation46_spill] sm:$0xff] }
 0x295   : > { %633 = vst [vmem:[%s5045_s13 + $0x140] sm:$0xff] %v5058_v63  ;;  %v5104_v15 = vadd.f32 %v606_v37, %v573_v10  ;;  %v839_v6 = vadd.f32 %v4905_v39, %v838_v34  ;;  %2138 = vmatpush.msrb.mxu1 %v4805_v51  ;;  %v576_v24 = vadd.f32 %v4954_v27, %v6835_v58  ;;  %v6836_v10 = vld [vmem:[#allocation49_spill] sm:$0xff]  ;;  %v851_v27 = vsub.f32 1.0, %v850_v22 }
 0x296   : > { %634 = vst [vmem:[%s5045_s13 + $0x180] sm:$0xff] %v5066_v62  ;;  %2158 = vmatpush.msrb.mxu2 %v4807_v42  ;;  %v611_v26 = vmul.f32 %v4947_v29, %v5083_v14  ;;  %v5115_v35 = vadd.f32 %v607_v8, %v574_v47  ;;  %v577_v37 = vadd.f32 %v4967_v59, %v6836_v10  ;;  %3529 = vpow2.f32 %v1163_v45  ;;  %v6837_v29 = vld [vmem:[#allocation52_spill] sm:$0xff]  ;;  %v1158_v59 = vpop.f32.mrf.mxu2 }
 0x297   : > { %635 = vst [vmem:[%s5045_s13 + $0x1c0] sm:$0xff] %v5079_v49  ;;  %2465 = vmatpush.msra.mxu1 %v4809_v46  ;;  %v5123_v34 = vadd.f32 %v608_v36, %v575_v23  ;;  %v578_v47 = vadd.f32 %v4979_v18, %v6837_v29  ;;  %v5129_v8 = vadd.f32 %v609_v3, %v576_v24  ;;  %v6838_v22 = vand.u32 2147483648, %v4829_v43 }
 0x298   : > { %2485 = vmatpush.msra.mxu2 %v4813_v50  ;;  %636 = vst [vmem:[%s5045_s13 + $0x200] sm:$0xff] %v5087_v17  ;;  %v5137_v23 = vadd.f32 %v610_v44, %v577_v37  ;;  %v843_v36 = vsel %vm842_vm12, %v4905_v39, %v839_v6  ;;  %v6839_v45 = vand.u32 2147483647, %v4829_v43  ;;  %v852_v44 = vmul.f32 %v5050_v55, %v851_v27 }
 0x299   : > { %637 = vst [vmem:[%s5045_s13 + $0x240] sm:$0xff] %v5097_v7  ;;  %v5142_v18 = vadd.f32 %v611_v26, %v578_v47  ;;  %v847_v3 = vor.u32 1.1754944e-38, %v6838_v22  ;;  %v1162_v58 = vsub.f32 0.0, %v1158_v59  ;;  %v860_v39 = vand.u32 2147483648, %v4935_v48  ;;  %2466 = vmatpush.msra.mxu1 %v4818_v52  ;;  %v6840_v59 = vld [vmem:[#allocation136_spill] sm:$0xff]  ;;  %v6841_v22 = vld [vmem:[#allocation137_spill] sm:$0xff] }
 0x29a   : > { %638 = vst [vmem:[%s5045_s13 + $0x280] sm:$0xff] %v5104_v15  ;;  %vm845_vm13 = vcmp.eq.f32.partialorder %v6839_v45, 8.507059e+37  ;;  %v858_v26 = vand.u32 2147483647, %v4935_v48  ;;  %v853_v10 = vadd.f32 %v5050_v55, %v852_v44  ;;  %2486 = vmatpush.msra.mxu2 %v4820_v33  ;;  %v6842_v45 = vld [vmem:[#allocation138_spill] sm:$0xff] }
 0x29b   : > { %639 = vst [vmem:[%s5045_s13 + $0x2c0] sm:$0xff] %v5115_v35  ;;  %v848_v24 = vsel %vm845_vm13, %v847_v3, %v843_v36  ;;  %v1165_v37 = vmul.f32 1.442695, %v1162_v58  ;;  %v861_v27 = vor.u32 1.1754944e-38, %v860_v39  ;;  %2467 = vmatpush.msra.mxu1 %v4962_v9  ;;  %v6851_v9 = vld [vmem:[#allocation149_spill] sm:$0xff] }
 0x29c   : > { %640 = vst [vmem:[%s5045_s13 + $0x300] sm:$0xff] %v5123_v34  ;;  %v3530_v6 = vpop.eup %3529  ;;  %v879_v43 = vperm.slane %v848_v24, 0  ;;  %vm859_vm2 = vcmp.eq.f32.partialorder %v858_v26, 8.507059e+37  ;;  %2487 = vmatpush.msra.mxu2 %v4964_v57  ;;  %v6844_v24 = vld [vmem:[#allocation140_spill] sm:$0xff] }
 0x29d   : > { %641 = vst [vmem:[%s5045_s13 + $0x340] sm:$0xff] %v5129_v8  ;;  %v5173_v29 = vadd.f32 1.0, %v3530_v6  ;;  %3531 = vpow2.f32 %v1165_v37  ;;  %2468 = vmatpush.msra.mxu1 %v4988_v28  ;;  %v6845_v6 = vld [vmem:[#allocation141_spill] sm:$0xff] }
 0x29e   : > { %642 = vst [vmem:[%s5045_s13 + $0x380] sm:$0xff] %v5137_v23  ;;  %2488 = vmatpush.msra.mxu2 %v4990_v4  ;;  %v885_v36 = vmul.f32 %v879_v43, %v6840_v59  ;;  %v886_v3 = vmul.f32 %v879_v43, %v6841_v22  ;;  %v887_v44 = vmul.f32 %v879_v43, %v6842_v45  ;;  %v6849_v4 = vld [vmem:[#allocation145_spill] sm:$0xff]  ;;  %v6856_v59 = vld [vmem:[#allocation23_spill] sm:$0xff] }
 0x29f   : > { %643 = vst [vmem:[%s5045_s13 + $0x3c0] sm:$0xff] %v5142_v18  ;;  %3533 = vrcp.f32 %v5173_v29  ;;  %v889_v39 = vmul.f32 %v879_v43, %v6844_v24  ;;  %v890_v26 = vmul.f32 %v879_v43, %v6845_v6  ;;  %v5214_v28 = vmul.f32 %v879_v43, %v6849_v4  ;;  %v6855_v4 = vld [vmem:[#allocation21_spill] sm:$0xff]  ;;  %2469 = vmatpush.msra.mxu1 %v5008_v20 }
 0x2a0   : > { %644 = vst [vmem:[%s5163_s10] sm:$0xff] %v5016_v61  ;;  %v857_v61 = vsel %vm856_vm0, %v5050_v55, %v853_v10  ;;  %v883_v55 = vmul.f32 %v879_v43, %v4852_v60  ;;  %v6846_v10 = vld [vmem:[#allocation142_spill] sm:$0xff]  ;;  %v5221_v6 = vmul.f32 %v879_v43, %v6851_v9  ;;  %2489 = vmatpush.msra.mxu2 %v5010_v56  ;;  %vm1174_vm4 = vweird.f32 %v5173_v29 }
 0x2a1   : > { %645 = vst [vmem:[%s5163_s10 + $0x40] sm:$0xff] %v5018_v32  ;;  %v862_v48 = vsel %vm859_vm2, %v861_v27, %v857_v61  ;;  %v880_v32 = vmul.f32 %v879_v43, %v4837_v1  ;;  %v891_v37 = vmul.f32 %v879_v43, %v6846_v10  ;;  %v6848_v61 = vld [vmem:[#allocation144_spill] sm:$0xff]  ;;  %v6852_v10 = vld [vmem:[#allocation17_spill] sm:$0xff]  ;;  %2470 = vmatpush.msra.mxu1 %v5032_v12 }
 0x2a2   : > { %646 = vst [vmem:[%s5163_s10 + $0x8] sm:$0xff] %v5020_v41  ;;  %v5185_v47 = vperm.slane %v862_v48, 0  ;;  %v881_v41 = vmul.f32 %v879_v43, %v4842_v16  ;;  %v5211_v48 = vmul.f32 %v879_v43, %v6848_v61  ;;  %2490 = vmatpush.msra.mxu2 %v5034_v13 }
 0x2a3   : > { %647 = vst [vmem:[%s5163_s10 + $0x48] sm:$0xff] %v5029_v53  ;;  %v882_v53 = vmul.f32 %v879_v43, %v4847_v54  ;;  %v896_v24 = vadd.f32 %v880_v32, %v6852_v10  ;;  %v3532_v45 = vpop.eup %3531  ;;  %v6865_v54 = vld [vmem:[#allocation151_spill] sm:$0xff]  ;;  %2471 = vmatpush.msra.mxu1 %v4797_v0 }
 0x2a4   : > { %648 = vst [vmem:[%s5163_s10 + $0x10] sm:$0xff] %v5042_v19  ;;  %v884_v19 = vmul.f32 %v879_v43, %v4857_v31  ;;  %2491 = vmatpush.msra.mxu2 %v4799_v11 }
 0x2a5   : > { %649 = vst [vmem:[%s5163_s10 + $0x50] sm:$0xff] %v5058_v63  ;;  %v6843_v63 = vld [vmem:[#allocation139_spill] sm:$0xff]  ;;  %v898_v22 = vadd.f32 %v882_v53, %v6855_v4  ;;  %v5234_v32 = vpop.eup %3533  ;;  %v6862_v4 = vld [vmem:[#allocation150_spill] sm:$0xff]  ;;  %2472 = vmatpush.msra.mxu1 %v4805_v51 }
 0x2a6   : > { %650 = vst [vmem:[%s5163_s10 + $0x18] sm:$0xff] %v5066_v62  ;;  %v888_v58 = vmul.f32 %v879_v43, %v6843_v63  ;;  %v6847_v62 = vld [vmem:[#allocation143_spill] sm:$0xff]  ;;  %v932_v53 = vmul.f32 %v5185_v47, %v6862_v4  ;;  %vm1175_vm3 = vweird.f32 %v5234_v32  ;;  %2492 = vmatpush.msra.mxu2 %v4807_v42 }
 0x2a7   : > { %651 = vst [vmem:[%s5163_s10 + $0x58] sm:$0xff] %v5079_v49  ;;  %v892_v27 = vmul.f32 %v879_v43, %v6847_v62  ;;  %v6850_v49 = vld [vmem:[#allocation146_spill] sm:$0xff]  ;;  %v6854_v63 = vld [vmem:[#allocation147_spill] sm:$0xff]  ;;  %v6858_v43 = vld [vmem:[#allocation148_spill] sm:$0xff] }
 0x2a8   : > { %652 = vst [vmem:[%s5163_s10 + $0x20] sm:$0xff] %v5087_v17  ;;  %v929_v57 = vmul.f32 %v5185_v47, %v6850_v49  ;;  %v6853_v17 = vld [vmem:[#allocation19_spill] sm:$0xff]  ;;  %v930_v61 = vmul.f32 %v5185_v47, %v6854_v63  ;;  %v899_v49 = vadd.f32 %v883_v55, %v6856_v59  ;;  %v931_v9 = vmul.f32 %v5185_v47, %v6858_v43  ;;  %v2100_v55 = vpop.f32.mrf.mxu3  ;;  %vm5329_vm5 = vmor %vm1174_vm4, %vm1175_vm3 }
 0x2a9   : > { %653 = vst [vmem:[%s5163_s10 + $0x60] sm:$0xff] %v5097_v7  ;;  %v897_v62 = vadd.f32 %v881_v41, %v6853_v17  ;;  %v6857_v7 = vld [vmem:[#allocation25_spill] sm:$0xff]  ;;  %v6859_v41 = vld [vmem:[#allocation27_spill] sm:$0xff] }
 0x2aa   : > { %654 = vst [vmem:[%s5163_s10 + $0x28] sm:$0xff] %v5104_v15  ;;  %v900_v31 = vadd.f32 %v884_v19, %v6857_v7  ;;  %v901_v10 = vadd.f32 %v885_v36, %v6859_v41  ;;  %v6860_v17 = vld [vmem:[#allocation29_spill] sm:$0xff]  ;;  %v6861_v15 = vld [vmem:[#allocation31_spill] sm:$0xff]  ;;  %v5249_v16 = vadd.f32 %v929_v57, %v896_v24  ;;  %v1170_v57 = vmul.f32 %v5234_v32, %v5173_v29 }
 0x2ab   : > { %655 = vst [vmem:[%s5163_s10 + $0x68] sm:$0xff] %v5115_v35  ;;  %v902_v63 = vadd.f32 %v886_v3, %v6860_v17  ;;  %v903_v60 = vadd.f32 %v887_v44, %v6861_v15  ;;  %v6863_v19 = vld [vmem:[#allocation33_spill] sm:$0xff]  ;;  %v6864_v7 = vld [vmem:[#allocation35_spill] sm:$0xff]  ;;  %v933_v35 = vmul.f32 %v5185_v47, %v6865_v54  ;;  %v6867_v44 = vld [vmem:[#allocation154_spill] sm:$0xff]  ;;  %v5266_v24 = vadd.f32 1.0, %v3532_v45 }
 0x2ac   : > { %656 = vst [vmem:[%s5163_s10 + $0x30] sm:$0xff] %v5123_v34  ;;  %v904_v59 = vadd.f32 %v888_v58, %v6863_v19  ;;  %v905_v43 = vadd.f32 %v889_v39, %v6864_v7  ;;  %v6866_v36 = vld [vmem:[#allocation37_spill] sm:$0xff]  ;;  %v934_v41 = vmul.f32 %v5185_v47, %v6867_v44  ;;  %v935_v34 = vmul.f32 %v5185_v47, %v4982_v21 }
 0x2ad   : > { %657 = vst [vmem:[%s5163_s10 + $0x70] sm:$0xff] %v5129_v8  ;;  %v906_v3 = vadd.f32 %v890_v26, %v6866_v36  ;;  %v5258_v58 = vadd.f32 %v930_v61, %v897_v62  ;;  %v5262_v39 = vadd.f32 %v931_v9, %v898_v22  ;;  %v2103_v8 = vmax.f32 %v2100_v55, 0.0  ;;  %v6868_v26 = vld [vmem:[#allocation39_spill] sm:$0xff]  ;;  %v6869_v61 = vld [vmem:[#allocation42_spill] sm:$0xff] }
 0x2ae   : > { %658 = vst [vmem:[%s5163_s10 + $0x38] sm:$0xff] %v5137_v23  ;;  %v907_v62 = vadd.f32 %v891_v37, %v6868_v26  ;;  %v908_v17 = vadd.f32 %v892_v27, %v6869_v61  ;;  %v936_v9 = vmul.f32 %v5185_v47, %v4995_v2  ;;  %v5276_v23 = vadd.f32 %v932_v53, %v899_v49 }
 0x2af   : > { %659 = vst [vmem:[%s5163_s10 + $0x78] sm:$0xff] %v5142_v18  ;;  %v937_v22 = vmul.f32 %v5185_v47, %v5002_v30  ;;  %v5280_v45 = vadd.f32 %v933_v35, %v900_v31  ;;  %v1171_v15 = vsub.f32 1.0, %v1170_v57  ;;  %3331 = vmatmul.msk.f32.vlgmr.msrb.gmra.mxu1 %vm450_vm1, %v2103_v8  ;;  %3332 = vmatmul.msk.f32.vlgmr.msrb.gmra.mxu2 %vm450_vm1, %v2103_v8  ;;  %v1180_v27 = vand.u32 2147483648, %v5173_v29  ;;  %v6870_v31 = vld [vmem:[#allocation157_spill] sm:$0xff] }
 0x2b0   : > { %961 = vst [vmem:[%s5045_s13 + $0x8] sm:$0xff] %v5249_v16  ;;  %v938_v18 = vmul.f32 %v5185_v47, %v5012_v5  ;;  %v5288_v37 = vadd.f32 %v934_v41, %v901_v10  ;;  %3535 = vrcp.f32 %v5266_v24  ;;  %v939_v49 = vmul.f32 %v5185_v47, %v6870_v31  ;;  %2799 = vmatpush.msrb.mxu1 %v4809_v46  ;;  %v6874_v57 = vld [vmem:[#allocation45_spill] sm:$0xff] }
 0x2b1   : > { %962 = vst [vmem:[%s5045_s13 + $0x48] sm:$0xff] %v5258_v58  ;;  %v5298_v53 = vadd.f32 %v935_v34, %v902_v63  ;;  %v1172_v10 = vmul.f32 %v5234_v32, %v1171_v15  ;;  %v940_v55 = vmul.f32 %v5185_v47, %v5038_v38  ;;  %v5306_v19 = vadd.f32 %v936_v9, %v903_v60  ;;  %v6871_v60 = vld [vmem:[#allocation40_spill] sm:$0xff] }
 0x2b2   : > { %963 = vst [vmem:[%s5045_s13 + $0x88] sm:$0xff] %v5262_v39  ;;  %v1178_v7 = vand.u32 2147483647, %v5173_v29  ;;  %v941_v63 = vmul.f32 %v5185_v47, %v5054_v40  ;;  %v5315_v35 = vadd.f32 %v937_v22, %v904_v59  ;;  %v942_v41 = vmul.f32 %v5185_v47, %v6871_v60  ;;  %2819 = vmatpush.msrb.mxu2 %v4813_v50 }
 0x2b3   : > { %964 = vst [vmem:[%s5045_s13 + $0xc8] sm:$0xff] %v5276_v23  ;;  %v1173_v36 = vadd.f32 %v5234_v32, %v1172_v10  ;;  %v5323_v34 = vadd.f32 %v938_v18, %v905_v43  ;;  %v1181_v11 = vor.u32 1.1754944e-38, %v1180_v27  ;;  %v943_v29 = vmul.f32 %v5185_v47, %v5075_v25  ;;  %2800 = vmatpush.msrb.mxu1 %v4818_v52  ;;  %v6879_v27 = vld [vmem:[#allocation132_spill] sm:$0xff]  ;;  %v6880_v10 = vld [vmem:[#allocation133_spill] sm:$0xff] }
 0x2b4   : > { %965 = vst [vmem:[%s5045_s13 + $0x108] sm:$0xff] %v5280_v45  ;;  %v5337_v43 = vadd.f32 %v939_v49, %v906_v3  ;;  %v909_v42 = vadd.f32 %v5211_v48, %v6874_v57  ;;  %v944_v3 = vmul.f32 %v5185_v47, %v5083_v14  ;;  %v5352_v8 = vadd.f32 %v940_v55, %v907_v62  ;;  %v6876_v47 = vld [vmem:[#allocation51_spill] sm:$0xff] }
 0x2b5   : > { %966 = vst [vmem:[%s5045_s13 + $0x148] sm:$0xff] %v5288_v37  ;;  %v1177_v59 = vsel %vm5329_vm5, %v5234_v32, %v1173_v36  ;;  %vm1179_vm6 = vcmp.eq.f32.partialorder %v1178_v7, 8.507059e+37  ;;  %v6875_v32 = vld [vmem:[#allocation48_spill] sm:$0xff]  ;;  %v5358_v26 = vadd.f32 %v941_v63, %v908_v17  ;;  %2820 = vmatpush.msrb.mxu2 %v4820_v33  ;;  %v911_v48 = vadd.f32 %v5221_v6, %v6876_v47  ;;  %v6881_v7 = vld [vmem:[#allocation134_spill] sm:$0xff]  ;;  %v6882_v36 = vld [vmem:[#allocation135_spill] sm:$0xff] }
 0x2b6   : > { %967 = vst [vmem:[%s5045_s13 + $0x188] sm:$0xff] %v5298_v53  ;;  %v5346_v51 = vpop.eup %3535  ;;  %v910_v46 = vadd.f32 %v5214_v28, %v6875_v32  ;;  %v1182_v50 = vsel %vm1179_vm6, %v1181_v11, %v1177_v59  ;;  %v5366_v62 = vadd.f32 %v942_v41, %v909_v42  ;;  %v1192_v33 = vand.u32 2147483647, %v5266_v24  ;;  %v6884_v11 = vld [vmem:[#allocation137_spill] sm:$0xff]  ;;  %v6885_v59 = vld [vmem:[#allocation138_spill] sm:$0xff]  ;;  %v6886_v42 = vld [vmem:[#allocation139_spill] sm:$0xff] }
 0x2b7   : > { %968 = vst [vmem:[%s5045_s13 + $0x1c8] sm:$0xff] %v5306_v19  ;;  %v1184_v61 = vmul.f32 %v5346_v51, %v5266_v24  ;;  %v5376_v17 = vadd.f32 %v944_v3, %v911_v48  ;;  %v1213_v52 = vperm.slane %v1182_v50, 0  ;;  %v1194_v6 = vand.u32 2147483648, %v5266_v24  ;;  %v6887_v3 = vld [vmem:[#allocation140_spill] sm:$0xff] }
 0x2b8   : > { %969 = vst [vmem:[%s5045_s13 + $0x208] sm:$0xff] %v5315_v35  ;;  %v5370_v28 = vadd.f32 %v943_v29, %v910_v46  ;;  %vm1188_vm7 = vweird.f32 %v5266_v24  ;;  %vm1189_vm8 = vweird.f32 %v5346_v51  ;;  %vm5393_vm9 = vcmp.eq.f32.partialorder %v1192_v33, 8.507059e+37  ;;  %v6888_v46 = vld [vmem:[#allocation141_spill] sm:$0xff]  ;;  %v6889_v48 = vld [vmem:[#allocation152_spill] sm:$0xff]  ;;  %v6906_v24 = vld [vmem:[#allocation30_spill] sm:$0xff] }
 0x2b9   : > { %970 = vst [vmem:[%s5045_s13 + $0x248] sm:$0xff] %v5323_v34  ;;  %v1185_v9 = vsub.f32 1.0, %v1184_v61  ;;  %v1214_v22 = vmul.f32 %v1213_v52, %v4837_v1  ;;  %v1195_v18 = vor.u32 1.1754944e-38, %v1194_v6  ;;  %v1215_v49 = vmul.f32 %v1213_v52, %v6879_v27  ;;  %v6883_v1 = vld [vmem:[#allocation136_spill] sm:$0xff]  ;;  %2801 = vmatpush.msrb.mxu1 %v6889_v48  ;;  %v6891_v61 = vld [vmem:[#allocation142_spill] sm:$0xff]  ;;  %v6892_v6 = vld [vmem:[#allocation143_spill] sm:$0xff] }
 0x2ba   : > { %971 = vst [vmem:[%s5045_s13 + $0x288] sm:$0xff] %v5337_v43  ;;  %v1216_v55 = vmul.f32 %v1213_v52, %v6880_v10  ;;  %v1217_v63 = vmul.f32 %v1213_v52, %v6881_v7  ;;  %v1218_v41 = vmul.f32 %v1213_v52, %v6882_v36  ;;  %v1219_v0 = vmul.f32 %v1213_v52, %v6883_v1  ;;  %v6893_v10 = vld [vmem:[#allocation144_spill] sm:$0xff]  ;;  %v6894_v7 = vld [vmem:[#allocation145_spill] sm:$0xff]  ;;  %vm1190_vm10 = vmor %vm1188_vm7, %vm1189_vm8 }
 0x2bb   : > { %972 = vst [vmem:[%s5045_s13 + $0x2c8] sm:$0xff] %v5352_v8  ;;  %v1220_v29 = vmul.f32 %v1213_v52, %v6884_v11  ;;  %v1221_v57 = vmul.f32 %v1213_v52, %v6885_v59  ;;  %v1223_v32 = vmul.f32 %v1213_v52, %v6887_v3  ;;  %v1224_v50 = vmul.f32 %v1213_v52, %v6888_v46  ;;  %v6895_v1 = vld [vmem:[#allocation149_spill] sm:$0xff]  ;;  %v6897_v3 = vld [vmem:[#allocation155_spill] sm:$0xff]  ;;  %v6899_v46 = vld [vmem:[#allocation16_spill] sm:$0xff] }
 0x2bc   : > { %973 = vst [vmem:[%s5045_s13 + $0x308] sm:$0xff] %v5358_v26  ;;  %v1186_v47 = vmul.f32 %v5346_v51, %v1185_v9  ;;  %v1225_v33 = vmul.f32 %v1213_v52, %v6891_v61  ;;  %v1226_v27 = vmul.f32 %v1213_v52, %v6892_v6  ;;  %v1228_v36 = vmul.f32 %v1213_v52, %v6894_v7  ;;  %v6896_v9 = vld [vmem:[#allocation15_spill] sm:$0xff]  ;;  %v6901_v6 = vld [vmem:[#allocation20_spill] sm:$0xff]  ;;  %v6904_v7 = vld [vmem:[#allocation26_spill] sm:$0xff] }
 0x2bd   : > { %974 = vst [vmem:[%s5045_s13 + $0x348] sm:$0xff] %v5366_v62  ;;  %v1229_v11 = vmul.f32 %v1213_v52, %v6895_v1  ;;  %v1230_v59 = vadd.f32 %v1214_v22, %v6896_v9  ;;  %2802 = vmatpush.msrb.mxu1 %v6897_v3  ;;  %v1231_v48 = vadd.f32 %v1215_v49, %v6899_v46  ;;  %v6903_v22 = vld [vmem:[#allocation24_spill] sm:$0xff]  ;;  %v6915_v3 = vld [vmem:[#allocation147_spill] sm:$0xff] }
 0x2be   : > { %975 = vst [vmem:[%s5045_s13 + $0x388] sm:$0xff] %v5370_v28  ;;  %v6907_v1 = vld [vmem:[#allocation32_spill] sm:$0xff] }
 0x2bf   : > { %976 = vst [vmem:[%s5045_s13 + $0x3c8] sm:$0xff] %v5376_v17  ;;  %2803 = vmatpush.msrb.mxu1 %v5008_v20  ;;  %v6909_v20 = vld [vmem:[#allocation36_spill] sm:$0xff] }
 0x2c0   : > { %3197 = vst [vmem:[%s5163_s10 + $0x80] sm:$0xff] %v5249_v16  ;;  %v1222_v16 = vmul.f32 %v1213_v52, %v6886_v42  ;;  %v1187_v42 = vadd.f32 %v5346_v51, %v1186_v47  ;;  %v1235_v47 = vadd.f32 %v1219_v0, %v6903_v22  ;;  %v1241_v9 = vadd.f32 %v1225_v33, %v6909_v20 }
 0x2c1   : > { %3198 = vst [vmem:[%s5163_s10 + $0xc0] sm:$0xff] %v5258_v58  ;;  %v6890_v58 = vld [vmem:[#allocation153_spill] sm:$0xff]  ;;  %2804 = vmatpush.msrb.mxu1 %v5032_v12 }
 0x2c2   : > { %3199 = vst [vmem:[%s5163_s10 + $0x88] sm:$0xff] %v5262_v39  ;;  %2821 = vmatpush.msrb.mxu2 %v6890_v58  ;;  %v1227_v39 = vmul.f32 %v1213_v52, %v6893_v10  ;;  %v6900_v58 = vld [vmem:[#allocation18_spill] sm:$0xff]  ;;  %v1191_v49 = vsel %vm1190_vm10, %v5346_v51, %v1187_v42 }
 0x2c3   : > { %3200 = vst [vmem:[%s5163_s10 + $0xc8] sm:$0xff] %v5276_v23  ;;  %v6898_v23 = vld [vmem:[#allocation156_spill] sm:$0xff]  ;;  %v1232_v61 = vadd.f32 %v1216_v55, %v6900_v58  ;;  %v6902_v10 = vld [vmem:[#allocation22_spill] sm:$0xff]  ;;  %v1196_v0 = vsel %vm5393_vm9, %v1195_v18, %v1191_v49 }
 0x2c4   : > { %3201 = vst [vmem:[%s5163_s10 + $0x90] sm:$0xff] %v5280_v45  ;;  %2822 = vmatpush.msrb.mxu2 %v6898_v23  ;;  %v1233_v45 = vadd.f32 %v1217_v63, %v6901_v6  ;;  %v1234_v52 = vadd.f32 %v1218_v41, %v6902_v10  ;;  %v6905_v55 = vld [vmem:[#allocation28_spill] sm:$0xff]  ;;  %v1238_v41 = vadd.f32 %v1222_v16, %v6906_v24  ;;  %v6911_v16 = vld [vmem:[#allocation41_spill] sm:$0xff] }
 0x2c5   : > { %3202 = vst [vmem:[%s5163_s10 + $0xd0] sm:$0xff] %v5288_v37  ;;  %v1236_v37 = vadd.f32 %v1220_v29, %v6904_v7  ;;  %v1237_v63 = vadd.f32 %v1221_v57, %v6905_v55  ;;  %v6908_v29 = vld [vmem:[#allocation34_spill] sm:$0xff]  ;;  %v1243_v15 = vadd.f32 %v1227_v39, %v6911_v16  ;;  %v6912_v18 = vld [vmem:[#allocation44_spill] sm:$0xff]  ;;  %v2774_v7 = vld [vmem:[#allocation7 + $0x10] sm:$0xff] }
 0x2c6   : > { %3203 = vst [vmem:[%s5163_s10 + $0x98] sm:$0xff] %v5298_v53  ;;  %2823 = vmatpush.msrb.mxu2 %v5010_v56  ;;  %v1239_v53 = vadd.f32 %v1223_v32, %v6907_v1  ;;  %v1240_v51 = vadd.f32 %v1224_v50, %v6908_v29  ;;  %v1262_v56 = vperm.slane %v1196_v0, 0  ;;  %v1244_v32 = vadd.f32 %v1228_v36, %v6912_v18  ;;  %v6914_v50 = vld [vmem:[#allocation146_spill] sm:$0xff]  ;;  %v6916_v23 = vld [vmem:[#allocation148_spill] sm:$0xff] }
 0x2c7   : > { %3204 = vst [vmem:[%s5163_s10 + $0xd8] sm:$0xff] %v5306_v19  ;;  %v6910_v19 = vld [vmem:[#allocation38_spill] sm:$0xff]  ;;  %2805 = vmatpush.msrb.mxu1 %v2774_v7  ;;  %v3578_v1 = vld [vmem:[#allocation7 + $0x8] sm:$0xff]  ;;  %v5626_v7 = vld [vmem:[#allocation5 + $0x30] sm:$0xff] }
 0x2c8   : > { %3205 = vst [vmem:[%s5163_s10 + $0xa0] sm:$0xff] %v5315_v35  ;;  %2824 = vmatpush.msrb.mxu2 %v5034_v13  ;;  %v1242_v57 = vadd.f32 %v1226_v27, %v6910_v19  ;;  %v6913_v35 = vld [vmem:[#allocation47_spill] sm:$0xff]  ;;  %v1263_v33 = vmul.f32 %v1262_v56, %v6914_v50  ;;  %v1264_v12 = vmul.f32 %v1262_v56, %v6915_v3 }
 0x2c9   : > { %3206 = vst [vmem:[%s5163_s10 + $0xe0] sm:$0xff] %v5323_v34  ;;  %v1245_v42 = vadd.f32 %v1229_v11, %v6913_v35  ;;  %v1265_v13 = vmul.f32 %v1262_v56, %v6916_v23  ;;  %v1266_v46 = vmul.f32 %v1262_v56, %v6862_v4  ;;  %v1267_v34 = vmul.f32 %v1262_v56, %v6865_v54 }
 0x2ca   : > { %3207 = vst [vmem:[%s5163_s10 + $0xa8] sm:$0xff] %v5337_v43  ;;  %v1268_v27 = vmul.f32 %v1262_v56, %v6867_v44  ;;  %v1269_v39 = vmul.f32 %v1262_v56, %v4982_v21  ;;  %v1270_v36 = vmul.f32 %v1262_v56, %v4995_v2  ;;  %v1271_v43 = vmul.f32 %v1262_v56, %v5002_v30 }
 0x2cb   : > { %3208 = vst [vmem:[%s5163_s10 + $0xe8] sm:$0xff] %v5352_v8  ;;  %v1272_v11 = vmul.f32 %v1262_v56, %v5012_v5  ;;  %v1273_v4 = vmul.f32 %v1262_v56, %v6870_v31  ;;  %v1274_v58 = vmul.f32 %v1262_v56, %v5038_v38  ;;  %v1275_v54 = vmul.f32 %v1262_v56, %v5054_v40 }
 0x2cc   : > { %3209 = vst [vmem:[%s5163_s10 + $0xb0] sm:$0xff] %v5358_v26  ;;  %v1276_v44 = vmul.f32 %v1262_v56, %v6871_v60  ;;  %v1277_v21 = vmul.f32 %v1262_v56, %v5075_v25  ;;  %v1278_v2 = vmul.f32 %v1262_v56, %v5083_v14  ;;  %v1279_v30 = vadd.f32 %v1263_v33, %v1230_v59 }
 0x2cd   : > { %3210 = vst [vmem:[%s5163_s10 + $0xf0] sm:$0xff] %v5366_v62  ;;  %v1280_v8 = vadd.f32 %v1264_v12, %v1231_v48  ;;  %v1281_v5 = vadd.f32 %v1265_v13, %v1232_v61  ;;  %v1282_v31 = vadd.f32 %v1266_v46, %v1233_v45  ;;  %v1283_v38 = vadd.f32 %v1267_v34, %v1234_v52  ;;  %v5532_v13 = vld [vmem:[%s6498_s1] sm:$0xff]  ;;  %v5537_v46 = vld [vmem:[%s6498_s1 + $0x8] sm:$0xff]  ;;  %v5542_v34 = vld [vmem:[%s6498_s1 + $0x10] sm:$0xff] }
 0x2ce   : > { %3211 = vst [vmem:[%s5163_s10 + $0xb8] sm:$0xff] %v5370_v28  ;;  %v1284_v40 = vadd.f32 %v1268_v27, %v1235_v47  ;;  %v1285_v60 = vadd.f32 %v1269_v39, %v1236_v37  ;;  %v1286_v25 = vadd.f32 %v1270_v36, %v1237_v63  ;;  %v1287_v14 = vadd.f32 %v1271_v43, %v1238_v41  ;;  %v2775_v37 = vld [vmem:[#allocation7 + $0x18] sm:$0xff]  ;;  %v3577_v41 = vld [vmem:[#allocation7] sm:$0xff] }
 0x2cf   : > { %3212 = vst [vmem:[%s5163_s10 + $0xf8] sm:$0xff] %v5376_v17  ;;  %v1288_v26 = vadd.f32 %v1272_v11, %v1239_v53  ;;  %v1289_v62 = vadd.f32 %v1273_v4, %v1240_v51  ;;  %v1290_v28 = vadd.f32 %v1274_v58, %v1241_v9  ;;  %v1291_v59 = vadd.f32 %v1275_v54, %v1242_v57  ;;  %v5549_v36 = vld [vmem:[%s6498_s1 + $0x18] sm:$0xff]  ;;  %v5554_v43 = vld [vmem:[%s6498_s1 + $0x20] sm:$0xff]  ;;  %v5559_v4 = vld [vmem:[%s6498_s1 + $0x28] sm:$0xff] }
 0x2d0   : > { %1295 = vst [vmem:[%s5045_s13 + $0x10] sm:$0xff] %v1279_v30  ;;  %v1292_v17 = vadd.f32 %v1276_v44, %v1243_v15  ;;  %v1293_v48 = vadd.f32 %v1277_v21, %v1244_v32  ;;  %v1294_v61 = vadd.f32 %v1278_v2, %v1245_v42  ;;  %2825 = vmatpush.msrb.mxu2 %v2775_v37  ;;  %v5564_v58 = vld [vmem:[%s6498_s1 + $0x30] sm:$0xff]  ;;  %v5569_v54 = vld [vmem:[%s6498_s1 + $0x38] sm:$0xff]  ;;  %v5571_v2 = vld [vmem:[#allocation5] sm:$0xff] }
 0x2d1   : > { %1296 = vst [vmem:[%s5045_s13 + $0x50] sm:$0xff] %v1280_v8  ;;  %2806 = vmatpush.msrb.mxu1 %v3577_v41 }
 0x2d2   : > { %1297 = vst [vmem:[%s5045_s13 + $0x90] sm:$0xff] %v1281_v5  ;;  %2826 = vmatpush.msrb.mxu2 %v3578_v1  ;;  %v6920_v1 = vld [vmem:[#allocation61_spill] sm:$0xff] }
 0x2d3   : > { %1298 = vst [vmem:[%s5045_s13 + $0xd0] sm:$0xff] %v1282_v31 }
 0x2d4   : > { %1299 = vst [vmem:[%s5045_s13 + $0x110] sm:$0xff] %v1283_v38 }
 0x2d5   : > { %1300 = vst [vmem:[%s5045_s13 + $0x150] sm:$0xff] %v1284_v40 }
 0x2d6   : > { %1301 = vst [vmem:[%s5045_s13 + $0x190] sm:$0xff] %v1285_v60 }
 0x2d7   : > { %1302 = vst [vmem:[%s5045_s13 + $0x1d0] sm:$0xff] %v1286_v25 }
 0x2d8   : > { %1303 = vst [vmem:[%s5045_s13 + $0x210] sm:$0xff] %v1287_v14 }
 0x2d9   : > { %1304 = vst [vmem:[%s5045_s13 + $0x250] sm:$0xff] %v1288_v26 }
 0x2da   : > { %1305 = vst [vmem:[%s5045_s13 + $0x290] sm:$0xff] %v1289_v62 }
 0x2db   : > { %1306 = vst [vmem:[%s5045_s13 + $0x2d0] sm:$0xff] %v1290_v28 }
 0x2dc   : > { %1307 = vst [vmem:[%s5045_s13 + $0x310] sm:$0xff] %v1291_v59 }
 0x2dd   : > { %1308 = vst [vmem:[%s5045_s13 + $0x350] sm:$0xff] %v1292_v17 }
 0x2de   : > { %1309 = vst [vmem:[%s5045_s13 + $0x390] sm:$0xff] %v1293_v48 }
 0x2df   : > { %1310 = vst [vmem:[%s5045_s13 + $0x3d0] sm:$0xff] %v1294_v61 }
 0x2e0   : > { %3231 = vst [vmem:[%s5163_s10 + $0x100] sm:$0xff] %v1279_v30  ;;  %v5573_v30 = vld [vmem:[#allocation5 + $0x8] sm:$0xff] }
 0x2e1   : > { %3232 = vst [vmem:[%s5163_s10 + $0x140] sm:$0xff] %v1280_v8  ;;  %v5575_v8 = vld [vmem:[#allocation5 + $0x10] sm:$0xff] }
 0x2e2   : > { %3233 = vst [vmem:[%s5163_s10 + $0x108] sm:$0xff] %v1281_v5  ;;  %v5580_v5 = vld [vmem:[%s6498_s1 + $0x40] sm:$0xff] }
 0x2e3   : > { %v2434_v6 = vpop.f32.mrf.mxu0  ;;  %3234 = vst [vmem:[%s5163_s10 + $0x148] sm:$0xff] %v1282_v31  ;;  %v5585_v31 = vld [vmem:[%s6498_s1 + $0x48] sm:$0xff] }
 0x2e4   : > { %v2437_v45 = vmax.f32 %v2434_v6, 0.0  ;;  %3235 = vst [vmem:[%s5163_s10 + $0x110] sm:$0xff] %v1283_v38 }
 0x2e5   : > { %3236 = vst [vmem:[%s5163_s10 + $0x150] sm:$0xff] %v1284_v40 }
 0x2e6   : > { %3365 = vmatmul.msk.f32.vlgmr.msra.gmra.mxu1 %vm450_vm1, %v2437_v45  ;;  %3366 = vmatmul.msk.f32.vlgmr.msra.gmra.mxu2 %vm450_vm1, %v2437_v45  ;;  %3237 = vst [vmem:[%s5163_s10 + $0x118] sm:$0xff] %v1285_v60 }
 0x2e7   : > { %3238 = vst [vmem:[%s5163_s10 + $0x158] sm:$0xff] %v1286_v25  ;;  %v5593_v25 = vld [vmem:[#allocation5 + $0x18] sm:$0xff] }
 0x2e8   : > { %3239 = vst [vmem:[%s5163_s10 + $0x120] sm:$0xff] %v1287_v14  ;;  %v2768_v47 = vpop.f32.mrf.mxu3 }
 0x2e9   : > { %3240 = vst [vmem:[%s5163_s10 + $0x160] sm:$0xff] %v1288_v26  ;;  %v2771_v63 = vmax.f32 %v2768_v47, 0.0 }
 0x2ea   : > { %3241 = vst [vmem:[%s5163_s10 + $0x128] sm:$0xff] %v1289_v62  ;;  %v1472_v10 = vpop.f32.mrf.mxu1 }
 0x2eb   : > { %3242 = vst [vmem:[%s5163_s10 + $0x168] sm:$0xff] %v1290_v28  ;;  %v1495_v52 = vsub.f32 0.0, %v1472_v10 }
 0x2ec   : > { %3243 = vst [vmem:[%s5163_s10 + $0x130] sm:$0xff] %v1291_v59  ;;  %v5603_v59 = vld [vmem:[#allocation5 + $0x20] sm:$0xff] }
 0x2ed   : > { %3244 = vst [vmem:[%s5163_s10 + $0x170] sm:$0xff] %v1292_v17  ;;  %v1497_v22 = vmul.f32 1.442695, %v1495_v52  ;;  %v5608_v17 = vld [vmem:[%s6498_s1 + $0x50] sm:$0xff] }
 0x2ee   : > { %3245 = vst [vmem:[%s5163_s10 + $0x138] sm:$0xff] %v1293_v48  ;;  %3399 = vmatmul.msk.f32.vlgmr.msrb.gmra.mxu1 %vm450_vm1, %v2771_v63  ;;  %3400 = vmatmul.msk.f32.vlgmr.msrb.gmra.mxu2 %vm450_vm1, %v2771_v63 }
 0x2ef   : > { %3246 = vst [vmem:[%s5163_s10 + $0x178] sm:$0xff] %v1294_v61  ;;  %3537 = vpow2.f32 %v1497_v22  ;;  %v5612_v61 = vld [vmem:[#allocation5 + $0x28] sm:$0xff] }
 0x2f0   : > { %v1492_v49 = vpop.f32.mrf.mxu2 }
 0x2f1   : > { %v1496_v55 = vsub.f32 0.0, %v1492_v49  ;;  %v5633_v49 = vld [vmem:[%s6498_s1 + $0x58] sm:$0xff] }
 0x2f2   : > { %6917 = vst [vmem:[#allocation43_spill] sm:$0xff] %v5633_v49 }
 0x2f3   : > { %v1499_v53 = vmul.f32 1.442695, %v1496_v55  ;;  %v6918_v55 = vld [vmem:[#allocation55_spill] sm:$0xff] }
 0x2f5   : > { %v3538_v24 = vpop.eup %3537  ;;  %3539 = vpow2.f32 %v1499_v53 }
 0x2f6   : > { %v1501_v0 = vadd.f32 1.0, %v3538_v24  ;;  %v6919_v24 = vld [vmem:[#allocation58_spill] sm:$0xff] }
 0x2f8   : > { %3541 = vrcp.f32 %v1501_v0  ;;  %v1514_v18 = vand.u32 2147483648, %v1501_v0  ;;  %vm1508_vm12 = vweird.f32 %v1501_v0  ;;  %v1512_v32 = vand.u32 2147483647, %v1501_v0 }
 0x2fa   : > { %v1515_v50 = vor.u32 1.1754944e-38, %v1514_v18  ;;  %vm1513_vm1 = vcmp.eq.f32.partialorder %v1512_v32, 8.507059e+37  ;;  %v5658_v18 = vld [vmem:[%s6498_s1 + $0x68] sm:$0xff] }
 0x2fb   : > { %v3540_v29 = vpop.eup %3539  ;;  %v5660_v32 = vld [vmem:[#allocation5 + $0x48] sm:$0xff] }
 0x2fc   : > { %v1502_v20 = vadd.f32 1.0, %v3540_v29 }
 0x2fe   : > { %v3542_v51 = vpop.eup %3541  ;;  %3543 = vrcp.f32 %v1502_v20  ;;  %v1528_v3 = vand.u32 2147483648, %v1502_v20  ;;  %v1526_v23 = vand.u32 2147483647, %v1502_v20  ;;  %vm1522_vm15 = vweird.f32 %v1502_v20 }
 0x2ff   : > { %v1504_v9 = vmul.f32 %v3542_v51, %v1501_v0  ;;  %vm1509_vm11 = vweird.f32 %v3542_v51  ;;  %v5638_v0 = vld [vmem:[#allocation5 + $0x38] sm:$0xff] }
 0x300   : > { %vm1510_vm13 = vmor %vm1508_vm12, %vm1509_vm11  ;;  %v1529_v11 = vor.u32 1.1754944e-38, %v1528_v3  ;;  %vm1527_vm2 = vcmp.eq.f32.partialorder %v1526_v23, 8.507059e+37 }
 0x301   : > { %v1505_v56 = vsub.f32 1.0, %v1504_v9  ;;  %v6921_v9 = vld [vmem:[#allocation64_spill] sm:$0xff] }
 0x303   : > { %v1506_v19 = vmul.f32 %v3542_v51, %v1505_v56 }
 0x304   : > { %v3544_v57 = vpop.eup %3543 }
 0x305   : > { %v1507_v16 = vadd.f32 %v3542_v51, %v1506_v19  ;;  %v1518_v15 = vmul.f32 %v3544_v57, %v1502_v20  ;;  %vm1523_vm14 = vweird.f32 %v3544_v57  ;;  %v6922_v19 = vld [vmem:[#allocation67_spill] sm:$0xff] }
 0x306   : > { %vm1524_vm0 = vmor %vm1522_vm15, %vm1523_vm14 }
 0x307   : > { %v1511_v35 = vsel %vm1510_vm13, %v3542_v51, %v1507_v16  ;;  %v1519_v42 = vsub.f32 1.0, %v1518_v15  ;;  %v5645_v51 = vld [vmem:[%s6498_s1 + $0x60] sm:$0xff] }
 0x308   : > { %v1516_v33 = vsel %vm1513_vm1, %v1515_v50, %v1511_v35  ;;  %v5651_v16 = vld [vmem:[#allocation5 + $0x40] sm:$0xff] }
 0x309   : > { %v1520_v12 = vmul.f32 %v3544_v57, %v1519_v42  ;;  %v5544_v27 = vperm.slane %v1516_v33, 0 }
 0x30b   : > { %v1521_v39 = vadd.f32 %v3544_v57, %v1520_v12  ;;  %v1548_v38 = vmul.f32 %v5544_v27, %v5532_v13  ;;  %v1549_v40 = vmul.f32 %v5544_v27, %v5537_v46  ;;  %v1550_v60 = vmul.f32 %v5544_v27, %v5542_v34  ;;  %v6923_v12 = vld [vmem:[#allocation70_spill] sm:$0xff] }
 0x30c   : > { %v1551_v26 = vmul.f32 %v5544_v27, %v5549_v36  ;;  %v1552_v62 = vmul.f32 %v5544_v27, %v5554_v43  ;;  %v1553_v28 = vmul.f32 %v5544_v27, %v5559_v4  ;;  %v1554_v48 = vmul.f32 %v5544_v27, %v5564_v58 }
 0x30d   : > { %v1525_v44 = vsel %vm1524_vm0, %v3544_v57, %v1521_v39  ;;  %v1555_v52 = vmul.f32 %v5544_v27, %v5569_v54  ;;  %v1556_v22 = vmul.f32 %v5544_v27, %v5580_v5  ;;  %v1557_v47 = vmul.f32 %v5544_v27, %v5585_v31  ;;  %v5673_v39 = vld [vmem:[#allocation5 + $0x50] sm:$0xff] }
 0x30e   : > { %v1530_v21 = vsel %vm1527_vm2, %v1529_v11, %v1525_v44  ;;  %v1564_v63 = vadd.f32 %v1548_v38, %v6918_v55  ;;  %v1565_v41 = vadd.f32 %v1549_v40, %v6919_v24  ;;  %v1566_v53 = vadd.f32 %v1550_v60, %v6920_v1  ;;  %6924 = vst [vmem:[#allocation46_spill] sm:$0xff] %v5673_v39  ;;  %v5682_v38 = vld [vmem:[%s6498_s1 + $0x70] sm:$0xff]  ;;  %v5698_v55 = vld [vmem:[#allocation5 + $0x60] sm:$0xff]  ;;  %v5709_v24 = vld [vmem:[%s6498_s1 + $0x78] sm:$0xff] }
 0x30f   : > { %v5595_v14 = vperm.slane %v1530_v21, 0  ;;  %v1558_v20 = vmul.f32 %v5544_v27, %v5608_v17  ;;  %v1567_v56 = vadd.f32 %v1551_v26, %v6921_v9  ;;  %v1568_v57 = vadd.f32 %v1552_v62, %v6922_v19  ;;  %v1806_v21 = vpop.f32.mrf.mxu1  ;;  %6925 = vst [vmem:[#allocation49_spill] sm:$0xff] %v5682_v38  ;;  %v6926_v60 = vld [vmem:[#allocation73_spill] sm:$0xff]  ;;  %v5687_v62 = vld [vmem:[#allocation5 + $0x58] sm:$0xff] }
 0x310   : > { %v1559_v3 = vmul.f32 %v5544_v27, %v5633_v49  ;;  %v1569_v23 = vadd.f32 %v1553_v28, %v6923_v12  ;;  %v1560_v40 = vmul.f32 %v5544_v27, %v5645_v51  ;;  %v1570_v26 = vadd.f32 %v1554_v48, %v6926_v60  ;;  %6927 = vst [vmem:[#allocation52_spill] sm:$0xff] %v5687_v62  ;;  %v6932_v19 = vld [vmem:[#allocation82_spill] sm:$0xff] }
 0x311   : > { %v1597_v6 = vmul.f32 %v5595_v14, %v5571_v2  ;;  %v1598_v45 = vmul.f32 %v5595_v14, %v5573_v30  ;;  %v1599_v10 = vmul.f32 %v5595_v14, %v5575_v8  ;;  %v1600_v37 = vmul.f32 %v5595_v14, %v5593_v25  ;;  %6929 = vst [vmem:[#allocation17_spill] sm:$0xff] %v5698_v55  ;;  %v5728_v60 = vld [vmem:[#allocation5 + $0x78] sm:$0xff] }
 0x312   : > { %v1601_v29 = vmul.f32 %v5595_v14, %v5603_v59  ;;  %v1602_v15 = vmul.f32 %v5595_v14, %v5612_v61  ;;  %v1603_v35 = vmul.f32 %v5595_v14, %v5626_v7  ;;  %v1604_v11 = vmul.f32 %v5595_v14, %v5638_v0  ;;  %6930 = vst [vmem:[#allocation19_spill] sm:$0xff] %v5709_v24 }
 0x313   : > { %v5664_v42 = vadd.f32 %v1597_v6, %v1564_v63  ;;  %v5666_v50 = vadd.f32 %v1598_v45, %v1565_v41  ;;  %v5668_v33 = vadd.f32 %v1599_v10, %v1566_v53  ;;  %v5677_v44 = vadd.f32 %v1600_v37, %v1567_v56  ;;  %v6928_v10 = vld [vmem:[#allocation76_spill] sm:$0xff]  ;;  %v6931_v41 = vld [vmem:[#allocation79_spill] sm:$0xff] }
 0x314   : > { %v1605_v28 = vmul.f32 %v5595_v14, %v5651_v16  ;;  %v5691_v6 = vadd.f32 %v1601_v29, %v1568_v57  ;;  %v1561_v45 = vmul.f32 %v5544_v27, %v5658_v18  ;;  %v1571_v37 = vadd.f32 %v1555_v52, %v6928_v10  ;;  %v5712_v53 = vld [vmem:[#allocation5 + $0x68] sm:$0xff] }
 0x315   : > { %1629 = vst [vmem:[%s5045_s13 + $0x18] sm:$0xff] %v5664_v42  ;;  %v1606_v48 = vmul.f32 %v5595_v14, %v5660_v32  ;;  %v5702_v63 = vadd.f32 %v1602_v15, %v1569_v23  ;;  %v1572_v1 = vadd.f32 %v1556_v22, %v6931_v41  ;;  %v1607_v52 = vmul.f32 %v5595_v14, %v5673_v39  ;;  %v5721_v15 = vld [vmem:[#allocation5 + $0x70] sm:$0xff]  ;;  %v6935_v41 = vld [vmem:[#allocation88_spill] sm:$0xff] }
 0x316   : > { %1630 = vst [vmem:[%s5045_s13 + $0x58] sm:$0xff] %v5666_v50  ;;  %v1619_v29 = vadd.f32 %v1603_v35, %v1570_v26  ;;  %v1829_v9 = vsub.f32 0.0, %v1806_v21  ;;  %v1562_v56 = vmul.f32 %v5544_v27, %v5682_v38  ;;  %v1573_v57 = vadd.f32 %v1557_v47, %v6932_v19  ;;  %v6934_v23 = vld [vmem:[#allocation85_spill] sm:$0xff]  ;;  %v6936_v19 = vld [vmem:[#allocation91_spill] sm:$0xff] }
 0x317   : > { %1631 = vst [vmem:[%s5045_s13 + $0x98] sm:$0xff] %v5668_v33  ;;  %v1608_v22 = vmul.f32 %v5595_v14, %v5687_v62  ;;  %v1620_v12 = vadd.f32 %v1604_v11, %v1571_v37  ;;  %v1574_v35 = vadd.f32 %v1558_v20, %v6934_v23  ;;  %v1609_v21 = vmul.f32 %v5595_v14, %v5698_v55 }
 0x318   : > { %6933 = vst [vmem:[#allocation21_spill] sm:$0xff] %v5721_v15  ;;  %v1621_v26 = vadd.f32 %v1605_v28, %v1572_v1  ;;  %v1831_v47 = vmul.f32 1.442695, %v1829_v9  ;;  %v1563_v10 = vmul.f32 %v5544_v27, %v5709_v24  ;;  %v1575_v11 = vadd.f32 %v1559_v3, %v6935_v41  ;;  %v1826_v27 = vpop.f32.mrf.mxu2  ;;  %v6937_v9 = vld [vmem:[#allocation94_spill] sm:$0xff] }
 0x319   : > { %1632 = vst [vmem:[%s5045_s13 + $0xd8] sm:$0xff] %v5677_v44  ;;  %v1610_v37 = vmul.f32 %v5595_v14, %v5712_v53  ;;  %v1622_v20 = vadd.f32 %v1606_v48, %v1573_v57  ;;  %v1576_v23 = vadd.f32 %v1560_v40, %v6936_v19  ;;  %v1611_v28 = vmul.f32 %v5595_v14, %v5721_v15  ;;  %v6938_v57 = vld [vmem:[#allocation96_spill] sm:$0xff] }
 0x31a   : > { %1633 = vst [vmem:[%s5045_s13 + $0x118] sm:$0xff] %v5691_v6  ;;  %v1623_v1 = vadd.f32 %v1607_v52, %v1574_v35  ;;  %3545 = vpow2.f32 %v1831_v47  ;;  %v1577_v3 = vadd.f32 %v1561_v45, %v6937_v9  ;;  %v1612_v41 = vmul.f32 %v5595_v14, %v5728_v60  ;;  %v6939_v52 = vld [vmem:[#allocation99_spill] sm:$0xff] }
 0x31b   : > { %1634 = vst [vmem:[%s5045_s13 + $0x158] sm:$0xff] %v5702_v63  ;;  %v1624_v48 = vadd.f32 %v1608_v22, %v1575_v11  ;;  %v1830_v40 = vsub.f32 0.0, %v1826_v27  ;;  %v1578_v19 = vadd.f32 %v1562_v56, %v6938_v57  ;;  %v1625_v15 = vadd.f32 %v1609_v21, %v1576_v23 }
 0x31c   : > { %1635 = vst [vmem:[%s5045_s13 + $0x198] sm:$0xff] %v1619_v29  ;;  %v1579_v35 = vadd.f32 %v1563_v10, %v6939_v52  ;;  %v1626_v47 = vadd.f32 %v1610_v37, %v1577_v3 }
 0x31d   : > { %1636 = vst [vmem:[%s5045_s13 + $0x1d8] sm:$0xff] %v1620_v12  ;;  %v1833_v45 = vmul.f32 1.442695, %v1830_v40  ;;  %v1627_v9 = vadd.f32 %v1611_v28, %v1578_v19 }
 0x31e   : > { %1637 = vst [vmem:[%s5045_s13 + $0x218] sm:$0xff] %v1621_v26  ;;  %v1628_v14 = vadd.f32 %v1612_v41, %v1579_v35 }
 0x31f   : > { %1638 = vst [vmem:[%s5045_s13 + $0x258] sm:$0xff] %v1622_v20  ;;  %3547 = vpow2.f32 %v1833_v45 }
 0x320   : > { %1639 = vst [vmem:[%s5045_s13 + $0x298] sm:$0xff] %v1623_v1  ;;  %v3546_v56 = vpop.eup %3545 }
 0x321   : > { %1640 = vst [vmem:[%s5045_s13 + $0x2d8] sm:$0xff] %v1624_v48  ;;  %v1835_v22 = vadd.f32 1.0, %v3546_v56 }
 0x322   : > { %1641 = vst [vmem:[%s5045_s13 + $0x318] sm:$0xff] %v1625_v15 }
 0x323   : > { %1642 = vst [vmem:[%s5045_s13 + $0x358] sm:$0xff] %v1626_v47  ;;  %3549 = vrcp.f32 %v1835_v22  ;;  %v1848_v41 = vand.u32 2147483648, %v1835_v22  ;;  %vm1842_vm4 = vweird.f32 %v1835_v22 }
 0x324   : > { %1643 = vst [vmem:[%s5045_s13 + $0x398] sm:$0xff] %v1627_v9 }
 0x325   : > { %1644 = vst [vmem:[%s5045_s13 + $0x3d8] sm:$0xff] %v1628_v14  ;;  %v3548_v10 = vpop.eup %3547 }
 0x326   : > { %3265 = vst [vmem:[%s5163_s10 + $0x180] sm:$0xff] %v5664_v42  ;;  %v1836_v11 = vadd.f32 1.0, %v3548_v10 }
 0x327   : > { %3266 = vst [vmem:[%s5163_s10 + $0x1c0] sm:$0xff] %v5666_v50 }
 0x328   : > { %3267 = vst [vmem:[%s5163_s10 + $0x188] sm:$0xff] %v5668_v33  ;;  %3551 = vrcp.f32 %v1836_v11  ;;  %v1862_v19 = vand.u32 2147483648, %v1836_v11  ;;  %v1860_v35 = vand.u32 2147483647, %v1836_v11  ;;  %vm1856_vm8 = vweird.f32 %v1836_v11 }
 0x329   : > { %3268 = vst [vmem:[%s5163_s10 + $0x1c8] sm:$0xff] %v5677_v44  ;;  %v3550_v23 = vpop.eup %3549 }
 0x32a   : > { %3269 = vst [vmem:[%s5163_s10 + $0x190] sm:$0xff] %v5691_v6  ;;  %v1838_v42 = vmul.f32 %v3550_v23, %v1835_v22  ;;  %vm1843_vm3 = vweird.f32 %v3550_v23  ;;  %vm1861_vm10 = vcmp.eq.f32.partialorder %v1860_v35, 8.507059e+37 }
 0x32b   : > { %3270 = vst [vmem:[%s5163_s10 + $0x1d0] sm:$0xff] %v5702_v63  ;;  %vm1844_vm5 = vmor %vm1842_vm4, %vm1843_vm3 }
 0x32c   : > { %v2140_v21 = vpop.f32.mrf.mxu1  ;;  %3271 = vst [vmem:[%s5163_s10 + $0x198] sm:$0xff] %v1619_v29  ;;  %v1839_v33 = vsub.f32 1.0, %v1838_v42 }
 0x32d   : > { %v2163_v37 = vsub.f32 0.0, %v2140_v21  ;;  %3272 = vst [vmem:[%s5163_s10 + $0x1d8] sm:$0xff] %v1620_v12 }
 0x32e   : > { %3273 = vst [vmem:[%s5163_s10 + $0x1a0] sm:$0xff] %v1621_v26  ;;  %v3552_v27 = vpop.eup %3551  ;;  %v1840_v6 = vmul.f32 %v3550_v23, %v1839_v33  ;;  %v1846_v26 = vand.u32 2147483647, %v1835_v22 }
 0x32f   : > { %v2165_v50 = vmul.f32 1.442695, %v2163_v37  ;;  %3274 = vst [vmem:[%s5163_s10 + $0x1e0] sm:$0xff] %v1622_v20  ;;  %v1852_v3 = vmul.f32 %v3552_v27, %v1836_v11  ;;  %vm1857_vm7 = vweird.f32 %v3552_v27 }
 0x330   : > { %3275 = vst [vmem:[%s5163_s10 + $0x1a8] sm:$0xff] %v1623_v1  ;;  %v1841_v63 = vadd.f32 %v3550_v23, %v1840_v6  ;;  %v1849_v1 = vor.u32 1.1754944e-38, %v1848_v41  ;;  %vm1847_vm6 = vcmp.eq.f32.partialorder %v1846_v26, 8.507059e+37  ;;  %vm1858_vm9 = vmor %vm1856_vm8, %vm1857_vm7 }
 0x331   : > { %3553 = vpow2.f32 %v2165_v50  ;;  %3276 = vst [vmem:[%s5163_s10 + $0x1e8] sm:$0xff] %v1624_v48  ;;  %v1853_v12 = vsub.f32 1.0, %v1852_v3 }
 0x332   : > { %v2160_v28 = vpop.f32.mrf.mxu2  ;;  %3277 = vst [vmem:[%s5163_s10 + $0x1b0] sm:$0xff] %v1625_v15  ;;  %v1845_v40 = vsel %vm1844_vm5, %v3550_v23, %v1841_v63 }
 0x333   : > { %v2164_v44 = vsub.f32 0.0, %v2160_v28  ;;  %3278 = vst [vmem:[%s5163_s10 + $0x1f0] sm:$0xff] %v1626_v47  ;;  %v1854_v57 = vmul.f32 %v3552_v27, %v1853_v12  ;;  %v1850_v15 = vsel %vm1847_vm6, %v1849_v1, %v1845_v40  ;;  %v6940_v12 = vld [vmem:[#allocation54_spill] sm:$0xff]  ;;  %v6941_v40 = vld [vmem:[#allocation57_spill] sm:$0xff] }
 0x334   : > { %3279 = vst [vmem:[%s5163_s10 + $0x1b8] sm:$0xff] %v1627_v9  ;;  %v5783_v45 = vperm.slane %v1850_v15, 0  ;;  %v1863_v9 = vor.u32 1.1754944e-38, %v1862_v19 }
 0x335   : > { %v2167_v29 = vmul.f32 1.442695, %v2164_v44  ;;  %3280 = vst [vmem:[%s5163_s10 + $0x1f8] sm:$0xff] %v1628_v14  ;;  %v1855_v52 = vadd.f32 %v3552_v27, %v1854_v57  ;;  %v6942_v57 = vld [vmem:[#allocation60_spill] sm:$0xff] }
 0x336   : > { %v1882_v22 = vmul.f32 %v5783_v45, %v5532_v13  ;;  %v1883_v21 = vmul.f32 %v5783_v45, %v5537_v46  ;;  %v1884_v37 = vmul.f32 %v5783_v45, %v5542_v34  ;;  %v1885_v23 = vmul.f32 %v5783_v45, %v5549_v36 }
 0x337   : > { %v3554_v20 = vpop.eup %3553  ;;  %3555 = vpow2.f32 %v2167_v29  ;;  %v1859_v14 = vsel %vm1858_vm9, %v3552_v27, %v1855_v52  ;;  %v1886_v11 = vmul.f32 %v5783_v45, %v5554_v43  ;;  %v1887_v28 = vmul.f32 %v5783_v45, %v5559_v4 }
 0x338   : > { %v5781_v48 = vadd.f32 1.0, %v3554_v20  ;;  %v1864_v10 = vsel %vm1861_vm10, %v1863_v9, %v1859_v14  ;;  %v1888_v33 = vmul.f32 %v5783_v45, %v5564_v58  ;;  %v1889_v44 = vmul.f32 %v5783_v45, %v5569_v54  ;;  %v6944_v14 = vld [vmem:[#allocation66_spill] sm:$0xff] }
 0x339   : > { %v5798_v42 = vperm.slane %v1864_v10, 0  ;;  %v1890_v27 = vmul.f32 %v5783_v45, %v5580_v5  ;;  %v1891_v29 = vmul.f32 %v5783_v45, %v5585_v31  ;;  %v1892_v41 = vmul.f32 %v5783_v45, %v5608_v17 }
 0x33a   : > { %3557 = vrcp.f32 %v5781_v48  ;;  %v1898_v26 = vadd.f32 %v1882_v22, %v6940_v12  ;;  %v1899_v1 = vadd.f32 %v1883_v21, %v6941_v40  ;;  %v1900_v15 = vadd.f32 %v1884_v37, %v6942_v57 }
 0x33b   : > { %v1931_v6 = vmul.f32 %v5798_v42, %v5571_v2  ;;  %v1932_v3 = vmul.f32 %v5798_v42, %v5573_v30  ;;  %v1933_v63 = vmul.f32 %v5798_v42, %v5575_v8  ;;  %v1934_v20 = vmul.f32 %v5798_v42, %v5593_v25 }
 0x33c   : > { %v1935_v19 = vmul.f32 %v5798_v42, %v5603_v59  ;;  %v1893_v35 = vmul.f32 %v5783_v45, %v5633_v49  ;;  %v1902_v22 = vadd.f32 %v1886_v11, %v6944_v14  ;;  %v1936_v10 = vmul.f32 %v5798_v42, %v5612_v61 }
 0x33d   : > { %v3556_v47 = vpop.eup %3555  ;;  %v1937_v21 = vmul.f32 %v5798_v42, %v5626_v7  ;;  %v5838_v37 = vadd.f32 %v1931_v6, %v1898_v26  ;;  %v5840_v12 = vadd.f32 %v1932_v3, %v1899_v1  ;;  %v5842_v40 = vadd.f32 %v1933_v63, %v1900_v15  ;;  %v6946_v6 = vld [vmem:[#allocation72_spill] sm:$0xff]  ;;  %v6947_v15 = vld [vmem:[#allocation75_spill] sm:$0xff] }
 0x33e   : > { %v5786_v56 = vadd.f32 1.0, %v3556_v47  ;;  %v6943_v47 = vld [vmem:[#allocation63_spill] sm:$0xff]  ;;  %v1938_v14 = vmul.f32 %v5798_v42, %v5638_v0  ;;  %v1904_v26 = vadd.f32 %v1888_v33, %v6946_v6  ;;  %v1939_v3 = vmul.f32 %v5798_v42, %v5651_v16  ;;  %v6948_v33 = vld [vmem:[#allocation78_spill] sm:$0xff] }
 0x33f   : > { %v1901_v9 = vadd.f32 %v1885_v23, %v6943_v47  ;;  %v1894_v23 = vmul.f32 %v5783_v45, %v5645_v51  ;;  %v6945_v47 = vld [vmem:[#allocation69_spill] sm:$0xff]  ;;  %v5856_v63 = vadd.f32 %v1935_v19, %v1902_v22  ;;  %1963 = vst [vmem:[%s5045_s13 + $0x20] sm:$0xff] %v5838_v37  ;;  %v1906_v19 = vadd.f32 %v1890_v27, %v6948_v33 }
 0x340   : > { %v5800_v50 = vpop.eup %3557  ;;  %3559 = vrcp.f32 %v5786_v56  ;;  %v1903_v11 = vadd.f32 %v1887_v28, %v6945_v47  ;;  %v1895_v28 = vmul.f32 %v5783_v45, %v5658_v18  ;;  %v1905_v47 = vadd.f32 %v1889_v44, %v6947_v15  ;;  %1964 = vst [vmem:[%s5045_s13 + $0x60] sm:$0xff] %v5840_v12 }
 0x341   : > { %v2172_v52 = vmul.f32 %v5800_v50, %v5781_v48  ;;  %v5851_v49 = vadd.f32 %v1934_v20, %v1901_v9  ;;  %v1940_v20 = vmul.f32 %v5798_v42, %v5660_v32  ;;  %v1941_v22 = vmul.f32 %v5798_v42, %v5673_v39  ;;  %1965 = vst [vmem:[%s5045_s13 + $0xa0] sm:$0xff] %v5842_v40 }
 0x342   : > { %v5865_v9 = vadd.f32 %v1936_v10, %v1903_v11  ;;  %v5872_v6 = vadd.f32 %v1937_v21, %v1904_v26  ;;  %v6949_v10 = vld [vmem:[#allocation81_spill] sm:$0xff]  ;;  %v1942_v15 = vmul.f32 %v5798_v42, %v5687_v62  ;;  %v5883_v27 = vadd.f32 %v1938_v14, %v1905_v47  ;;  %v6950_v21 = vld [vmem:[#allocation84_spill] sm:$0xff]  ;;  %1967 = vst [vmem:[%s5045_s13 + $0x120] sm:$0xff] %v5856_v63  ;;  %v6951_v62 = vld [vmem:[#allocation87_spill] sm:$0xff] }
 0x343   : > { %v2173_v1 = vsub.f32 1.0, %v2172_v52  ;;  %v1896_v52 = vmul.f32 %v5783_v45, %v5682_v38  ;;  %v1907_v11 = vadd.f32 %v1891_v29, %v6949_v10  ;;  %1966 = vst [vmem:[%s5045_s13 + $0xe0] sm:$0xff] %v5851_v49  ;;  %v1908_v26 = vadd.f32 %v1892_v41, %v6950_v21  ;;  %v6952_v21 = vld [vmem:[#allocation90_spill] sm:$0xff] }
 0x344   : > { %v1943_v33 = vmul.f32 %v5798_v42, %v5698_v55  ;;  %v5890_v39 = vadd.f32 %v1939_v3, %v1906_v19  ;;  %v1897_v10 = vmul.f32 %v5783_v45, %v5709_v24  ;;  %v1909_v14 = vadd.f32 %v1893_v35, %v6951_v62  ;;  %1968 = vst [vmem:[%s5045_s13 + $0x160] sm:$0xff] %v5865_v9  ;;  %v6953_v19 = vld [vmem:[#allocation21_spill] sm:$0xff] }
 0x345   : > { %v2174_v29 = vmul.f32 %v5800_v50, %v2173_v1  ;;  %v1944_v47 = vmul.f32 %v5798_v42, %v5712_v53  ;;  %v1956_v41 = vadd.f32 %v1940_v20, %v1907_v11  ;;  %v1910_v3 = vadd.f32 %v1894_v23, %v6952_v21  ;;  %1969 = vst [vmem:[%s5045_s13 + $0x1a0] sm:$0xff] %v5872_v6  ;;  %v6954_v1 = vld [vmem:[#allocation93_spill] sm:$0xff]  ;;  %v6955_v20 = vld [vmem:[#allocation95_spill] sm:$0xff] }
 0x346   : > { %v5844_v57 = vpop.eup %3559  ;;  %v1945_v55 = vmul.f32 %v5798_v42, %v6953_v19  ;;  %v1957_v38 = vadd.f32 %v1941_v22, %v1908_v26  ;;  %v1911_v24 = vadd.f32 %v1895_v28, %v6954_v1  ;;  %v1946_v62 = vmul.f32 %v5798_v42, %v5728_v60  ;;  %1970 = vst [vmem:[%s5045_s13 + $0x1e0] sm:$0xff] %v5883_v27  ;;  %v6956_v28 = vld [vmem:[#allocation98_spill] sm:$0xff] }
 0x347   : > { %v2186_v44 = vmul.f32 %v5844_v57, %v5786_v56  ;;  %v1958_v35 = vadd.f32 %v1942_v15, %v1909_v14  ;;  %v1912_v23 = vadd.f32 %v1896_v52, %v6955_v20  ;;  %v5913_v11 = vadd.f32 %v1943_v33, %v1910_v3  ;;  %1971 = vst [vmem:[%s5045_s13 + $0x220] sm:$0xff] %v5890_v39 }
 0x348   : > { %v2175_v22 = vadd.f32 %v5800_v50, %v2174_v29  ;;  %vm2177_vm11 = vweird.f32 %v5800_v50  ;;  %v5920_v26 = vadd.f32 %v1944_v47, %v1911_v24  ;;  %1972 = vst [vmem:[%s5045_s13 + $0x260] sm:$0xff] %v1956_v41  ;;  %v2182_v42 = vand.u32 2147483648, %v5781_v48 }
 0x349   : > { %v2187_v45 = vsub.f32 1.0, %v2186_v44  ;;  %v1913_v44 = vadd.f32 %v1897_v10, %v6956_v28  ;;  %v5924_v15 = vadd.f32 %v1945_v55, %v1912_v23  ;;  %1973 = vst [vmem:[%s5045_s13 + $0x2a0] sm:$0xff] %v1957_v38  ;;  %vm2176_vm12 = vweird.f32 %v5781_v48  ;;  %v6962_v28 = vld [vmem:[#allocation62_spill] sm:$0xff] }
 0x34a   : > { %v2180_v52 = vand.u32 2147483647, %v5781_v48  ;;  %1974 = vst [vmem:[%s5045_s13 + $0x2e0] sm:$0xff] %v1958_v35  ;;  %vm2178_vm13 = vmor %vm2176_vm12, %vm2177_vm11  ;;  %v2183_v55 = vor.u32 1.1754944e-38, %v2182_v42  ;;  %v2196_v10 = vand.u32 2147483648, %v5786_v56  ;;  %vm2191_vm14 = vweird.f32 %v5844_v57 }
 0x34b   : > { %v2188_v33 = vmul.f32 %v5844_v57, %v2187_v45  ;;  %v5930_v29 = vadd.f32 %v1946_v62, %v1913_v44  ;;  %1975 = vst [vmem:[%s5045_s13 + $0x320] sm:$0xff] %v5913_v11  ;;  %v2179_v24 = vsel %vm2178_vm13, %v5800_v50, %v2175_v22  ;;  %v2194_v14 = vand.u32 2147483647, %v5786_v56  ;;  %v6959_v45 = vld [vmem:[#allocation56_spill] sm:$0xff] }
 0x34c   : > { %1976 = vst [vmem:[%s5045_s13 + $0x360] sm:$0xff] %v5920_v26  ;;  %vm2181_vm1 = vcmp.eq.f32.partialorder %v2180_v52, 8.507059e+37  ;;  %vm2190_vm15 = vweird.f32 %v5786_v56  ;;  %v2197_v47 = vor.u32 1.1754944e-38, %v2196_v10  ;;  %v6963_v52 = vld [vmem:[#allocation65_spill] sm:$0xff]  ;;  %v6964_v10 = vld [vmem:[#allocation68_spill] sm:$0xff] }
 0x34d   : > { %1977 = vst [vmem:[%s5045_s13 + $0x3a0] sm:$0xff] %v5924_v15  ;;  %v2189_v48 = vadd.f32 %v5844_v57, %v2188_v33  ;;  %v2184_v50 = vsel %vm2181_vm1, %v2183_v55, %v2179_v24  ;;  %vm2192_vm0 = vmor %vm2190_vm15, %vm2191_vm14  ;;  %vm2195_vm2 = vcmp.eq.f32.partialorder %v2194_v14, 8.507059e+37 }
 0x34e   : > { %1978 = vst [vmem:[%s5045_s13 + $0x3e0] sm:$0xff] %v5930_v29  ;;  %v5953_v21 = vperm.slane %v2184_v50, 0 }
 0x34f   : > { %3299 = vst [vmem:[%s5163_s10 + $0x200] sm:$0xff] %v5838_v37  ;;  %v2193_v3 = vsel %vm2192_vm0, %v5844_v57, %v2189_v48 }
 0x350   : > { %3300 = vst [vmem:[%s5163_s10 + $0x240] sm:$0xff] %v5840_v12  ;;  %v2198_v37 = vsel %vm2195_vm2, %v2197_v47, %v2193_v3  ;;  %v2216_v12 = vmul.f32 %v5953_v21, %v5532_v13  ;;  %v2220_v13 = vmul.f32 %v5953_v21, %v5554_v43  ;;  %v2224_v43 = vmul.f32 %v5953_v21, %v5580_v5  ;;  %v6965_v47 = vld [vmem:[#allocation71_spill] sm:$0xff] }
 0x351   : > { %3301 = vst [vmem:[%s5163_s10 + $0x208] sm:$0xff] %v5842_v40  ;;  %v5960_v56 = vperm.slane %v2198_v37, 0  ;;  %v2217_v40 = vmul.f32 %v5953_v21, %v5537_v46  ;;  %v2221_v46 = vmul.f32 %v5953_v21, %v5559_v4  ;;  %v2226_v5 = vmul.f32 %v5953_v21, %v5608_v17 }
 0x352   : > { %3302 = vst [vmem:[%s5163_s10 + $0x248] sm:$0xff] %v5851_v49  ;;  %v2218_v49 = vmul.f32 %v5953_v21, %v5542_v34  ;;  %v2222_v34 = vmul.f32 %v5953_v21, %v5564_v58  ;;  %v2225_v58 = vmul.f32 %v5953_v21, %v5585_v31  ;;  %v6961_v31 = vld [vmem:[#allocation43_spill] sm:$0xff]  ;;  %v2236_v44 = vadd.f32 %v2220_v13, %v6962_v28 }
 0x353   : > { %3303 = vst [vmem:[%s5163_s10 + $0x210] sm:$0xff] %v5856_v63  ;;  %v2265_v57 = vmul.f32 %v5960_v56, %v5571_v2  ;;  %v2219_v63 = vmul.f32 %v5953_v21, %v5549_v36  ;;  %v2223_v36 = vmul.f32 %v5953_v21, %v5569_v54  ;;  %v2268_v4 = vmul.f32 %v5960_v56, %v5593_v25 }
 0x354   : > { %3304 = vst [vmem:[%s5163_s10 + $0x250] sm:$0xff] %v5865_v9  ;;  %v2266_v9 = vmul.f32 %v5960_v56, %v5573_v30  ;;  %v2234_v1 = vadd.f32 %v2218_v49, %v6959_v45  ;;  %v2269_v62 = vmul.f32 %v5960_v56, %v5603_v59  ;;  %v2270_v23 = vmul.f32 %v5960_v56, %v5612_v61 }
 0x355   : > { %3305 = vst [vmem:[%s5163_s10 + $0x218] sm:$0xff] %v5872_v6  ;;  %v2227_v22 = vmul.f32 %v5953_v21, %v6961_v31  ;;  %v2228_v17 = vmul.f32 %v5953_v21, %v5645_v51  ;;  %v2237_v33 = vadd.f32 %v2221_v46, %v6963_v52  ;;  %v2238_v48 = vadd.f32 %v2222_v34, %v6964_v10  ;;  %v6969_v34 = vld [vmem:[#allocation77_spill] sm:$0xff] }
 0x356   : > { %3306 = vst [vmem:[%s5163_s10 + $0x258] sm:$0xff] %v5883_v27  ;;  %v2267_v27 = vmul.f32 %v5960_v56, %v5575_v8  ;;  %v2273_v14 = vmul.f32 %v5960_v56, %v5651_v16  ;;  %v6040_v50 = vadd.f32 %v2269_v62, %v2236_v44  ;;  %v2239_v3 = vadd.f32 %v2223_v36, %v6965_v47  ;;  %v6974_v62 = vld [vmem:[#allocation83_spill] sm:$0xff] }
 0x357   : > { %3307 = vst [vmem:[%s5163_s10 + $0x220] sm:$0xff] %v5890_v39  ;;  %v6957_v39 = vld [vmem:[#allocation50_spill] sm:$0xff]  ;;  %v2274_v37 = vmul.f32 %v5960_v56, %v5660_v32  ;;  %v2279_v28 = vmul.f32 %v5960_v56, %v6953_v19 }
 0x358   : > { %3308 = vst [vmem:[%s5163_s10 + $0x260] sm:$0xff] %v1956_v41  ;;  %v2232_v6 = vadd.f32 %v2216_v12, %v6957_v39  ;;  %v6026_v42 = vadd.f32 %v2267_v27, %v2234_v1  ;;  %v2286_v12 = vadd.f32 %v2270_v23, %v2237_v33  ;;  %v2241_v39 = vadd.f32 %v2225_v58, %v6969_v34  ;;  %v6973_v1 = vld [vmem:[#allocation19_spill] sm:$0xff] }
 0x359   : > { %3309 = vst [vmem:[%s5163_s10 + $0x228] sm:$0xff] %v1957_v38  ;;  %v6958_v38 = vld [vmem:[#allocation53_spill] sm:$0xff]  ;;  %v2231_v58 = vmul.f32 %v5953_v21, %v6973_v1  ;;  %v6123_v1 = vld [vmem:[%s6498_s1 + $0x8] sm:$0xff] }
 0x35a   : > { %3310 = vst [vmem:[%s5163_s10 + $0x268] sm:$0xff] %v1958_v35  ;;  %v2233_v41 = vadd.f32 %v2217_v40, %v6958_v38  ;;  %v6008_v54 = vadd.f32 %v2265_v57, %v2232_v6  ;;  %v6960_v35 = vld [vmem:[#allocation59_spill] sm:$0xff]  ;;  %v6966_v40 = vld [vmem:[#allocation74_spill] sm:$0xff]  ;;  %v6970_v6 = vld [vmem:[#allocation52_spill] sm:$0xff]  ;;  %v2290_v23 = vadd.f32 %v2274_v37, %v2241_v39 }
 0x35b   : > { %3311 = vst [vmem:[%s5163_s10 + $0x230] sm:$0xff] %v5913_v11  ;;  %v2235_v20 = vadd.f32 %v2219_v63, %v6960_v35  ;;  %v2240_v49 = vadd.f32 %v2224_v43, %v6966_v40  ;;  %v6967_v57 = vld [vmem:[#allocation46_spill] sm:$0xff]  ;;  %v2276_v27 = vmul.f32 %v5960_v56, %v6970_v6  ;;  %v6971_v43 = vld [vmem:[#allocation80_spill] sm:$0xff]  ;;  %v2243_v35 = vadd.f32 %v2227_v22, %v6974_v62 }
 0x35c   : > { %3312 = vst [vmem:[%s5163_s10 + $0x270] sm:$0xff] %v5920_v26  ;;  %v6017_v11 = vadd.f32 %v2266_v9, %v2233_v41  ;;  %v2271_v26 = vmul.f32 %v5960_v56, %v5626_v7  ;;  %v2275_v63 = vmul.f32 %v5960_v56, %v6967_v57  ;;  %v2242_v38 = vadd.f32 %v2226_v5, %v6971_v43  ;;  %v6972_v41 = vld [vmem:[#allocation17_spill] sm:$0xff]  ;;  %v6975_v5 = vld [vmem:[#allocation86_spill] sm:$0xff] }
 0x35d   : > { %3313 = vst [vmem:[%s5163_s10 + $0x238] sm:$0xff] %v5924_v15  ;;  %v2272_v15 = vmul.f32 %v5960_v56, %v5638_v0  ;;  %v6035_v24 = vadd.f32 %v2268_v4, %v2235_v20  ;;  %v2277_v4 = vmul.f32 %v5960_v56, %v6972_v41  ;;  %v2289_v45 = vadd.f32 %v2273_v14, %v2240_v49 }
 0x35e   : > { %3314 = vst [vmem:[%s5163_s10 + $0x278] sm:$0xff] %v5930_v29  ;;  %v2229_v29 = vmul.f32 %v5953_v21, %v5658_v18  ;;  %v2287_v13 = vadd.f32 %v2271_v26, %v2238_v48  ;;  %v6968_v18 = vld [vmem:[#allocation49_spill] sm:$0xff]  ;;  %v2278_v20 = vmul.f32 %v5960_v56, %v5712_v53  ;;  %v2244_v31 = vadd.f32 %v2228_v17, %v6975_v5 }
 0x35f   : > { %2297 = vst [vmem:[%s5045_s13 + $0x28] sm:$0xff] %v6008_v54  ;;  %v2230_v46 = vmul.f32 %v5953_v21, %v6968_v18  ;;  %v2288_v36 = vadd.f32 %v2272_v15, %v2239_v3  ;;  %v2291_v44 = vadd.f32 %v2275_v63, %v2242_v38  ;;  %v6976_v26 = vld [vmem:[#allocation89_spill] sm:$0xff]  ;;  %v2280_v21 = vmul.f32 %v5960_v56, %v5728_v60  ;;  %v6977_v15 = vld [vmem:[#allocation92_spill] sm:$0xff]  ;;  %v6116_v38 = vld [vmem:[%s6498_s1] sm:$0xff] }
 0x360   : > { %2298 = vst [vmem:[%s5045_s13 + $0x68] sm:$0xff] %v6017_v11  ;;  %v2245_v52 = vadd.f32 %v2229_v29, %v6976_v26  ;;  %v2292_v22 = vadd.f32 %v2276_v27, %v2243_v35  ;;  %v2293_v17 = vadd.f32 %v2277_v4, %v2244_v31  ;;  %v6978_v48 = vld [vmem:[#allocation97_spill] sm:$0xff]  ;;  %v6133_v35 = vld [vmem:[%s6498_s1 + $0x18] sm:$0xff]  ;;  %v6158_v26 = vld [vmem:[%s6498_s1 + $0x40] sm:$0xff] }
 0x361   : > { %2299 = vst [vmem:[%s5045_s13 + $0xa8] sm:$0xff] %v6026_v42  ;;  %v2247_v14 = vadd.f32 %v2231_v58, %v6978_v48  ;;  %v6128_v58 = vld [vmem:[%s6498_s1 + $0x10] sm:$0xff] }
 0x362   : > { %2300 = vst [vmem:[%s5045_s13 + $0xe8] sm:$0xff] %v6035_v24  ;;  %v6148_v31 = vld [vmem:[%s6498_s1 + $0x30] sm:$0xff] }
 0x363   : > { %v2474_v55 = vpop.f32.mrf.mxu1  ;;  %2301 = vst [vmem:[%s5045_s13 + $0x128] sm:$0xff] %v6040_v50  ;;  %v2296_v3 = vadd.f32 %v2280_v21, %v2247_v14  ;;  %v6182_v48 = vld [vmem:[%s6498_s1 + $0x50] sm:$0xff] }
 0x364   : > { %v2497_v51 = vsub.f32 0.0, %v2474_v55  ;;  %2302 = vst [vmem:[%s5045_s13 + $0x168] sm:$0xff] %v2286_v12  ;;  %v2246_v55 = vadd.f32 %v2230_v46, %v6977_v15 }
 0x365   : > { %2303 = vst [vmem:[%s5045_s13 + $0x1a8] sm:$0xff] %v2287_v13 }
 0x366   : > { %v2499_v9 = vmul.f32 1.442695, %v2497_v51  ;;  %2304 = vst [vmem:[%s5045_s13 + $0x1e8] sm:$0xff] %v2288_v36  ;;  %v2294_v51 = vadd.f32 %v2278_v20, %v2245_v52  ;;  %v2295_v29 = vadd.f32 %v2279_v28, %v2246_v55  ;;  %v6138_v20 = vld [vmem:[%s6498_s1 + $0x20] sm:$0xff]  ;;  %v6163_v52 = vld [vmem:[%s6498_s1 + $0x48] sm:$0xff] }
 0x367   : > { %2305 = vst [vmem:[%s5045_s13 + $0x228] sm:$0xff] %v2289_v45 }
 0x368   : > { %3561 = vpow2.f32 %v2499_v9  ;;  %2306 = vst [vmem:[%s5045_s13 + $0x268] sm:$0xff] %v2290_v23 }
 0x369   : > { %v2494_v33 = vpop.f32.mrf.mxu2  ;;  %2307 = vst [vmem:[%s5045_s13 + $0x2a8] sm:$0xff] %v2291_v44 }
 0x36a   : > { %v2498_v10 = vsub.f32 0.0, %v2494_v33  ;;  %2308 = vst [vmem:[%s5045_s13 + $0x2e8] sm:$0xff] %v2292_v22 }
 0x36b   : > { %2309 = vst [vmem:[%s5045_s13 + $0x328] sm:$0xff] %v2293_v17 }
 0x36c   : > { %v2501_v47 = vmul.f32 1.442695, %v2498_v10  ;;  %2310 = vst [vmem:[%s5045_s13 + $0x368] sm:$0xff] %v2294_v51 }
 0x36d   : > { %2311 = vst [vmem:[%s5045_s13 + $0x3a8] sm:$0xff] %v2295_v29 }
 0x36e   : > { %v3562_v56 = vpop.eup %3561  ;;  %3563 = vpow2.f32 %v2501_v47  ;;  %2312 = vst [vmem:[%s5045_s13 + $0x3e8] sm:$0xff] %v2296_v3 }
 0x36f   : > { %v2503_v37 = vadd.f32 1.0, %v3562_v56  ;;  %3333 = vst [vmem:[%s5163_s10 + $0x280] sm:$0xff] %v6008_v54 }
 0x370   : > { %3334 = vst [vmem:[%s5163_s10 + $0x2c0] sm:$0xff] %v6017_v11 }
 0x371   : > { %3565 = vrcp.f32 %v2503_v37  ;;  %3335 = vst [vmem:[%s5163_s10 + $0x288] sm:$0xff] %v6026_v42  ;;  %v2516_v18 = vand.u32 2147483648, %v2503_v37  ;;  %vm2510_vm4 = vweird.f32 %v2503_v37 }
 0x372   : > { %3336 = vst [vmem:[%s5163_s10 + $0x2c8] sm:$0xff] %v6035_v24 }
 0x373   : > { %3337 = vst [vmem:[%s5163_s10 + $0x290] sm:$0xff] %v6040_v50  ;;  %v2517_v34 = vor.u32 1.1754944e-38, %v2516_v18  ;;  %v6983_v18 = vld [vmem:[#allocation109_spill] sm:$0xff] }
 0x374   : > { %v3564_v40 = vpop.eup %3563  ;;  %3338 = vst [vmem:[%s5163_s10 + $0x2d0] sm:$0xff] %v2286_v12  ;;  %v2514_v12 = vand.u32 2147483647, %v2503_v37 }
 0x375   : > { %v2504_v63 = vadd.f32 1.0, %v3564_v40  ;;  %3339 = vst [vmem:[%s5163_s10 + $0x298] sm:$0xff] %v2287_v13 }
 0x376   : > { %3340 = vst [vmem:[%s5163_s10 + $0x2d8] sm:$0xff] %v2288_v36  ;;  %vm2515_vm6 = vcmp.eq.f32.partialorder %v2514_v12, 8.507059e+37 }
 0x377   : > { %v3566_v49 = vpop.eup %3565  ;;  %3567 = vrcp.f32 %v2504_v63  ;;  %3341 = vst [vmem:[%s5163_s10 + $0x2a0] sm:$0xff] %v2289_v45  ;;  %v2530_v27 = vand.u32 2147483648, %v2504_v63  ;;  %v2528_v43 = vand.u32 2147483647, %v2504_v63  ;;  %vm2524_vm8 = vweird.f32 %v2504_v63 }
 0x378   : > { %v2506_v9 = vmul.f32 %v3566_v49, %v2503_v37  ;;  %3342 = vst [vmem:[%s5163_s10 + $0x2e0] sm:$0xff] %v2290_v23  ;;  %vm2511_vm3 = vweird.f32 %v3566_v49  ;;  %v6143_v23 = vld [vmem:[%s6498_s1 + $0x28] sm:$0xff] }
 0x379   : > { %3343 = vst [vmem:[%s5163_s10 + $0x2a8] sm:$0xff] %v2291_v44  ;;  %vm2512_vm5 = vmor %vm2510_vm4, %vm2511_vm3  ;;  %v2531_v62 = vor.u32 1.1754944e-38, %v2530_v27  ;;  %vm2529_vm10 = vcmp.eq.f32.partialorder %v2528_v43, 8.507059e+37  ;;  %v6153_v44 = vld [vmem:[%s6498_s1 + $0x38] sm:$0xff] }
 0x37a   : > { %v2507_v54 = vsub.f32 1.0, %v2506_v9  ;;  %3344 = vst [vmem:[%s5163_s10 + $0x2e8] sm:$0xff] %v2292_v22  ;;  %v6981_v9 = vld [vmem:[#allocation105_spill] sm:$0xff] }
 0x37b   : > { %3345 = vst [vmem:[%s5163_s10 + $0x2b0] sm:$0xff] %v2293_v17 }
 0x37c   : > { %v2508_v11 = vmul.f32 %v3566_v49, %v2507_v54  ;;  %3346 = vst [vmem:[%s5163_s10 + $0x2f0] sm:$0xff] %v2294_v51 }
 0x37d   : > { %v3568_v42 = vpop.eup %3567  ;;  %3347 = vst [vmem:[%s5163_s10 + $0x2b8] sm:$0xff] %v2295_v29 }
 0x37e   : > { %3348 = vst [vmem:[%s5163_s10 + $0x2f8] sm:$0xff] %v2296_v3  ;;  %v2509_v24 = vadd.f32 %v3566_v49, %v2508_v11  ;;  %v2520_v50 = vmul.f32 %v3568_v42, %v2504_v63  ;;  %vm2525_vm7 = vweird.f32 %v3568_v42 }
 0x37f   : > { %vm2526_vm9 = vmor %vm2524_vm8, %vm2525_vm7 }
 0x380   : > { %v2513_v13 = vsel %vm2512_vm5, %v3566_v49, %v2509_v24  ;;  %v2521_v46 = vsub.f32 1.0, %v2520_v50  ;;  %v6982_v24 = vld [vmem:[#allocation107_spill] sm:$0xff] }
 0x381   : > { %v2518_v39 = vsel %vm2515_vm6, %v2517_v34, %v2513_v13 }
 0x382   : > { %v2522_v36 = vmul.f32 %v3568_v42, %v2521_v46  ;;  %v6118_v4 = vperm.slane %v2518_v39, 0 }
 0x384   : > { %v2523_v45 = vadd.f32 %v3568_v42, %v2522_v36  ;;  %v2550_v21 = vmul.f32 %v6118_v4, %v6116_v38  ;;  %v2551_v22 = vmul.f32 %v6118_v4, %v6123_v1  ;;  %v2552_v33 = vmul.f32 %v6118_v4, %v6128_v58 }
 0x385   : > { %v2553_v55 = vmul.f32 %v6118_v4, %v6133_v35  ;;  %v2554_v17 = vmul.f32 %v6118_v4, %v6138_v20  ;;  %v2555_v10 = vmul.f32 %v6118_v4, %v6143_v23  ;;  %v2556_v14 = vmul.f32 %v6118_v4, %v6148_v31 }
 0x386   : > { %v2527_v5 = vsel %vm2526_vm9, %v3568_v42, %v2523_v45  ;;  %v2557_v47 = vmul.f32 %v6118_v4, %v6153_v44  ;;  %v2558_v3 = vmul.f32 %v6118_v4, %v6158_v26  ;;  %v2559_v37 = vmul.f32 %v6118_v4, %v6163_v52  ;;  %v6213_v42 = vld [vmem:[%s6498_s1 + $0x60] sm:$0xff] }
 0x387   : > { %v2532_v28 = vsel %vm2529_vm10, %v2531_v62, %v2527_v5  ;;  %v2568_v54 = vadd.f32 %v2552_v33, %v6981_v9  ;;  %v2569_v50 = vadd.f32 %v2553_v55, %v6982_v24  ;;  %v2570_v12 = vadd.f32 %v2554_v17, %v6983_v18  ;;  %v2808_v5 = vpop.f32.mrf.mxu1  ;;  %v6986_v17 = vld [vmem:[#allocation115_spill] sm:$0xff] }
 0x388   : > { %v6171_v15 = vperm.slane %v2532_v28, 0  ;;  %v2562_v28 = vmul.f32 %v6118_v4, %v6213_v42 }
 0x38a   : > { %v2599_v51 = vmul.f32 %v6171_v15, %v5571_v2  ;;  %v2600_v56 = vmul.f32 %v6171_v15, %v5573_v30  ;;  %v2601_v29 = vmul.f32 %v6171_v15, %v5575_v8  ;;  %v2602_v40 = vmul.f32 %v6171_v15, %v5593_v25  ;;  %v6203_v2 = vld [vmem:[%s6498_s1 + $0x58] sm:$0xff]  ;;  %v6979_v30 = vld [vmem:[#allocation101_spill] sm:$0xff]  ;;  %v6980_v8 = vld [vmem:[#allocation103_spill] sm:$0xff] }
 0x38b   : > { %v2566_v49 = vadd.f32 %v2550_v21, %v6979_v30  ;;  %v2567_v63 = vadd.f32 %v2551_v22, %v6980_v8  ;;  %v2603_v11 = vmul.f32 %v6171_v15, %v5603_v59  ;;  %v2560_v25 = vmul.f32 %v6118_v4, %v6182_v48  ;;  %v6224_v59 = vld [vmem:[%s6498_s1 + $0x68] sm:$0xff]  ;;  %v6985_v21 = vld [vmem:[#allocation113_spill] sm:$0xff] }
 0x38c   : > { %v2604_v13 = vmul.f32 %v6171_v15, %v5612_v61  ;;  %v2605_v46 = vmul.f32 %v6171_v15, %v5626_v7  ;;  %v6232_v27 = vadd.f32 %v2601_v29, %v2568_v54  ;;  %v2561_v36 = vmul.f32 %v6118_v4, %v6203_v2  ;;  %v6984_v61 = vld [vmem:[#allocation111_spill] sm:$0xff]  ;;  %v6244_v7 = vld [vmem:[%s6498_s1 + $0x70] sm:$0xff] }
 0x38d   : > { %v6228_v34 = vadd.f32 %v2599_v51, %v2566_v49  ;;  %v6230_v39 = vadd.f32 %v2600_v56, %v2567_v63  ;;  %v2571_v43 = vadd.f32 %v2555_v10, %v6984_v61  ;;  %v2606_v45 = vmul.f32 %v6171_v15, %v5638_v0  ;;  %v6988_v49 = vld [vmem:[#allocation119_spill] sm:$0xff] }
 0x38e   : > { %v6239_v62 = vadd.f32 %v2602_v40, %v2569_v50  ;;  %v2572_v22 = vadd.f32 %v2556_v14, %v6985_v21  ;;  %v2607_v33 = vmul.f32 %v6171_v15, %v5651_v16  ;;  %v2619_v55 = vadd.f32 %v2603_v11, %v2570_v12  ;;  %v6263_v16 = vld [vmem:[%s6498_s1 + $0x78] sm:$0xff]  ;;  %v6987_v14 = vld [vmem:[#allocation117_spill] sm:$0xff]  ;;  %2633 = vst [vmem:[%s5045_s13 + $0xb0] sm:$0xff] %v6232_v27  ;;  %v6992_v61 = vld [vmem:[#allocation127_spill] sm:$0xff] }
 0x38f   : > { %2631 = vst [vmem:[%s5045_s13 + $0x30] sm:$0xff] %v6228_v34  ;;  %v2563_v0 = vmul.f32 %v6118_v4, %v6224_v59  ;;  %v2573_v10 = vadd.f32 %v2557_v47, %v6986_v17  ;;  %v2608_v51 = vmul.f32 %v6171_v15, %v5660_v32  ;;  %v2620_v56 = vadd.f32 %v2604_v13, %v2571_v43  ;;  %v6993_v43 = vld [vmem:[#allocation129_spill] sm:$0xff] }
 0x390   : > { %2632 = vst [vmem:[%s5045_s13 + $0x70] sm:$0xff] %v6230_v39  ;;  %v2574_v29 = vadd.f32 %v2558_v3, %v6987_v14  ;;  %v2609_v40 = vmul.f32 %v6171_v15, %v6967_v57  ;;  %v2621_v30 = vadd.f32 %v2605_v46, %v2572_v22  ;;  %v2831_v47 = vsub.f32 0.0, %v2808_v5  ;;  %v6989_v3 = vld [vmem:[#allocation121_spill] sm:$0xff]  ;;  %v2828_v22 = vpop.f32.mrf.mxu2 }
 0x391   : > { %v2564_v32 = vmul.f32 %v6118_v4, %v6244_v7  ;;  %v2575_v8 = vadd.f32 %v2559_v37, %v6988_v49  ;;  %v2610_v63 = vmul.f32 %v6171_v15, %v6970_v6  ;;  %v2622_v9 = vadd.f32 %v2606_v45, %v2573_v10  ;;  %2634 = vst [vmem:[%s5045_s13 + $0xf0] sm:$0xff] %v6239_v62  ;;  %v6990_v37 = vld [vmem:[#allocation123_spill] sm:$0xff] }
 0x392   : > { %v2576_v54 = vadd.f32 %v2560_v25, %v6989_v3  ;;  %v2611_v57 = vmul.f32 %v6171_v15, %v6972_v41  ;;  %v2623_v11 = vadd.f32 %v2607_v33, %v2574_v29  ;;  %2635 = vst [vmem:[%s5045_s13 + $0x130] sm:$0xff] %v2619_v55  ;;  %v2833_v24 = vmul.f32 1.442695, %v2831_v47  ;;  %v6991_v25 = vld [vmem:[#allocation125_spill] sm:$0xff] }
 0x393   : > { %v2565_v50 = vmul.f32 %v6118_v4, %v6263_v16  ;;  %v2577_v18 = vadd.f32 %v2561_v36, %v6990_v37  ;;  %v2612_v6 = vmul.f32 %v6171_v15, %v5712_v53  ;;  %v2624_v12 = vadd.f32 %v2608_v51, %v2575_v8  ;;  %2636 = vst [vmem:[%s5045_s13 + $0x170] sm:$0xff] %v2620_v56  ;;  %v2916_v37 = vld [vmem:[#allocation5] sm:$0xff] }
 0x394   : > { %v2578_v13 = vadd.f32 %v2562_v28, %v6991_v25  ;;  %v2613_v41 = vmul.f32 %v6171_v15, %v6953_v19  ;;  %v2625_v46 = vadd.f32 %v2609_v40, %v2576_v54  ;;  %2637 = vst [vmem:[%s5045_s13 + $0x1b0] sm:$0xff] %v2621_v30  ;;  %3569 = vpow2.f32 %v2833_v24  ;;  %v6994_v19 = vld [vmem:[#allocation131_spill] sm:$0xff] }
 0x395   : > { %v2579_v4 = vadd.f32 %v2563_v0, %v6992_v61  ;;  %v2614_v36 = vmul.f32 %v6171_v15, %v5728_v60  ;;  %v2626_v53 = vadd.f32 %v2610_v63, %v2577_v18  ;;  %2638 = vst [vmem:[%s5045_s13 + $0x1f0] sm:$0xff] %v2622_v9  ;;  %v2580_v45 = vadd.f32 %v2564_v32, %v6993_v43  ;;  %v2917_v18 = vld [vmem:[#allocation5 + $0x8] sm:$0xff] }
 0x396   : > { %v2627_v5 = vadd.f32 %v2611_v57, %v2578_v13  ;;  %2639 = vst [vmem:[%s5045_s13 + $0x230] sm:$0xff] %v2623_v11  ;;  %v2581_v28 = vadd.f32 %v2565_v50, %v6994_v19  ;;  %v2832_v60 = vsub.f32 0.0, %v2828_v22  ;;  %v6995_v19 = vld [vmem:[#allocation100_spill] sm:$0xff] }
 0x397   : > { %v2628_v21 = vadd.f32 %v2612_v6, %v2579_v4  ;;  %2640 = vst [vmem:[%s5045_s13 + $0x270] sm:$0xff] %v2624_v12  ;;  %v2629_v33 = vadd.f32 %v2613_v41, %v2580_v45  ;;  %v2918_v6 = vld [vmem:[#allocation5 + $0x10] sm:$0xff]  ;;  %v2919_v41 = vld [vmem:[#allocation5 + $0x18] sm:$0xff] }
 0x398   : > { %2641 = vst [vmem:[%s5045_s13 + $0x2b0] sm:$0xff] %v2625_v46  ;;  %v2630_v15 = vadd.f32 %v2614_v36, %v2581_v28  ;;  %v2835_v17 = vmul.f32 1.442695, %v2832_v60  ;;  %v2920_v36 = vld [vmem:[#allocation5 + $0x20] sm:$0xff] }
 0x399   : > { %2642 = vst [vmem:[%s5045_s13 + $0x2f0] sm:$0xff] %v2626_v53 }
 0x39a   : > { %v3570_v0 = vpop.eup %3569  ;;  %2643 = vst [vmem:[%s5045_s13 + $0x330] sm:$0xff] %v2627_v5  ;;  %3571 = vpow2.f32 %v2835_v17  ;;  %v6998_v17 = vld [vmem:[#allocation106_spill] sm:$0xff] }
 0x39b   : > { %2644 = vst [vmem:[%s5045_s13 + $0x370] sm:$0xff] %v2628_v21  ;;  %v2837_v10 = vadd.f32 1.0, %v3570_v0 }
 0x39c   : > { %2645 = vst [vmem:[%s5045_s13 + $0x3b0] sm:$0xff] %v2629_v33 }
 0x39d   : > { %2646 = vst [vmem:[%s5045_s13 + $0x3f0] sm:$0xff] %v2630_v15  ;;  %3573 = vrcp.f32 %v2837_v10  ;;  %vm2844_vm12 = vweird.f32 %v2837_v10 }
 0x39e   : > { %3367 = vst [vmem:[%s5163_s10 + $0x300] sm:$0xff] %v6228_v34 }
 0x39f   : > { %3368 = vst [vmem:[%s5163_s10 + $0x340] sm:$0xff] %v6230_v39 }
 0x3a0   : > { %3369 = vst [vmem:[%s5163_s10 + $0x308] sm:$0xff] %v6232_v27  ;;  %v3572_v51 = vpop.eup %3571 }
 0x3a1   : > { %3370 = vst [vmem:[%s5163_s10 + $0x348] sm:$0xff] %v6239_v62  ;;  %v2838_v29 = vadd.f32 1.0, %v3572_v51 }
 0x3a2   : > { %3371 = vst [vmem:[%s5163_s10 + $0x310] sm:$0xff] %v2619_v55 }
 0x3a3   : > { %v3574_v14 = vpop.eup %3573  ;;  %3372 = vst [vmem:[%s5163_s10 + $0x350] sm:$0xff] %v2620_v56  ;;  %3575 = vrcp.f32 %v2838_v29  ;;  %v2850_v56 = vand.u32 2147483648, %v2837_v10  ;;  %v2864_v63 = vand.u32 2147483648, %v2838_v29  ;;  %v2862_v3 = vand.u32 2147483647, %v2838_v29 }
 0x3a4   : > { %3373 = vst [vmem:[%s5163_s10 + $0x318] sm:$0xff] %v2621_v30  ;;  %v2840_v40 = vmul.f32 %v3574_v14, %v2837_v10  ;;  %vm2845_vm11 = vweird.f32 %v3574_v14  ;;  %v2848_v30 = vand.u32 2147483647, %v2837_v10  ;;  %vm2858_vm15 = vweird.f32 %v2838_v29  ;;  %v6999_v10 = vld [vmem:[#allocation108_spill] sm:$0xff] }
 0x3a5   : > { %3374 = vst [vmem:[%s5163_s10 + $0x358] sm:$0xff] %v2622_v9  ;;  %vm2846_vm13 = vmor %vm2844_vm12, %vm2845_vm11  ;;  %v2851_v49 = vor.u32 1.1754944e-38, %v2850_v56  ;;  %vm2863_vm2 = vcmp.eq.f32.partialorder %v2862_v3, 8.507059e+37  ;;  %v2926_v56 = vld [vmem:[#allocation5 + $0x50] sm:$0xff] }
 0x3a6   : > { %3375 = vst [vmem:[%s5163_s10 + $0x320] sm:$0xff] %v2623_v11  ;;  %v2841_v34 = vsub.f32 1.0, %v2840_v40  ;;  %vm2849_vm1 = vcmp.eq.f32.partialorder %v2848_v30, 8.507059e+37  ;;  %v2865_v11 = vor.u32 1.1754944e-38, %v2864_v63  ;;  %v2927_v63 = vld [vmem:[#allocation5 + $0x58] sm:$0xff] }
 0x3a7   : > { %3376 = vst [vmem:[%s5163_s10 + $0x360] sm:$0xff] %v2624_v12 }
 0x3a8   : > { %3377 = vst [vmem:[%s5163_s10 + $0x328] sm:$0xff] %v2625_v46  ;;  %v2842_v39 = vmul.f32 %v3574_v14, %v2841_v34 }
 0x3a9   : > { %3378 = vst [vmem:[%s5163_s10 + $0x368] sm:$0xff] %v2626_v53  ;;  %v3576_v27 = vpop.eup %3575  ;;  %v2921_v53 = vld [vmem:[#allocation5 + $0x28] sm:$0xff] }
 0x3aa   : > { %3379 = vst [vmem:[%s5163_s10 + $0x330] sm:$0xff] %v2627_v5  ;;  %v2843_v62 = vadd.f32 %v3574_v14, %v2842_v39  ;;  %v2854_v55 = vmul.f32 %v3576_v27, %v2838_v29  ;;  %vm2859_vm14 = vweird.f32 %v3576_v27  ;;  %v2922_v5 = vld [vmem:[#allocation5 + $0x30] sm:$0xff]  ;;  %v2925_v29 = vld [vmem:[#allocation5 + $0x48] sm:$0xff] }
 0x3ab   : > { %3380 = vst [vmem:[%s5163_s10 + $0x370] sm:$0xff] %v2628_v21  ;;  %vm2860_vm0 = vmor %vm2858_vm15, %vm2859_vm14  ;;  %v6996_v21 = vld [vmem:[#allocation102_spill] sm:$0xff] }
 0x3ac   : > { %3381 = vst [vmem:[%s5163_s10 + $0x338] sm:$0xff] %v2629_v33  ;;  %v2847_v47 = vsel %vm2846_vm13, %v3574_v14, %v2843_v62  ;;  %v2855_v32 = vsub.f32 1.0, %v2854_v55  ;;  %v6997_v33 = vld [vmem:[#allocation104_spill] sm:$0xff]  ;;  %v7000_v62 = vld [vmem:[#allocation110_spill] sm:$0xff] }
 0x3ad   : > { %3382 = vst [vmem:[%s5163_s10 + $0x378] sm:$0xff] %v2630_v15  ;;  %v2852_v8 = vsel %vm2849_vm1, %v2851_v49, %v2847_v47  ;;  %v2923_v15 = vld [vmem:[#allocation5 + $0x38] sm:$0xff]  ;;  %v7001_v49 = vld [vmem:[#allocation112_spill] sm:$0xff] }
 0x3ae   : > { %v2856_v9 = vmul.f32 %v3576_v27, %v2855_v32  ;;  %v6325_v54 = vperm.slane %v2852_v8, 0 }
 0x3b0   : > { %v2857_v57 = vadd.f32 %v3576_v27, %v2856_v9  ;;  %v2884_v12 = vmul.f32 %v6325_v54, %v6116_v38  ;;  %v2885_v25 = vmul.f32 %v6325_v54, %v6123_v1  ;;  %v2886_v13 = vmul.f32 %v6325_v54, %v6128_v58 }
 0x3b1   : > { %v2887_v61 = vmul.f32 %v6325_v54, %v6133_v35  ;;  %v2888_v4 = vmul.f32 %v6325_v54, %v6138_v20  ;;  %v2889_v58 = vmul.f32 %v6325_v54, %v6143_v23  ;;  %v2890_v45 = vmul.f32 %v6325_v54, %v6148_v31 }
 0x3b2   : > { %v2861_v24 = vsel %vm2860_vm0, %v3576_v27, %v2857_v57  ;;  %v2891_v35 = vmul.f32 %v6325_v54, %v6153_v44  ;;  %v2900_v28 = vadd.f32 %v2884_v12, %v6995_v19  ;;  %v2901_v22 = vadd.f32 %v2885_v25, %v6996_v21  ;;  %v2924_v44 = vld [vmem:[#allocation5 + $0x40] sm:$0xff]  ;;  %v7002_v57 = vld [vmem:[#allocation114_spill] sm:$0xff]  ;;  %v2929_v12 = vld [vmem:[#allocation5 + $0x68] sm:$0xff] }
 0x3b3   : > { %v2866_v50 = vsel %vm2863_vm2, %v2865_v11, %v2861_v24  ;;  %v2902_v60 = vadd.f32 %v2886_v13, %v6997_v33  ;;  %v2892_v23 = vmul.f32 %v6325_v54, %v6158_v26  ;;  %v2903_v31 = vadd.f32 %v2887_v61, %v6998_v17  ;;  %v2928_v24 = vld [vmem:[#allocation5 + $0x60] sm:$0xff]  ;;  %v7008_v33 = vld [vmem:[#allocation126_spill] sm:$0xff] }
 0x3b4   : > { %v6333_v46 = vperm.slane %v2866_v50, 0  ;;  %v2904_v51 = vadd.f32 %v2888_v4, %v6999_v10  ;;  %v2893_v26 = vmul.f32 %v6325_v54, %v6163_v52  ;;  %v2905_v55 = vadd.f32 %v2889_v58, %v7000_v62  ;;  %v2930_v4 = vld [vmem:[#allocation5 + $0x70] sm:$0xff]  ;;  %v7010_v17 = vld [vmem:[#allocation130_spill] sm:$0xff] }
 0x3b5   : > { %v2894_v32 = vmul.f32 %v6325_v54, %v6182_v48  ;;  %v2906_v8 = vadd.f32 %v2890_v45, %v7001_v49  ;;  %v2895_v52 = vmul.f32 %v6325_v54, %v6203_v2  ;;  %v2907_v11 = vadd.f32 %v2891_v35, %v7002_v57  ;;  %v7006_v35 = vld [vmem:[#allocation122_spill] sm:$0xff] }
 0x3b6   : > { %v2933_v43 = vmul.f32 %v6333_v46, %v2916_v37  ;;  %v2934_v38 = vmul.f32 %v6333_v46, %v2917_v18  ;;  %v2935_v1 = vmul.f32 %v6333_v46, %v2918_v6  ;;  %v2936_v20 = vmul.f32 %v6333_v46, %v2919_v41  ;;  %v7003_v18 = vld [vmem:[#allocation116_spill] sm:$0xff]  ;;  %v7004_v41 = vld [vmem:[#allocation118_spill] sm:$0xff] }
 0x3b7   : > { %v2937_v0 = vmul.f32 %v6333_v46, %v2920_v36  ;;  %v2938_v14 = vmul.f32 %v6333_v46, %v2921_v53  ;;  %v2939_v40 = vmul.f32 %v6333_v46, %v2922_v5  ;;  %v2940_v30 = vmul.f32 %v6333_v46, %v2923_v15  ;;  %v7009_v15 = vld [vmem:[#allocation128_spill] sm:$0xff] }
 0x3b8   : > { %v6359_v34 = vadd.f32 %v2933_v43, %v2900_v28  ;;  %v6361_v39 = vadd.f32 %v2934_v38, %v2901_v22  ;;  %v6363_v27 = vadd.f32 %v2935_v1, %v2902_v60  ;;  %v2952_v47 = vadd.f32 %v2936_v20, %v2903_v31  ;;  %v7005_v43 = vld [vmem:[#allocation120_spill] sm:$0xff]  ;;  %v2931_v1 = vld [vmem:[#allocation5 + $0x78] sm:$0xff] }
 0x3b9   : > { %v2941_v9 = vmul.f32 %v6333_v46, %v2924_v44  ;;  %v2953_v3 = vadd.f32 %v2937_v0, %v2904_v51  ;;  %v2942_v50 = vmul.f32 %v6333_v46, %v2925_v29  ;;  %v2954_v37 = vadd.f32 %v2938_v14, %v2905_v55 }
 0x3ba   : > { %2965 = vst [vmem:[%s5045_s13 + $0x38] sm:$0xff] %v6359_v34  ;;  %v2896_v48 = vmul.f32 %v6325_v54, %v6213_v42  ;;  %v2908_v6 = vadd.f32 %v2892_v23, %v7003_v18  ;;  %v2943_v25 = vmul.f32 %v6333_v46, %v2926_v56  ;;  %v2955_v13 = vadd.f32 %v2939_v40, %v2906_v8 }
 0x3bb   : > { %2966 = vst [vmem:[%s5045_s13 + $0x78] sm:$0xff] %v6361_v39  ;;  %v2897_v2 = vmul.f32 %v6325_v54, %v6224_v59  ;;  %v2909_v61 = vadd.f32 %v2893_v26, %v7004_v41  ;;  %v2944_v36 = vmul.f32 %v6333_v46, %v2927_v63  ;;  %v2956_v53 = vadd.f32 %v2940_v30, %v2907_v11 }
 0x3bc   : > { %2967 = vst [vmem:[%s5045_s13 + $0xb8] sm:$0xff] %v6363_v27  ;;  %v2898_v42 = vmul.f32 %v6325_v54, %v6244_v7  ;;  %v2910_v38 = vadd.f32 %v2894_v32, %v7005_v43  ;;  %v2945_v58 = vmul.f32 %v6333_v46, %v2928_v24  ;;  %v2957_v45 = vadd.f32 %v2941_v9, %v2908_v6  ;;  %v7007_v7 = vld [vmem:[#allocation124_spill] sm:$0xff] }
 0x3bd   : > { %2968 = vst [vmem:[%s5045_s13 + $0xf8] sm:$0xff] %v2952_v47  ;;  %v2899_v59 = vmul.f32 %v6325_v54, %v6263_v16  ;;  %v2911_v5 = vadd.f32 %v2895_v52, %v7006_v35  ;;  %v2946_v20 = vmul.f32 %v6333_v46, %v2929_v12  ;;  %v2958_v19 = vadd.f32 %v2942_v50, %v2909_v61 }
 0x3be   : > { %2969 = vst [vmem:[%s5045_s13 + $0x138] sm:$0xff] %v2953_v3  ;;  %v2912_v28 = vadd.f32 %v2896_v48, %v7007_v7  ;;  %v2947_v21 = vmul.f32 %v6333_v46, %v2930_v4  ;;  %v2959_v22 = vadd.f32 %v2943_v25, %v2910_v38  ;;  %v2913_v60 = vadd.f32 %v2897_v2, %v7008_v33 }
 0x3bf   : > { %2970 = vst [vmem:[%s5045_s13 + $0x178] sm:$0xff] %v2954_v37  ;;  %v2948_v16 = vmul.f32 %v6333_v46, %v2931_v1  ;;  %v2960_v54 = vadd.f32 %v2944_v36, %v2911_v5  ;;  %v2914_v0 = vadd.f32 %v2898_v42, %v7009_v15  ;;  %v2915_v31 = vadd.f32 %v2899_v59, %v7010_v17 }
 0x3c0   : > { %2971 = vst [vmem:[%s5045_s13 + $0x1b8] sm:$0xff] %v2955_v13  ;;  %v2961_v23 = vadd.f32 %v2945_v58, %v2912_v28  ;;  %v2962_v10 = vadd.f32 %v2946_v20, %v2913_v60 }
 0x3c1   : > { %2972 = vst [vmem:[%s5045_s13 + $0x1f8] sm:$0xff] %v2956_v53  ;;  %v2963_v51 = vadd.f32 %v2947_v21, %v2914_v0  ;;  %v2964_v46 = vadd.f32 %v2948_v16, %v2915_v31 }
 0x3c2   : > { %2973 = vst [vmem:[%s5045_s13 + $0x238] sm:$0xff] %v2957_v45 }
 0x3c3   : > { %2974 = vst [vmem:[%s5045_s13 + $0x278] sm:$0xff] %v2958_v19 }
 0x3c4   : > { %2975 = vst [vmem:[%s5045_s13 + $0x2b8] sm:$0xff] %v2959_v22 }
 0x3c5   : > { %2976 = vst [vmem:[%s5045_s13 + $0x2f8] sm:$0xff] %v2960_v54 }
 0x3c6   : > { %2977 = vst [vmem:[%s5045_s13 + $0x338] sm:$0xff] %v2961_v23 }
 0x3c7   : > { %2978 = vst [vmem:[%s5045_s13 + $0x378] sm:$0xff] %v2962_v10 }
 0x3c8   : > { %2979 = vst [vmem:[%s5045_s13 + $0x3b8] sm:$0xff] %v2963_v51 }
 0x3c9   : > { %2980 = vst [vmem:[%s5045_s13 + $0x3f8] sm:$0xff] %v2964_v46 }
 0x3ca   : > { %3401 = vst [vmem:[%s5163_s10 + $0x380] sm:$0xff] %v6359_v34 }
 0x3cb   : > { %3402 = vst [vmem:[%s5163_s10 + $0x3c0] sm:$0xff] %v6361_v39 }
 0x3cc   : > { %3403 = vst [vmem:[%s5163_s10 + $0x388] sm:$0xff] %v6363_v27 }
 0x3cd   : > { %3404 = vst [vmem:[%s5163_s10 + $0x3c8] sm:$0xff] %v2952_v47 }
 0x3ce   : > { %3405 = vst [vmem:[%s5163_s10 + $0x390] sm:$0xff] %v2953_v3 }
 0x3cf   : > { %3406 = vst [vmem:[%s5163_s10 + $0x3d0] sm:$0xff] %v2954_v37 }
 0x3d0   : > { %3407 = vst [vmem:[%s5163_s10 + $0x398] sm:$0xff] %v2955_v13 }
 0x3d1   : > { %3408 = vst [vmem:[%s5163_s10 + $0x3d8] sm:$0xff] %v2956_v53 }
 0x3d2   : > { %3409 = vst [vmem:[%s5163_s10 + $0x3a0] sm:$0xff] %v2957_v45 }
 0x3d3   : > { %3410 = vst [vmem:[%s5163_s10 + $0x3e0] sm:$0xff] %v2958_v19 }
 0x3d4   : > { %3411 = vst [vmem:[%s5163_s10 + $0x3a8] sm:$0xff] %v2959_v22 }
 0x3d5   : > { %3412 = vst [vmem:[%s5163_s10 + $0x3e8] sm:$0xff] %v2960_v54 }
 0x3d6   : > { %3413 = vst [vmem:[%s5163_s10 + $0x3b0] sm:$0xff] %v2961_v23 }
 0x3d7   : > { %3414 = vst [vmem:[%s5163_s10 + $0x3f0] sm:$0xff] %v2962_v10 }
 0x3d8   : > { %3415 = vst [vmem:[%s5163_s10 + $0x3b8] sm:$0xff] %v2963_v51 }
 0x3d9   : > { %3416 = vst [vmem:[%s5163_s10 + $0x3f8] sm:$0xff] %v2964_v46 }
 0x3da   : > { %3696 = shalt.err (!%p3693_p10)
}
 0x3db   : > { %s3780_s10 = smov 1024   ;;  %s3781_s14 = smov 64  }
 0x3dc   : > { %3441 = dma.vmem_to_hbm [thread:$0]  (%p3890_p5), %s6441_s26, 16384, %s3020_s29, %s2999_s17, %s3780_s10, %s3780_s10, %s3781_s14  }
 0x3dd   : > { %s3004_s16 = scalar_lea.sflag [#allocation10], %s3920_s11  ;;  %s3711_s13 = sshra.s32 %s6450_s25, 4  ;;  %s3712_s13 = int_to_ptr.hbm [resolvable:$true] %s3711_s13 }
 0x3de   : > { %s3713_s8 = scalar_lea.hbm %s3712_s13, 1024  ;;  %s3717_s18 = scalar_lea.hbm %s6503_s6, 2048 }
 0x3df   : > { %p3714_p12 = scmp.ne.s32.totalorder %s3712_s13, %s3713_s8  ;;  %p3718_p3 = scmp.lt.s32.totalorder %s3712_s13, %s6503_s6 }
 0x3e0   : > { %p3719_p7 = scmp.lt.s32.totalorder %s3717_s18, %s3713_s8 }
 0x3e1   : > { %p3715_p13 = pnand %p3714_p12, %p3890_p5 }
 0x3e2   : > { %p3720_p1 = por %p3719_p7, %p3718_p3 }
 0x3e3   : > { %p3716_p0 = pneg %p3715_p13 }
 0x3e5   : > { %p3721_p4 = pnand %p3720_p1, %p3716_p0 }
 0x3e7   : > { %3724 = shalt.err (!%p3721_p4)
}
 0x3e8   : > { %s3782_s11 = smov 2048  }
 0x3e9   : > { %3442 = dma.vmem_to_hbm [thread:$0]  (%p3890_p5), %s6447_s9, 16384, %s6450_s25, %s3004_s16, %s3780_s10, %s3782_s11, %s3781_s14  }
 0x3ea PF: > { %s3051_s26 = sand.u32 1, %s3759_s21   ;;  %p7011_p8 = scmp.ge.s32.totalorder %s3771_s24, 2 }
 0x3eb   : > { %s3052_s29 = scalar_lea.sflag [#allocation4], %s3051_s26 }
 0x3ec   : > { %p3457_p11 = pnand %p7011_p8, %p3853_p6 }
 0x3ee   : > { %p3458_p9 = pneg %p3457_p11 }
 0x3f0   : > { %3750 = dma.done.wait (%p3458_p9), %s3052_s29, 16384  }
 0x3f1   : > { %3752 = vsyncadd (%p3458_p9), %s3052_s29, 4294950912  ;;  %s3062_s17 = scalar_lea.sflag [#allocation10], %s3051_s26 }
 0x3f2   : > { %3754 = dma.done.wait (%p3458_p9), %s3062_s17, 16384  }
 0x3f3   : > { %3756 = vsyncadd (%p3458_p9), %s3062_s17, 4294950912  ;;  %p24_p5 = scmp.ge.s32.totalorder %s3877_s20, 4   ;;  %s7012_s21 = smov %s3763_s22 }
 0x3f4   : > { %s7013_s22 = smov %s3767_s23  ;;  %s7014_s23 = smov %s3886_s30 }
 0x3f5   : > { %s7015_s24 = smov %s3877_s20  ;;  %26 = sbr.rel (!%p24_p5) target bundleno = 8 (0x8), region = 124 }
 0x3fa   :  { %3068 = vsyncpa [#allocation3], 1 }
 0x3fb   :  { %3070 = vsyncpa [#allocation3 + $0x1], 1 }
 0x3fc   :  { %3071 = vsyncpa [#allocation6], 1 }
 0x3fd   :  { %3072 = vsyncpa [#allocation4], 1 }
 0x3fe   :  { %3074 = vsyncpa [#allocation4 + $0x1], 1 }
 0x3ff   :  { %3075 = vsyncpa [#allocation10], 1 }
 0x400   :  { %3077 = vsyncpa [#allocation10 + $0x1], 1 }

</bundles_post_ra>
